<compile_context>
chip_gen: v7x
topology: tpu7x:2x2x1
jax: 0.10.0
libtpu: 0.0.40
codegen_flags: <defaults>
</compile_context>

<pallas_src>
import functools

import jax
import jax.numpy as jnp
from jax.experimental import pallas as pl
from jax.experimental.pallas import tpu as pltpu

GRAVITY = 9.81
L = 1.0
DT = 0.1
_LANE = 128


def _round_up(n, m):
    return ((n + m - 1) // m) * m


# ----------------------------- fused Pallas kernel ---------------------------
def _informed_rwm_kernel(x_ref, ew1_ref, dw1_ref, wrest_ref, bias_ref, out_ref,
                         *, context, forecast, dt, g, l):
    """Encoder MLP -> unrolled pendulum rollout -> decoder MLP, all in vregs/VMEM."""
    f32 = jnp.float32
    HI = jax.lax.Precision.HIGHEST

    def mlp4(h, w_first_ref, rest_base, bias_base):
        # (Linear + ReLU) x 3 -> Linear; everything zero-padded to 128 lanes.
        h = jnp.dot(h, w_first_ref[...], preferred_element_type=f32, precision=HI)
        h = jnp.maximum(h + bias_ref[bias_base:bias_base + 1, :], 0.0)
        for i in range(2):
            h = jnp.dot(h, wrest_ref[rest_base + i], preferred_element_type=f32,
                        precision=HI)
            h = jnp.maximum(h + bias_ref[bias_base + 1 + i:bias_base + 2 + i, :], 0.0)
        h = jnp.dot(h, wrest_ref[rest_base + 2], preferred_element_type=f32,
                    precision=HI)
        return h + bias_ref[bias_base + 3:bias_base + 4, :]

    # ---- encoder ----
    zc = mlp4(x_ref[...], ew1_ref, 0, 0)          # (bb, 128); lanes >= 3*context are 0

    # ---- pendulum dynamics rollout (static unroll, state kept in vregs) ----
    base = 3 * context
    last = zc[:, base - 3:base]                   # last context latent, one slice
    xx, yy, td = last[:, 0:1], last[:, 1:2], last[:, 2:3]

    # Step 0 only: theta = atan2(yy, xx) + pi/2, carried as (cos, sin), with one
    # renormalization.  cos = -yy/r, sin = xx/r; atan2(0,0)=0 -> theta = pi/2.
    r2 = xx * xx + yy * yy
    ok = r2 > 0.0
    inv = jnp.where(ok, jax.lax.rsqrt(jnp.where(ok, r2, 1.0)), 1.0)
    c = jnp.where(ok, -yy * inv, 0.0)
    s = jnp.where(ok, xx * inv, 1.0)

    bb, wpad = zc.shape
    lane = jax.lax.broadcasted_iota(jnp.int32, (bb, wpad), 1)
    zt = zc                                        # lanes >= base are exactly zero
    for i in range(forecast):
        if i > 0:
            # per-call theta = atan2(y, x) + pi/2 on a unit-norm (x, y): just a
            # quarter-turn rotation, no rsqrt / selects needed.
            c, s = -s, c
        # symplectic step: theta += td*dt ; td += dt * (-(g/l) * sin(theta))
        d = td * dt
        cd, sd = jnp.cos(d), jnp.sin(d)
        c, s = c * cd - s * sd, s * cd + c * sd
        td = td + dt * (-(g / l) * s)
        j = base + 3 * i
        zt = jnp.where(lane == j, c, zt)           # in-register z_total assembly
        zt = jnp.where(lane == j + 1, s, zt)
        zt = jnp.where(lane == j + 2, td, zt)

    # ---- decoder ----  (single lane-dense store of the whole output block)
    out_ref[...] = mlp4(zt, dw1_ref, 3, 4).astype(out_ref.dtype)


# ------------------------------- weight packing -------------------------------
def pack_params(enc_params, dec_params, *, in_dim, wpad=_LANE):
    """Fuse the 8 Linear layers into 4 lane-dense, zero-padded stacks."""
    def pad_w(w, rows, cols):
        p = jnp.zeros((rows, cols), jnp.float32)
        return p.at[: w.shape[0], : w.shape[1]].set(w.astype(jnp.float32))

    def pad_b(b, cols):
        p = jnp.zeros((cols,), jnp.float32)
        return p.at[: b.shape[0]].set(b.astype(jnp.float32))

    in_pad = _round_up(in_dim, _LANE)
    ew1 = pad_w(enc_params[0][0], in_pad, wpad)                          # (in_pad, 128)
    dw1 = pad_w(dec_params[0][0], wpad, wpad)                            # (128, 128)
    wrest = jnp.stack([pad_w(w, wpad, wpad) for (w, _) in enc_params[1:]]
                      + [pad_w(w, wpad, wpad) for (w, _) in dec_params[1:]])  # (6,128,128)
    bias = jnp.stack([pad_b(b, wpad) for (_, b) in enc_params]
                     + [pad_b(b, wpad) for (_, b) in dec_params])        # (8, 128)
    return ew1, dw1, wrest, bias


# ------------------------------- full forward ---------------------------------
def informed_rwm_forward(x, packed, *, observable_dim, context, forecast,
                         dt=DT, g=GRAVITY, l=L, block_b=256):
    ew1, dw1, wrest, bias = packed
    in_pad, wpad = ew1.shape
    B = x.shape[0]

    bb = min(_round_up(B, 8), block_b)             # batch block (sublane aligned)
    B_pad = _round_up(B, bb)
    xp = jnp.zeros((B_pad, in_pad), jnp.float32).at[:B, : x.shape[1]].set(
        x.astype(jnp.float32))

    flops = 2 * B_pad * (in_pad * wpad + 7 * wpad * wpad)
    cost = pl.CostEstimate(
        flops=int(flops),
        transcendentals=int(3 * B_pad * forecast),
        bytes_accessed=int(4 * (xp.size + ew1.size + dw1.size + wrest.size
                                + bias.size + B_pad * wpad)))

    out = pl.pallas_call(
        functools.partial(_informed_rwm_kernel, context=context, forecast=forecast,
                          dt=dt, g=g, l=l),
        out_shape=jax.ShapeDtypeStruct((B_pad, wpad), jnp.float32),
        grid_spec=pltpu.PrefetchScalarGridSpec(
            num_scalar_prefetch=0,
            grid=(B_pad // bb,),
            in_specs=[
                pl.BlockSpec((bb, in_pad), lambda i: (i, 0)),   # x: blocked over batch
                pl.BlockSpec(ew1.shape, lambda i: (0, 0)),      # weights: constant
                pl.BlockSpec(dw1.shape, lambda i: (0, 0)),      #   index_map -> DMA'd
                pl.BlockSpec(wrest.shape, lambda i: (0, 0, 0)), #   once, VMEM-resident
                pl.BlockSpec(bias.shape, lambda i: (0, 0)),
            ],
            out_specs=pl.BlockSpec((bb, wpad), lambda i: (i, 0)),
        ),
        compiler_params=pltpu.CompilerParams(dimension_semantics=("parallel",)),
        cost_estimate=cost,
    )(xp, ew1, dw1, wrest, bias)

    # padded (B_pad, 128) -> real (B, forecast, observable_dim)
    return out[:B, : observable_dim * forecast].reshape(B, forecast, observable_dim)


# ------------------------------ parameter init --------------------------------
def init_linear(key, fan_in, fan_out):
    kw, kb = jax.random.split(key)
    bound = 1.0 / (fan_in ** 0.5)
    w = jax.random.uniform(kw, (fan_in, fan_out), jnp.float32, -bound, bound)
    b = jax.random.uniform(kb, (fan_out,), jnp.float32, -bound, bound)
    return w, b


def init_mlp(key, dims):
    keys = jax.random.split(key, len(dims) - 1)
    return [init_linear(k, dims[i], dims[i + 1]) for i, k in enumerate(keys)]


# --------------------------- plain-JAX reference ------------------------------
def reference_forward(x, enc_params, dec_params, context, forecast,
                      dt=DT, g=GRAVITY, l=L):
    def mlp(h, params):
        for i, (w, b) in enumerate(params):
            h = jnp.dot(h, w, precision=jax.lax.Precision.HIGHEST) + b
            if i < len(params) - 1:
                h = jnp.maximum(h, 0.0)
        return h

    B = x.shape[0]
    zc = mlp(x, enc_params)
    z = zc.reshape(B, context, 3)[:, -1, :]
    steps = []
    for _ in range(forecast):
        xx, yy, td = z[:, 0], z[:, 1], z[:, 2]
        theta = jnp.arctan2(yy, xx) + jnp.pi / 2
        theta = theta + td * dt
        td = td + dt * (-(g / l) * jnp.sin(theta))
        z = jnp.stack([jnp.cos(theta), jnp.sin(theta), td], axis=1)
        steps.append(z)
    zf = jnp.stack(steps, axis=1)
    zt = jnp.concatenate([zc.reshape(B, context, 3), zf], axis=1).reshape(B, -1)
    out = mlp(zt, dec_params)
    return out.reshape(B, forecast, -1)


if __name__ == "__main__":
    observable_dim = 12
    hidden_dim = 30
    context = 32
    forecast = 8
    B = 2

    root = jax.random.PRNGKey(0)
    k_enc, k_dec, k_x = jax.random.split(root, 3)

    enc_params = init_mlp(
        k_enc, [observable_dim * context, hidden_dim, hidden_dim, hidden_dim, 3 * context]
    )
    dec_params = init_mlp(
        k_dec,
        [3 * (forecast + context), hidden_dim, hidden_dim, hidden_dim,
         observable_dim * forecast],
    )
    x = jax.random.normal(k_x, (B, observable_dim * context), dtype=jnp.float32)

    # one-time packing into lane-dense zero-padded stacks (4 refs total)
    packed = pack_params(enc_params, dec_params, in_dim=observable_dim * context)

    fwd = jax.jit(functools.partial(informed_rwm_forward,
                                    observable_dim=observable_dim,
                                    context=context, forecast=forecast))
    out = fwd(x, packed)
    jax.block_until_ready(out)
    assert out.shape == (B, forecast, observable_dim), out.shape

    # correctness check against a plain-JAX reference (atan2-based dynamics)
    ref = reference_forward(x, enc_params, dec_params, context, forecast)
    err = float(jnp.max(jnp.abs(out - ref)))
    assert err < 1e-3, f"max abs error vs reference: {err}"

    print("KERNEL_OK")
</pallas_src>

<mosaic_0001>
module attributes {stable_mosaic.version = 11 : i64} {
  func.func @_informed_rwm_kernel(%arg0: i32, %arg1: memref<8x384xf32, #tpu.memory_space<vmem>>, %arg2: memref<384x128xf32, #tpu.memory_space<vmem>>, %arg3: memref<128x128xf32, #tpu.memory_space<vmem>>, %arg4: memref<6x128x128xf32, #tpu.memory_space<vmem>>, %arg5: memref<8x128xf32, #tpu.memory_space<vmem>>, %arg6: memref<8x128xf32, #tpu.memory_space<vmem>>) attributes {dimension_semantics = [#tpu.dimension_semantics<parallel>], iteration_bounds = array<i64: 1>, scalar_prefetch = 0 : i64, scratch_operands = 0 : i64, tpu.core_type = #tpu.core_type<tc>, window_params = [{transform_indices = @transform_0, window_bounds = array<i64: 8, 384>}, {pipeline_mode = #tpu.pipeline_mode<synchronous>, transform_indices = @transform_1, window_bounds = array<i64: 384, 128>}, {pipeline_mode = #tpu.pipeline_mode<synchronous>, transform_indices = @transform_2, window_bounds = array<i64: 128, 128>}, {pipeline_mode = #tpu.pipeline_mode<synchronous>, transform_indices = @transform_3, window_bounds = array<i64: 6, 128, 128>}, {pipeline_mode = #tpu.pipeline_mode<synchronous>, transform_indices = @transform_4, window_bounds = array<i64: 8, 128>}, {transform_indices = @transform_5, window_bounds = array<i64: 8, 128>}]} {
    %c0 = arith.constant 0 : index
    %c0_0 = arith.constant 0 : index
    %0 = vector.load %arg1[%c0, %c0_0] : memref<8x384xf32, #tpu.memory_space<vmem>>, vector<8x384xf32>
    %c0_1 = arith.constant 0 : index
    %c0_2 = arith.constant 0 : index
    %1 = vector.load %arg2[%c0_1, %c0_2] : memref<384x128xf32, #tpu.memory_space<vmem>>, vector<384x128xf32>
    %cst = arith.constant dense<0.000000e+00> : vector<8x128xf32>
    %2 = tpu.matmul %0, %1, %cst {dimension_numbers = #tpu.dot_dimension_numbers<[1], [0], [0], [1], [0, 0, 1, 1], [], []>, precision = #tpu.contract_precision<fp32>} : vector<8x384xf32>, vector<384x128xf32>, vector<8x128xf32> -> vector<8x128xf32>
    %c0_3 = arith.constant 0 : index
    %c0_4 = arith.constant 0 : index
    %3 = vector.load %arg5[%c0_3, %c0_4] : memref<8x128xf32, #tpu.memory_space<vmem>>, vector<1x128xf32>
    %4 = vector.broadcast %3 : vector<1x128xf32> to vector<8x128xf32>
    %5 = arith.addf %2, %4 : vector<8x128xf32>
    %cst_5 = arith.constant 0.000000e+00 : f32
    %6 = vector.broadcast %cst_5 : f32 to vector<8x128xf32>
    %7 = arith.maximumf %5, %6 : vector<8x128xf32>
    %c0_6 = arith.constant 0 : index
    %c0_7 = arith.constant 0 : index
    %c0_8 = arith.constant 0 : index
    %8 = vector.load %arg4[%c0_6, %c0_7, %c0_8] : memref<6x128x128xf32, #tpu.memory_space<vmem>>, vector<1x128x128xf32>
    %9 = vector.shape_cast %8 : vector<1x128x128xf32> to vector<128x128xf32>
    %cst_9 = arith.constant dense<0.000000e+00> : vector<8x128xf32>
    %10 = tpu.matmul %7, %9, %cst_9 {dimension_numbers = #tpu.dot_dimension_numbers<[1], [0], [0], [1], [0, 0, 1, 1], [], []>, precision = #tpu.contract_precision<fp32>} : vector<8x128xf32>, vector<128x128xf32>, vector<8x128xf32> -> vector<8x128xf32>
    %c1 = arith.constant 1 : index
    %c0_10 = arith.constant 0 : index
    %11 = vector.load %arg5[%c1, %c0_10] : memref<8x128xf32, #tpu.memory_space<vmem>>, vector<1x128xf32>
    %12 = vector.broadcast %11 : vector<1x128xf32> to vector<8x128xf32>
    %13 = arith.addf %10, %12 : vector<8x128xf32>
    %cst_11 = arith.constant 0.000000e+00 : f32
    %14 = vector.broadcast %cst_11 : f32 to vector<8x128xf32>
    %15 = arith.maximumf %13, %14 : vector<8x128xf32>
    %c1_12 = arith.constant 1 : index
    %c0_13 = arith.constant 0 : index
    %c0_14 = arith.constant 0 : index
    %16 = vector.load %arg4[%c1_12, %c0_13, %c0_14] : memref<6x128x128xf32, #tpu.memory_space<vmem>>, vector<1x128x128xf32>
    %17 = vector.shape_cast %16 : vector<1x128x128xf32> to vector<128x128xf32>
    %cst_15 = arith.constant dense<0.000000e+00> : vector<8x128xf32>
    %18 = tpu.matmul %15, %17, %cst_15 {dimension_numbers = #tpu.dot_dimension_numbers<[1], [0], [0], [1], [0, 0, 1, 1], [], []>, precision = #tpu.contract_precision<fp32>} : vector<8x128xf32>, vector<128x128xf32>, vector<8x128xf32> -> vector<8x128xf32>
    %c2 = arith.constant 2 : index
    %c0_16 = arith.constant 0 : index
    %19 = vector.load %arg5[%c2, %c0_16] : memref<8x128xf32, #tpu.memory_space<vmem>>, vector<1x128xf32>
    %20 = vector.broadcast %19 : vector<1x128xf32> to vector<8x128xf32>
    %21 = arith.addf %18, %20 : vector<8x128xf32>
    %cst_17 = arith.constant 0.000000e+00 : f32
    %22 = vector.broadcast %cst_17 : f32 to vector<8x128xf32>
    %23 = arith.maximumf %21, %22 : vector<8x128xf32>
    %c2_18 = arith.constant 2 : index
    %c0_19 = arith.constant 0 : index
    %c0_20 = arith.constant 0 : index
    %24 = vector.load %arg4[%c2_18, %c0_19, %c0_20] : memref<6x128x128xf32, #tpu.memory_space<vmem>>, vector<1x128x128xf32>
    %25 = vector.shape_cast %24 : vector<1x128x128xf32> to vector<128x128xf32>
    %cst_21 = arith.constant dense<0.000000e+00> : vector<8x128xf32>
    %26 = tpu.matmul %23, %25, %cst_21 {dimension_numbers = #tpu.dot_dimension_numbers<[1], [0], [0], [1], [0, 0, 1, 1], [], []>, precision = #tpu.contract_precision<fp32>} : vector<8x128xf32>, vector<128x128xf32>, vector<8x128xf32> -> vector<8x128xf32>
    %c3 = arith.constant 3 : index
    %c0_22 = arith.constant 0 : index
    %27 = vector.load %arg5[%c3, %c0_22] : memref<8x128xf32, #tpu.memory_space<vmem>>, vector<1x128xf32>
    %28 = vector.broadcast %27 : vector<1x128xf32> to vector<8x128xf32>
    %29 = arith.addf %26, %28 : vector<8x128xf32>
    %30 = vector.extract_strided_slice %29 {offsets = [0, 93], sizes = [8, 3], strides = [1, 1]} : vector<8x128xf32> to vector<8x3xf32>
    %31 = vector.extract_strided_slice %30 {offsets = [0, 0], sizes = [8, 1], strides = [1, 1]} : vector<8x3xf32> to vector<8x1xf32>
    %32 = vector.extract_strided_slice %30 {offsets = [0, 1], sizes = [8, 1], strides = [1, 1]} : vector<8x3xf32> to vector<8x1xf32>
    %33 = vector.extract_strided_slice %30 {offsets = [0, 2], sizes = [8, 1], strides = [1, 1]} : vector<8x3xf32> to vector<8x1xf32>
    %34 = arith.mulf %31, %31 : vector<8x1xf32>
    %35 = arith.mulf %32, %32 : vector<8x1xf32>
    %36 = arith.addf %34, %35 : vector<8x1xf32>
    %cst_23 = arith.constant 0.000000e+00 : f32
    %37 = vector.broadcast %cst_23 : f32 to vector<8x1xf32>
    %38 = arith.cmpf ogt, %36, %37 : vector<8x1xf32>
    %cst_24 = arith.constant 1.000000e+00 : f32
    %39 = vector.broadcast %cst_24 : f32 to vector<8x1xf32>
    %40 = arith.select %38, %36, %39 : vector<8x1xi1>, vector<8x1xf32>
    %41 = math.rsqrt %40 : vector<8x1xf32>
    %cst_25 = arith.constant 1.000000e+00 : f32
    %42 = vector.broadcast %cst_25 : f32 to vector<8x1xf32>
    %43 = arith.select %38, %41, %42 : vector<8x1xi1>, vector<8x1xf32>
    %cst_26 = arith.constant 0.000000e+00 : f32
    %44 = vector.broadcast %cst_26 : f32 to vector<8x1xf32>
    %45 = arith.subf %44, %32 : vector<8x1xf32>
    %46 = arith.mulf %45, %43 : vector<8x1xf32>
    %cst_27 = arith.constant 0.000000e+00 : f32
    %47 = vector.broadcast %cst_27 : f32 to vector<8x1xf32>
    %48 = arith.select %38, %46, %47 : vector<8x1xi1>, vector<8x1xf32>
    %49 = arith.mulf %31, %43 : vector<8x1xf32>
    %cst_28 = arith.constant 1.000000e+00 : f32
    %50 = vector.broadcast %cst_28 : f32 to vector<8x1xf32>
    %51 = arith.select %38, %49, %50 : vector<8x1xi1>, vector<8x1xf32>
    %52 = tpu.iota {dimensions = array<i32: 1>} : vector<8x128xi32>
    %cst_29 = arith.constant 1.000000e-01 : f32
    %53 = vector.broadcast %cst_29 : f32 to vector<8x1xf32>
    %54 = arith.mulf %33, %53 : vector<8x1xf32>
    %55 = math.cos %54 : vector<8x1xf32>
    %56 = math.sin %54 : vector<8x1xf32>
    %57 = arith.mulf %48, %55 : vector<8x1xf32>
    %58 = arith.mulf %51, %56 : vector<8x1xf32>
    %59 = arith.subf %57, %58 : vector<8x1xf32>
    %60 = arith.mulf %51, %55 : vector<8x1xf32>
    %61 = arith.mulf %48, %56 : vector<8x1xf32>
    %62 = arith.addf %60, %61 : vector<8x1xf32>
    %cst_30 = arith.constant -9.810000e+00 : f32
    %63 = vector.broadcast %cst_30 : f32 to vector<8x1xf32>
    %64 = arith.mulf %63, %62 : vector<8x1xf32>
    %cst_31 = arith.constant 1.000000e-01 : f32
    %65 = vector.broadcast %cst_31 : f32 to vector<8x1xf32>
    %66 = arith.mulf %65, %64 : vector<8x1xf32>
    %67 = arith.addf %33, %66 : vector<8x1xf32>
    %c96_i32 = arith.constant 96 : i32
    %68 = vector.broadcast %c96_i32 : i32 to vector<8x128xi32>
    %69 = arith.cmpi eq, %52, %68 : vector<8x128xi32>
    %70 = vector.shape_cast %59 : vector<8x1xf32> to vector<8x1xf32>
    %71 = vector.broadcast %70 : vector<8x1xf32> to vector<8x128xf32>
    %72 = arith.select %69, %71, %29 : vector<8x128xi1>, vector<8x128xf32>
    %c97_i32 = arith.constant 97 : i32
    %73 = vector.broadcast %c97_i32 : i32 to vector<8x128xi32>
    %74 = arith.cmpi eq, %52, %73 : vector<8x128xi32>
    %75 = vector.shape_cast %62 : vector<8x1xf32> to vector<8x1xf32>
    %76 = vector.broadcast %75 : vector<8x1xf32> to vector<8x128xf32>
    %77 = arith.select %74, %76, %72 : vector<8x128xi1>, vector<8x128xf32>
    %c98_i32 = arith.constant 98 : i32
    %78 = vector.broadcast %c98_i32 : i32 to vector<8x128xi32>
    %79 = arith.cmpi eq, %52, %78 : vector<8x128xi32>
    %80 = vector.shape_cast %67 : vector<8x1xf32> to vector<8x1xf32>
    %81 = vector.broadcast %80 : vector<8x1xf32> to vector<8x128xf32>
    %82 = arith.select %79, %81, %77 : vector<8x128xi1>, vector<8x128xf32>
    %cst_32 = arith.constant 0.000000e+00 : f32
    %83 = vector.broadcast %cst_32 : f32 to vector<8x1xf32>
    %84 = arith.subf %83, %62 : vector<8x1xf32>
    %cst_33 = arith.constant 1.000000e-01 : f32
    %85 = vector.broadcast %cst_33 : f32 to vector<8x1xf32>
    %86 = arith.mulf %67, %85 : vector<8x1xf32>
    %87 = math.cos %86 : vector<8x1xf32>
    %88 = math.sin %86 : vector<8x1xf32>
    %89 = arith.mulf %84, %87 : vector<8x1xf32>
    %90 = arith.mulf %59, %88 : vector<8x1xf32>
    %91 = arith.subf %89, %90 : vector<8x1xf32>
    %92 = arith.mulf %59, %87 : vector<8x1xf32>
    %93 = arith.mulf %84, %88 : vector<8x1xf32>
    %94 = arith.addf %92, %93 : vector<8x1xf32>
    %cst_34 = arith.constant -9.810000e+00 : f32
    %95 = vector.broadcast %cst_34 : f32 to vector<8x1xf32>
    %96 = arith.mulf %95, %94 : vector<8x1xf32>
    %cst_35 = arith.constant 1.000000e-01 : f32
    %97 = vector.broadcast %cst_35 : f32 to vector<8x1xf32>
    %98 = arith.mulf %97, %96 : vector<8x1xf32>
    %99 = arith.addf %67, %98 : vector<8x1xf32>
    %c99_i32 = arith.constant 99 : i32
    %100 = vector.broadcast %c99_i32 : i32 to vector<8x128xi32>
    %101 = arith.cmpi eq, %52, %100 : vector<8x128xi32>
    %102 = vector.shape_cast %91 : vector<8x1xf32> to vector<8x1xf32>
    %103 = vector.broadcast %102 : vector<8x1xf32> to vector<8x128xf32>
    %104 = arith.select %101, %103, %82 : vector<8x128xi1>, vector<8x128xf32>
    %c100_i32 = arith.constant 100 : i32
    %105 = vector.broadcast %c100_i32 : i32 to vector<8x128xi32>
    %106 = arith.cmpi eq, %52, %105 : vector<8x128xi32>
    %107 = vector.shape_cast %94 : vector<8x1xf32> to vector<8x1xf32>
    %108 = vector.broadcast %107 : vector<8x1xf32> to vector<8x128xf32>
    %109 = arith.select %106, %108, %104 : vector<8x128xi1>, vector<8x128xf32>
    %c101_i32 = arith.constant 101 : i32
    %110 = vector.broadcast %c101_i32 : i32 to vector<8x128xi32>
    %111 = arith.cmpi eq, %52, %110 : vector<8x128xi32>
    %112 = vector.shape_cast %99 : vector<8x1xf32> to vector<8x1xf32>
    %113 = vector.broadcast %112 : vector<8x1xf32> to vector<8x128xf32>
    %114 = arith.select %111, %113, %109 : vector<8x128xi1>, vector<8x128xf32>
    %cst_36 = arith.constant 0.000000e+00 : f32
    %115 = vector.broadcast %cst_36 : f32 to vector<8x1xf32>
    %116 = arith.subf %115, %94 : vector<8x1xf32>
    %cst_37 = arith.constant 1.000000e-01 : f32
    %117 = vector.broadcast %cst_37 : f32 to vector<8x1xf32>
    %118 = arith.mulf %99, %117 : vector<8x1xf32>
    %119 = math.cos %118 : vector<8x1xf32>
    %120 = math.sin %118 : vector<8x1xf32>
    %121 = arith.mulf %116, %119 : vector<8x1xf32>
    %122 = arith.mulf %91, %120 : vector<8x1xf32>
    %123 = arith.subf %121, %122 : vector<8x1xf32>
    %124 = arith.mulf %91, %119 : vector<8x1xf32>
    %125 = arith.mulf %116, %120 : vector<8x1xf32>
    %126 = arith.addf %124, %125 : vector<8x1xf32>
    %cst_38 = arith.constant -9.810000e+00 : f32
    %127 = vector.broadcast %cst_38 : f32 to vector<8x1xf32>
    %128 = arith.mulf %127, %126 : vector<8x1xf32>
    %cst_39 = arith.constant 1.000000e-01 : f32
    %129 = vector.broadcast %cst_39 : f32 to vector<8x1xf32>
    %130 = arith.mulf %129, %128 : vector<8x1xf32>
    %131 = arith.addf %99, %130 : vector<8x1xf32>
    %c102_i32 = arith.constant 102 : i32
    %132 = vector.broadcast %c102_i32 : i32 to vector<8x128xi32>
    %133 = arith.cmpi eq, %52, %132 : vector<8x128xi32>
    %134 = vector.shape_cast %123 : vector<8x1xf32> to vector<8x1xf32>
    %135 = vector.broadcast %134 : vector<8x1xf32> to vector<8x128xf32>
    %136 = arith.select %133, %135, %114 : vector<8x128xi1>, vector<8x128xf32>
    %c103_i32 = arith.constant 103 : i32
    %137 = vector.broadcast %c103_i32 : i32 to vector<8x128xi32>
    %138 = arith.cmpi eq, %52, %137 : vector<8x128xi32>
    %139 = vector.shape_cast %126 : vector<8x1xf32> to vector<8x1xf32>
    %140 = vector.broadcast %139 : vector<8x1xf32> to vector<8x128xf32>
    %141 = arith.select %138, %140, %136 : vector<8x128xi1>, vector<8x128xf32>
    %c104_i32 = arith.constant 104 : i32
    %142 = vector.broadcast %c104_i32 : i32 to vector<8x128xi32>
    %143 = arith.cmpi eq, %52, %142 : vector<8x128xi32>
    %144 = vector.shape_cast %131 : vector<8x1xf32> to vector<8x1xf32>
    %145 = vector.broadcast %144 : vector<8x1xf32> to vector<8x128xf32>
    %146 = arith.select %143, %145, %141 : vector<8x128xi1>, vector<8x128xf32>
    %cst_40 = arith.constant 0.000000e+00 : f32
    %147 = vector.broadcast %cst_40 : f32 to vector<8x1xf32>
    %148 = arith.subf %147, %126 : vector<8x1xf32>
    %cst_41 = arith.constant 1.000000e-01 : f32
    %149 = vector.broadcast %cst_41 : f32 to vector<8x1xf32>
    %150 = arith.mulf %131, %149 : vector<8x1xf32>
    %151 = math.cos %150 : vector<8x1xf32>
    %152 = math.sin %150 : vector<8x1xf32>
    %153 = arith.mulf %148, %151 : vector<8x1xf32>
    %154 = arith.mulf %123, %152 : vector<8x1xf32>
    %155 = arith.subf %153, %154 : vector<8x1xf32>
    %156 = arith.mulf %123, %151 : vector<8x1xf32>
    %157 = arith.mulf %148, %152 : vector<8x1xf32>
    %158 = arith.addf %156, %157 : vector<8x1xf32>
    %cst_42 = arith.constant -9.810000e+00 : f32
    %159 = vector.broadcast %cst_42 : f32 to vector<8x1xf32>
    %160 = arith.mulf %159, %158 : vector<8x1xf32>
    %cst_43 = arith.constant 1.000000e-01 : f32
    %161 = vector.broadcast %cst_43 : f32 to vector<8x1xf32>
    %162 = arith.mulf %161, %160 : vector<8x1xf32>
    %163 = arith.addf %131, %162 : vector<8x1xf32>
    %c105_i32 = arith.constant 105 : i32
    %164 = vector.broadcast %c105_i32 : i32 to vector<8x128xi32>
    %165 = arith.cmpi eq, %52, %164 : vector<8x128xi32>
    %166 = vector.shape_cast %155 : vector<8x1xf32> to vector<8x1xf32>
    %167 = vector.broadcast %166 : vector<8x1xf32> to vector<8x128xf32>
    %168 = arith.select %165, %167, %146 : vector<8x128xi1>, vector<8x128xf32>
    %c106_i32 = arith.constant 106 : i32
    %169 = vector.broadcast %c106_i32 : i32 to vector<8x128xi32>
    %170 = arith.cmpi eq, %52, %169 : vector<8x128xi32>
    %171 = vector.shape_cast %158 : vector<8x1xf32> to vector<8x1xf32>
    %172 = vector.broadcast %171 : vector<8x1xf32> to vector<8x128xf32>
    %173 = arith.select %170, %172, %168 : vector<8x128xi1>, vector<8x128xf32>
    %c107_i32 = arith.constant 107 : i32
    %174 = vector.broadcast %c107_i32 : i32 to vector<8x128xi32>
    %175 = arith.cmpi eq, %52, %174 : vector<8x128xi32>
    %176 = vector.shape_cast %163 : vector<8x1xf32> to vector<8x1xf32>
    %177 = vector.broadcast %176 : vector<8x1xf32> to vector<8x128xf32>
    %178 = arith.select %175, %177, %173 : vector<8x128xi1>, vector<8x128xf32>
    %cst_44 = arith.constant 0.000000e+00 : f32
    %179 = vector.broadcast %cst_44 : f32 to vector<8x1xf32>
    %180 = arith.subf %179, %158 : vector<8x1xf32>
    %cst_45 = arith.constant 1.000000e-01 : f32
    %181 = vector.broadcast %cst_45 : f32 to vector<8x1xf32>
    %182 = arith.mulf %163, %181 : vector<8x1xf32>
    %183 = math.cos %182 : vector<8x1xf32>
    %184 = math.sin %182 : vector<8x1xf32>
    %185 = arith.mulf %180, %183 : vector<8x1xf32>
    %186 = arith.mulf %155, %184 : vector<8x1xf32>
    %187 = arith.subf %185, %186 : vector<8x1xf32>
    %188 = arith.mulf %155, %183 : vector<8x1xf32>
    %189 = arith.mulf %180, %184 : vector<8x1xf32>
    %190 = arith.addf %188, %189 : vector<8x1xf32>
    %cst_46 = arith.constant -9.810000e+00 : f32
    %191 = vector.broadcast %cst_46 : f32 to vector<8x1xf32>
    %192 = arith.mulf %191, %190 : vector<8x1xf32>
    %cst_47 = arith.constant 1.000000e-01 : f32
    %193 = vector.broadcast %cst_47 : f32 to vector<8x1xf32>
    %194 = arith.mulf %193, %192 : vector<8x1xf32>
    %195 = arith.addf %163, %194 : vector<8x1xf32>
    %c108_i32 = arith.constant 108 : i32
    %196 = vector.broadcast %c108_i32 : i32 to vector<8x128xi32>
    %197 = arith.cmpi eq, %52, %196 : vector<8x128xi32>
    %198 = vector.shape_cast %187 : vector<8x1xf32> to vector<8x1xf32>
    %199 = vector.broadcast %198 : vector<8x1xf32> to vector<8x128xf32>
    %200 = arith.select %197, %199, %178 : vector<8x128xi1>, vector<8x128xf32>
    %c109_i32 = arith.constant 109 : i32
    %201 = vector.broadcast %c109_i32 : i32 to vector<8x128xi32>
    %202 = arith.cmpi eq, %52, %201 : vector<8x128xi32>
    %203 = vector.shape_cast %190 : vector<8x1xf32> to vector<8x1xf32>
    %204 = vector.broadcast %203 : vector<8x1xf32> to vector<8x128xf32>
    %205 = arith.select %202, %204, %200 : vector<8x128xi1>, vector<8x128xf32>
    %c110_i32 = arith.constant 110 : i32
    %206 = vector.broadcast %c110_i32 : i32 to vector<8x128xi32>
    %207 = arith.cmpi eq, %52, %206 : vector<8x128xi32>
    %208 = vector.shape_cast %195 : vector<8x1xf32> to vector<8x1xf32>
    %209 = vector.broadcast %208 : vector<8x1xf32> to vector<8x128xf32>
    %210 = arith.select %207, %209, %205 : vector<8x128xi1>, vector<8x128xf32>
    %cst_48 = arith.constant 0.000000e+00 : f32
    %211 = vector.broadcast %cst_48 : f32 to vector<8x1xf32>
    %212 = arith.subf %211, %190 : vector<8x1xf32>
    %cst_49 = arith.constant 1.000000e-01 : f32
    %213 = vector.broadcast %cst_49 : f32 to vector<8x1xf32>
    %214 = arith.mulf %195, %213 : vector<8x1xf32>
    %215 = math.cos %214 : vector<8x1xf32>
    %216 = math.sin %214 : vector<8x1xf32>
    %217 = arith.mulf %212, %215 : vector<8x1xf32>
    %218 = arith.mulf %187, %216 : vector<8x1xf32>
    %219 = arith.subf %217, %218 : vector<8x1xf32>
    %220 = arith.mulf %187, %215 : vector<8x1xf32>
    %221 = arith.mulf %212, %216 : vector<8x1xf32>
    %222 = arith.addf %220, %221 : vector<8x1xf32>
    %cst_50 = arith.constant -9.810000e+00 : f32
    %223 = vector.broadcast %cst_50 : f32 to vector<8x1xf32>
    %224 = arith.mulf %223, %222 : vector<8x1xf32>
    %cst_51 = arith.constant 1.000000e-01 : f32
    %225 = vector.broadcast %cst_51 : f32 to vector<8x1xf32>
    %226 = arith.mulf %225, %224 : vector<8x1xf32>
    %227 = arith.addf %195, %226 : vector<8x1xf32>
    %c111_i32 = arith.constant 111 : i32
    %228 = vector.broadcast %c111_i32 : i32 to vector<8x128xi32>
    %229 = arith.cmpi eq, %52, %228 : vector<8x128xi32>
    %230 = vector.shape_cast %219 : vector<8x1xf32> to vector<8x1xf32>
    %231 = vector.broadcast %230 : vector<8x1xf32> to vector<8x128xf32>
    %232 = arith.select %229, %231, %210 : vector<8x128xi1>, vector<8x128xf32>
    %c112_i32 = arith.constant 112 : i32
    %233 = vector.broadcast %c112_i32 : i32 to vector<8x128xi32>
    %234 = arith.cmpi eq, %52, %233 : vector<8x128xi32>
    %235 = vector.shape_cast %222 : vector<8x1xf32> to vector<8x1xf32>
    %236 = vector.broadcast %235 : vector<8x1xf32> to vector<8x128xf32>
    %237 = arith.select %234, %236, %232 : vector<8x128xi1>, vector<8x128xf32>
    %c113_i32 = arith.constant 113 : i32
    %238 = vector.broadcast %c113_i32 : i32 to vector<8x128xi32>
    %239 = arith.cmpi eq, %52, %238 : vector<8x128xi32>
    %240 = vector.shape_cast %227 : vector<8x1xf32> to vector<8x1xf32>
    %241 = vector.broadcast %240 : vector<8x1xf32> to vector<8x128xf32>
    %242 = arith.select %239, %241, %237 : vector<8x128xi1>, vector<8x128xf32>
    %cst_52 = arith.constant 0.000000e+00 : f32
    %243 = vector.broadcast %cst_52 : f32 to vector<8x1xf32>
    %244 = arith.subf %243, %222 : vector<8x1xf32>
    %cst_53 = arith.constant 1.000000e-01 : f32
    %245 = vector.broadcast %cst_53 : f32 to vector<8x1xf32>
    %246 = arith.mulf %227, %245 : vector<8x1xf32>
    %247 = math.cos %246 : vector<8x1xf32>
    %248 = math.sin %246 : vector<8x1xf32>
    %249 = arith.mulf %244, %247 : vector<8x1xf32>
    %250 = arith.mulf %219, %248 : vector<8x1xf32>
    %251 = arith.subf %249, %250 : vector<8x1xf32>
    %252 = arith.mulf %219, %247 : vector<8x1xf32>
    %253 = arith.mulf %244, %248 : vector<8x1xf32>
    %254 = arith.addf %252, %253 : vector<8x1xf32>
    %cst_54 = arith.constant -9.810000e+00 : f32
    %255 = vector.broadcast %cst_54 : f32 to vector<8x1xf32>
    %256 = arith.mulf %255, %254 : vector<8x1xf32>
    %cst_55 = arith.constant 1.000000e-01 : f32
    %257 = vector.broadcast %cst_55 : f32 to vector<8x1xf32>
    %258 = arith.mulf %257, %256 : vector<8x1xf32>
    %259 = arith.addf %227, %258 : vector<8x1xf32>
    %c114_i32 = arith.constant 114 : i32
    %260 = vector.broadcast %c114_i32 : i32 to vector<8x128xi32>
    %261 = arith.cmpi eq, %52, %260 : vector<8x128xi32>
    %262 = vector.shape_cast %251 : vector<8x1xf32> to vector<8x1xf32>
    %263 = vector.broadcast %262 : vector<8x1xf32> to vector<8x128xf32>
    %264 = arith.select %261, %263, %242 : vector<8x128xi1>, vector<8x128xf32>
    %c115_i32 = arith.constant 115 : i32
    %265 = vector.broadcast %c115_i32 : i32 to vector<8x128xi32>
    %266 = arith.cmpi eq, %52, %265 : vector<8x128xi32>
    %267 = vector.shape_cast %254 : vector<8x1xf32> to vector<8x1xf32>
    %268 = vector.broadcast %267 : vector<8x1xf32> to vector<8x128xf32>
    %269 = arith.select %266, %268, %264 : vector<8x128xi1>, vector<8x128xf32>
    %c116_i32 = arith.constant 116 : i32
    %270 = vector.broadcast %c116_i32 : i32 to vector<8x128xi32>
    %271 = arith.cmpi eq, %52, %270 : vector<8x128xi32>
    %272 = vector.shape_cast %259 : vector<8x1xf32> to vector<8x1xf32>
    %273 = vector.broadcast %272 : vector<8x1xf32> to vector<8x128xf32>
    %274 = arith.select %271, %273, %269 : vector<8x128xi1>, vector<8x128xf32>
    %cst_56 = arith.constant 0.000000e+00 : f32
    %275 = vector.broadcast %cst_56 : f32 to vector<8x1xf32>
    %276 = arith.subf %275, %254 : vector<8x1xf32>
    %cst_57 = arith.constant 1.000000e-01 : f32
    %277 = vector.broadcast %cst_57 : f32 to vector<8x1xf32>
    %278 = arith.mulf %259, %277 : vector<8x1xf32>
    %279 = math.cos %278 : vector<8x1xf32>
    %280 = math.sin %278 : vector<8x1xf32>
    %281 = arith.mulf %276, %279 : vector<8x1xf32>
    %282 = arith.mulf %251, %280 : vector<8x1xf32>
    %283 = arith.subf %281, %282 : vector<8x1xf32>
    %284 = arith.mulf %251, %279 : vector<8x1xf32>
    %285 = arith.mulf %276, %280 : vector<8x1xf32>
    %286 = arith.addf %284, %285 : vector<8x1xf32>
    %cst_58 = arith.constant -9.810000e+00 : f32
    %287 = vector.broadcast %cst_58 : f32 to vector<8x1xf32>
    %288 = arith.mulf %287, %286 : vector<8x1xf32>
    %cst_59 = arith.constant 1.000000e-01 : f32
    %289 = vector.broadcast %cst_59 : f32 to vector<8x1xf32>
    %290 = arith.mulf %289, %288 : vector<8x1xf32>
    %291 = arith.addf %259, %290 : vector<8x1xf32>
    %c117_i32 = arith.constant 117 : i32
    %292 = vector.broadcast %c117_i32 : i32 to vector<8x128xi32>
    %293 = arith.cmpi eq, %52, %292 : vector<8x128xi32>
    %294 = vector.shape_cast %283 : vector<8x1xf32> to vector<8x1xf32>
    %295 = vector.broadcast %294 : vector<8x1xf32> to vector<8x128xf32>
    %296 = arith.select %293, %295, %274 : vector<8x128xi1>, vector<8x128xf32>
    %c118_i32 = arith.constant 118 : i32
    %297 = vector.broadcast %c118_i32 : i32 to vector<8x128xi32>
    %298 = arith.cmpi eq, %52, %297 : vector<8x128xi32>
    %299 = vector.shape_cast %286 : vector<8x1xf32> to vector<8x1xf32>
    %300 = vector.broadcast %299 : vector<8x1xf32> to vector<8x128xf32>
    %301 = arith.select %298, %300, %296 : vector<8x128xi1>, vector<8x128xf32>
    %c119_i32 = arith.constant 119 : i32
    %302 = vector.broadcast %c119_i32 : i32 to vector<8x128xi32>
    %303 = arith.cmpi eq, %52, %302 : vector<8x128xi32>
    %304 = vector.shape_cast %291 : vector<8x1xf32> to vector<8x1xf32>
    %305 = vector.broadcast %304 : vector<8x1xf32> to vector<8x128xf32>
    %306 = arith.select %303, %305, %301 : vector<8x128xi1>, vector<8x128xf32>
    %c0_60 = arith.constant 0 : index
    %c0_61 = arith.constant 0 : index
    %307 = vector.load %arg3[%c0_60, %c0_61] : memref<128x128xf32, #tpu.memory_space<vmem>>, vector<128x128xf32>
    %cst_62 = arith.constant dense<0.000000e+00> : vector<8x128xf32>
    %308 = tpu.matmul %306, %307, %cst_62 {dimension_numbers = #tpu.dot_dimension_numbers<[1], [0], [0], [1], [0, 0, 1, 1], [], []>, precision = #tpu.contract_precision<fp32>} : vector<8x128xf32>, vector<128x128xf32>, vector<8x128xf32> -> vector<8x128xf32>
    %c4 = arith.constant 4 : index
    %c0_63 = arith.constant 0 : index
    %309 = vector.load %arg5[%c4, %c0_63] : memref<8x128xf32, #tpu.memory_space<vmem>>, vector<1x128xf32>
    %310 = vector.broadcast %309 : vector<1x128xf32> to vector<8x128xf32>
    %311 = arith.addf %308, %310 : vector<8x128xf32>
    %cst_64 = arith.constant 0.000000e+00 : f32
    %312 = vector.broadcast %cst_64 : f32 to vector<8x128xf32>
    %313 = arith.maximumf %311, %312 : vector<8x128xf32>
    %c3_65 = arith.constant 3 : index
    %c0_66 = arith.constant 0 : index
    %c0_67 = arith.constant 0 : index
    %314 = vector.load %arg4[%c3_65, %c0_66, %c0_67] : memref<6x128x128xf32, #tpu.memory_space<vmem>>, vector<1x128x128xf32>
    %315 = vector.shape_cast %314 : vector<1x128x128xf32> to vector<128x128xf32>
    %cst_68 = arith.constant dense<0.000000e+00> : vector<8x128xf32>
    %316 = tpu.matmul %313, %315, %cst_68 {dimension_numbers = #tpu.dot_dimension_numbers<[1], [0], [0], [1], [0, 0, 1, 1], [], []>, precision = #tpu.contract_precision<fp32>} : vector<8x128xf32>, vector<128x128xf32>, vector<8x128xf32> -> vector<8x128xf32>
    %c5 = arith.constant 5 : index
    %c0_69 = arith.constant 0 : index
    %317 = vector.load %arg5[%c5, %c0_69] : memref<8x128xf32, #tpu.memory_space<vmem>>, vector<1x128xf32>
    %318 = vector.broadcast %317 : vector<1x128xf32> to vector<8x128xf32>
    %319 = arith.addf %316, %318 : vector<8x128xf32>
    %cst_70 = arith.constant 0.000000e+00 : f32
    %320 = vector.broadcast %cst_70 : f32 to vector<8x128xf32>
    %321 = arith.maximumf %319, %320 : vector<8x128xf32>
    %c4_71 = arith.constant 4 : index
    %c0_72 = arith.constant 0 : index
    %c0_73 = arith.constant 0 : index
    %322 = vector.load %arg4[%c4_71, %c0_72, %c0_73] : memref<6x128x128xf32, #tpu.memory_space<vmem>>, vector<1x128x128xf32>
    %323 = vector.shape_cast %322 : vector<1x128x128xf32> to vector<128x128xf32>
    %cst_74 = arith.constant dense<0.000000e+00> : vector<8x128xf32>
    %324 = tpu.matmul %321, %323, %cst_74 {dimension_numbers = #tpu.dot_dimension_numbers<[1], [0], [0], [1], [0, 0, 1, 1], [], []>, precision = #tpu.contract_precision<fp32>} : vector<8x128xf32>, vector<128x128xf32>, vector<8x128xf32> -> vector<8x128xf32>
    %c6 = arith.constant 6 : index
    %c0_75 = arith.constant 0 : index
    %325 = vector.load %arg5[%c6, %c0_75] : memref<8x128xf32, #tpu.memory_space<vmem>>, vector<1x128xf32>
    %326 = vector.broadcast %325 : vector<1x128xf32> to vector<8x128xf32>
    %327 = arith.addf %324, %326 : vector<8x128xf32>
    %cst_76 = arith.constant 0.000000e+00 : f32
    %328 = vector.broadcast %cst_76 : f32 to vector<8x128xf32>
    %329 = arith.maximumf %327, %328 : vector<8x128xf32>
    %c5_77 = arith.constant 5 : index
    %c0_78 = arith.constant 0 : index
    %c0_79 = arith.constant 0 : index
    %330 = vector.load %arg4[%c5_77, %c0_78, %c0_79] : memref<6x128x128xf32, #tpu.memory_space<vmem>>, vector<1x128x128xf32>
    %331 = vector.shape_cast %330 : vector<1x128x128xf32> to vector<128x128xf32>
    %cst_80 = arith.constant dense<0.000000e+00> : vector<8x128xf32>
    %332 = tpu.matmul %329, %331, %cst_80 {dimension_numbers = #tpu.dot_dimension_numbers<[1], [0], [0], [1], [0, 0, 1, 1], [], []>, precision = #tpu.contract_precision<fp32>} : vector<8x128xf32>, vector<128x128xf32>, vector<8x128xf32> -> vector<8x128xf32>
    %c7 = arith.constant 7 : index
    %c0_81 = arith.constant 0 : index
    %333 = vector.load %arg5[%c7, %c0_81] : memref<8x128xf32, #tpu.memory_space<vmem>>, vector<1x128xf32>
    %334 = vector.broadcast %333 : vector<1x128xf32> to vector<8x128xf32>
    %335 = arith.addf %332, %334 : vector<8x128xf32>
    %c0_82 = arith.constant 0 : index
    %c0_83 = arith.constant 0 : index
    %336 = vector.load %arg6[%c0_82, %c0_83] : memref<8x128xf32, #tpu.memory_space<vmem>>, vector<8x128xf32>
    tpu.vector_store %arg6[%c0_82, %c0_83], %335 {strides = array<i32>} : memref<8x128xf32, #tpu.memory_space<vmem>>, vector<8x128xf32>,
    return
  }
  func.func @transform_0(%arg0: i32) -> (i32, i32) {
    %c0_i32 = arith.constant 0 : i32
    %c0_i32_0 = arith.constant 0 : i32
    return %arg0, %c0_i32 : i32, i32
  }
  func.func @transform_1(%arg0: i32) -> (i32, i32) {
    %c0_i32 = arith.constant 0 : i32
    %c0_i32_0 = arith.constant 0 : i32
    %c0_i32_1 = arith.constant 0 : i32
    return %c0_i32, %c0_i32_0 : i32, i32
  }
  func.func @transform_2(%arg0: i32) -> (i32, i32) {
    %c0_i32 = arith.constant 0 : i32
    %c0_i32_0 = arith.constant 0 : i32
    %c0_i32_1 = arith.constant 0 : i32
    return %c0_i32, %c0_i32_0 : i32, i32
  }
  func.func @transform_3(%arg0: i32) -> (i32, i32, i32) {
    %c0_i32 = arith.constant 0 : i32
    %c0_i32_0 = arith.constant 0 : i32
    %c0_i32_1 = arith.constant 0 : i32
    %c0_i32_2 = arith.constant 0 : i32
    return %c0_i32, %c0_i32_0, %c0_i32_1 : i32, i32, i32
  }
  func.func @transform_4(%arg0: i32) -> (i32, i32) {
    %c0_i32 = arith.constant 0 : i32
    %c0_i32_0 = arith.constant 0 : i32
    %c0_i32_1 = arith.constant 0 : i32
    return %c0_i32, %c0_i32_0 : i32, i32
  }
  func.func @transform_5(%arg0: i32) -> (i32, i32) {
    %c0_i32 = arith.constant 0 : i32
    %c0_i32_0 = arith.constant 0 : i32
    return %arg0, %c0_i32 : i32, i32
  }
}

</mosaic_0001>

<bundles_post_ra>
// kernel: informed_rwm_forward.1
= control target key start
LH: loop header
LB: loop body
LE: loop exit
PB: predicated region body
PF: predicated region fallthrough
CT: control target
= control target key end

     0   :  { %10 = vsyncpa [#allocation3], 0  ;;  %s15942_s0 = inlined_call_operand.vmem [shape: f32[8,384], index: 0, kind: input, shape index: {}]   ;;  %s15943_s1 = inlined_call_operand.hbm [shape: f32[384,128], index: 1, kind: input, shape index: {}]   ;;  %s15944_s2 = inlined_call_operand.hbm [shape: f32[128,128], index: 2, kind: input, shape index: {}]   ;;  %s15945_s3 = inlined_call_operand.hbm [shape: f32[6,128,128], index: 3, kind: input, shape index: {}]   ;;  %s15946_s4 = inlined_call_operand.vmem [shape: f32[8,128], index: 4, kind: input, shape index: {}]   ;;  %s15947_s5 = inlined_call_operand.vmem [shape: f32[8,128], index: 5, kind: output, shape index: {}]  }
   0x1   :  { %11 = vsyncpa [#allocation5], 0  ;;  %s12682_s18 = smov [#allocation4]   ;;  %s12683_s20 = smov [#allocation2]  }
   0x2   :  { %s31_s19 = sshll.u32 %s12682_s18, 4  ;;  %s19_s21 = sshll.u32 %s12683_s20, 4  ;;  %s32_s19 = int_to_ptr.vmem [resolvable:$true] %s31_s19  ;;  %s12732_s21 = int_to_ptr.vmem [resolvable:$true] %s19_s21 }
   0x3   :  { %s12612_s24 = scalar_lea.hbm %s15944_s2, 2048 }
   0x4   :  { %p12613_p0 = scmp.ne.s32.totalorder %s15944_s2, %s12612_s24  ;;  %p12616_p1 = scmp.lt.u32.totalorder %s12612_s24, %s15944_s2 }
   0x6   :  { %p12618_p2 = pnand %p12616_p1, %p12613_p0 }
   0x8   :  { %12621 = shalt.err (!%p12618_p2)
}
   0x9   :  { %s12622_s29 = scalar_lea.vmem %s32_s19, 2048  ;;  %p12627_p4 = scmp.lt.s32.totalorder %s32_s19, %s32_s19 }
   0xa   :  { %p12623_p3 = scmp.ne.s32.totalorder %s32_s19, %s12622_s29  ;;  %p12628_p5 = scmp.lt.s32.totalorder %s12622_s29, %s12622_s29 }
   0xc   :  { %p12629_p6 = por %p12628_p5, %p12627_p4 }
   0xe   :  { %p12630_p7 = pnand %p12629_p6, %p12623_p3 }
  0x10   :  { %12633 = shalt.err (!%p12630_p7)
}
  0x11   :  { %s12684_s30 = smov 128   ;;  %s12685_s6 = smov 8  }
  0x12   :  { %37 = dma.hbm_to_vmem [thread:$0]  %s15944_s2, 2048, %s32_s19, [#allocation5], %s12684_s30, %s12684_s30, %s12685_s6  }
  0x13   :  { %s12634_s11 = scalar_lea.hbm %s15943_s1, 6144 }
  0x14   :  { %p12635_p8 = scmp.ne.s32.totalorder %s15943_s1, %s12634_s11  ;;  %p12638_p9 = scmp.lt.u32.totalorder %s12634_s11, %s15943_s1 }
  0x16   :  { %p12640_p10 = pnand %p12638_p9, %p12635_p8 }
  0x18   :  { %12643 = shalt.err (!%p12640_p10)
}
  0x19   :  { %s12644_s16 = scalar_lea.vmem %s12732_s21, 6144  ;;  %p12649_p12 = scmp.lt.s32.totalorder %s12732_s21, %s12732_s21 }
  0x1a   :  { %p12645_p11 = scmp.ne.s32.totalorder %s12732_s21, %s12644_s16  ;;  %p12650_p13 = scmp.lt.s32.totalorder %s12644_s16, %s12644_s16 }
  0x1c   :  { %p12651_p0 = por %p12650_p13, %p12649_p12 }
  0x1e   :  { %p12652_p1 = pnand %p12651_p0, %p12645_p11 }
  0x20   :  { %12655 = shalt.err (!%p12652_p1)
}
  0x21   :  { %25 = dma.hbm_to_vmem [thread:$0]  %s15943_s1, 6144, %s12732_s21, [#allocation3], %s12684_s30, %s12684_s30, %s12685_s6  }
  0x22   :  { %s12686_s18 = smov [#allocation6]   ;;  %s12656_s23 = scalar_lea.hbm %s15945_s3, 12288 }
  0x23   :  { %s43_s19 = sshll.u32 %s12686_s18, 4  ;;  %p12657_p2 = scmp.ne.s32.totalorder %s15945_s3, %s12656_s23  ;;  %s44_s19 = int_to_ptr.vmem [resolvable:$true] %s43_s19 }
  0x24   :  { %p12660_p3 = scmp.lt.u32.totalorder %s12656_s23, %s15945_s3 }
  0x26   :  { %p12662_p4 = pnand %p12660_p3, %p12657_p2 }
  0x28   :  { %12665 = shalt.err (!%p12662_p4)
}
  0x29   :  { %s12666_s28 = scalar_lea.vmem %s44_s19, 12288  ;;  %p12671_p6 = scmp.lt.s32.totalorder %s44_s19, %s44_s19 }
  0x2a   :  { %p12667_p5 = scmp.ne.s32.totalorder %s44_s19, %s12666_s28  ;;  %p12672_p7 = scmp.lt.s32.totalorder %s12666_s28, %s12666_s28 }
  0x2c   :  { %p12673_p8 = por %p12672_p7, %p12671_p6 }
  0x2e   :  { %p12674_p9 = pnand %p12673_p8, %p12667_p5 }
  0x30   :  { %12677 = shalt.err (!%p12674_p9)
}
  0x31   :  { %49 = dma.hbm_to_vmem [thread:$0]  %s15945_s3, 12288, %s44_s19, [#allocation5], %s12684_s30, %s12684_s30, %s12685_s6  }
  0x32   :  { %12678 = dma.done.wait [#allocation3], 6144  }
  0x33   :  { %12679 = vsyncadd [#allocation3], 4294961152 }
  0x34   :  { %12680 = dma.done.wait [#allocation5], 14336  }
  0x35   :  { %12681 = vsyncadd [#allocation5], 4294952960  ;;  %v80_v0 = vld [vmem:[#allocation2 + $0x80] sm:$0xff]  ;;  %v81_v1 = vld [vmem:[#allocation2 + $0x88] sm:$0xff]  ;;  %vm12688_vm0 = vmmov 0   ;;  %s12690_s16 = smov 127  }
  0x36   :  { %v64_v2 = vld [vmem:[#allocation2] sm:$0xff]  ;;  %v166_v3 = vand.u32 4294901760, %v80_v0  ;;  %v169_v4 = vand.u32 4294901760, %v81_v1  ;;  %v65_v5 = vld [vmem:[#allocation2 + $0x8] sm:$0xff]  ;;  %v82_v7 = vld [vmem:[#allocation2 + $0x90] sm:$0xff]  ;;  %s12697_s2 = smov 1  }
  0x37   :  { %v118_v6 = vand.u32 4294901760, %v64_v2  ;;  %v83_v8 = vld [vmem:[#allocation2 + $0x98] sm:$0xff]  ;;  %v121_v9 = vand.u32 4294901760, %v65_v5  ;;  %v172_v10 = vand.u32 4294901760, %v82_v7  ;;  %v66_v12 = vld [vmem:[#allocation2 + $0x10] sm:$0xff]  ;;  %v84_v18 = vld [vmem:[#allocation2 + $0xa0] sm:$0xff] }
  0x38   :  { %v175_v11 = vand.u32 4294901760, %v83_v8  ;;  %v67_v13 = vld [vmem:[#allocation2 + $0x18] sm:$0xff]  ;;  %v12784_v14 = vpack.c.bf16 %v169_v4, %v166_v3  ;;  %v124_v16 = vand.u32 4294901760, %v66_v12  ;;  %v85_v19 = vld [vmem:[#allocation2 + $0xa8] sm:$0xff]  ;;  %v68_v23 = vld [vmem:[#allocation2 + $0x20] sm:$0xff]  ;;  %v178_v29 = vand.u32 4294901760, %v84_v18 }
  0x39   :  { %v12786_v15 = vsub.f32 %v64_v2, %v118_v6  ;;  %v127_v17 = vand.u32 4294901760, %v67_v13  ;;  %v12788_v20 = vpack.c.bf16 %v121_v9, %v118_v6  ;;  %v12790_v21 = vsub.f32 %v65_v5, %v121_v9  ;;  %v69_v24 = vld [vmem:[#allocation2 + $0x28] sm:$0xff]  ;;  %v86_v37 = vld [vmem:[#allocation2 + $0xb0] sm:$0xff]  ;;  %v87_v42 = vld [vmem:[#allocation2 + $0xb8] sm:$0xff]  ;;  %s12698_s17 = smov 126   ;;  %s12699_s18 = smov 2  }
  0x3a   :  { %v12792_v22 = vpack.c.bf16 %v175_v11, %v172_v10  ;;  %11083 = vmatprep.subr.bf16.mxu0 %v12784_v14  ;;  %v12795_v25 = vsub.f32 %v82_v7, %v172_v10  ;;  %v12797_v26 = vsub.f32 %v83_v8, %v175_v11  ;;  %v12801_v28 = vsub.f32 %v66_v12, %v124_v16  ;;  %v70_v55 = vld [vmem:[#allocation2 + $0x30] sm:$0xff]  ;;  %v71_v56 = vld [vmem:[#allocation2 + $0x38] sm:$0xff]  ;;  %v88_v5 = vld [vmem:[#allocation2 + $0xc0] sm:$0xff] }
  0x3b   :  { %v12799_v27 = vpack.c.bf16 %v127_v17, %v124_v16  ;;  %11085 = vmatpush3.bf16.msra.mxu0 %v12788_v20  ;;  %v181_v30 = vand.u32 4294901760, %v85_v19  ;;  %v12804_v31 = vsub.f32 %v80_v0, %v166_v3  ;;  %v12806_v32 = vsub.f32 %v81_v1, %v169_v4  ;;  %v89_v6 = vld [vmem:[#allocation2 + $0xc8] sm:$0xff]  ;;  %v72_v11 = vld [vmem:[#allocation2 + $0x40] sm:$0xff] }
  0x3c   :  { %11087 = vmatprep.subr.bf16.mxu0 %v12792_v22  ;;  %v130_v33 = vand.u32 4294901760, %v68_v23  ;;  %v133_v34 = vand.u32 4294901760, %v69_v24  ;;  %v15963_v35 = vand.u32 4294901760, %v12786_v15  ;;  %v15962_v36 = vand.u32 4294901760, %v12790_v21 }
  0x3d   :  { %v12811_v38 = vsub.f32 %v67_v13, %v127_v17  ;;  %v12813_v39 = vpack.c.bf16 %v181_v30, %v178_v29  ;;  %v12815_v40 = vsub.f32 %v84_v18, %v178_v29  ;;  %v15969_v41 = vand.u32 4294901760, %v12804_v31  ;;  %v73_v29 = vld [vmem:[#allocation2 + $0x48] sm:$0xff] }
  0x3e   :  { %v12818_v43 = vsub.f32 %v85_v19, %v181_v30  ;;  %v15965_v44 = vand.u32 4294901760, %v12806_v32  ;;  %v12821_v45 = vpack.c.bf16 %v133_v34, %v130_v33  ;;  %v12823_v46 = vsub.f32 %v68_v23, %v130_v33 }
  0x3f   :  { %11089 = vmatpush3.bf16.msra.mxu0 %v12799_v27  ;;  %v345_v47 = vsub.f32 %v12804_v31, %v15969_v41  ;;  %v233_v48 = vsub.f32 %v12786_v15, %v15963_v35  ;;  %v240_v49 = vsub.f32 %v12790_v21, %v15962_v36  ;;  %v184_v50 = vand.u32 4294901760, %v86_v37 }
  0x40   :  { %11091 = vmatprep.subr.bf16.mxu0 %v12813_v39  ;;  %v352_v51 = vsub.f32 %v12806_v32, %v15965_v44  ;;  %v187_v52 = vand.u32 4294901760, %v87_v42  ;;  %v15960_v53 = vand.u32 4294901760, %v12795_v25  ;;  %v15958_v54 = vand.u32 4294901760, %v12797_v26 }
  0x41   :  { %v346_v57 = vand.u32 4294901760, %v345_v47  ;;  %v12841_v58 = vsub.f32 %v69_v24, %v133_v34  ;;  %v234_v59 = vand.u32 4294901760, %v233_v48  ;;  %v241_v60 = vand.u32 4294901760, %v240_v49 }
  0x42   :  { %v353_v61 = vand.u32 4294901760, %v352_v51  ;;  %v12843_v62 = vpack.c.bf16 %v187_v52, %v184_v50  ;;  %v12845_v63 = vsub.f32 %v86_v37, %v184_v50  ;;  %v359_v0 = vsub.f32 %v12795_v25, %v15960_v53 }
  0x43   :  { %11093 = vmatpush3.bf16.msra.mxu0 %v12821_v45  ;;  %v11116_v1 = vpack.c.bf16 %v241_v60, %v234_v59  ;;  %v366_v2 = vsub.f32 %v12797_v26, %v15958_v54  ;;  %v136_v3 = vand.u32 4294901760, %v70_v55  ;;  %v139_v4 = vand.u32 4294901760, %v71_v56  ;;  %v91_v59 = vld [vmem:[#allocation2 + $0xd8] sm:$0xff] }
  0x44   :  { %v11114_v7 = vpack.c.bf16 %v353_v61, %v346_v57  ;;  %11095 = vmatprep.subr.bf16.mxu0 %v12843_v62  ;;  %v360_v8 = vand.u32 4294901760, %v359_v0  ;;  %v15957_v9 = vand.u32 4294901760, %v12801_v28  ;;  %v15955_v10 = vand.u32 4294901760, %v12811_v38  ;;  %v90_v57 = vld [vmem:[#allocation2 + $0xd0] sm:$0xff]  ;;  %v95_v54 = vld [vmem:[#allocation2 + $0xf8] sm:$0xff] }
  0x45   :  { %v12857_v12 = vsub.f32 %v87_v42, %v187_v52  ;;  %v367_v13 = vand.u32 4294901760, %v366_v2  ;;  %v12859_v16 = vpack.c.bf16 %v139_v4, %v136_v3  ;;  %v12861_v17 = vsub.f32 %v70_v55, %v136_v3 }
  0x46   :  { %11115 = vmatprep.subr.bf16.mxu1 %v11114_v7  ;;  %v247_v18 = vsub.f32 %v12801_v28, %v15957_v9  ;;  %v254_v19 = vsub.f32 %v12811_v38, %v15955_v10  ;;  %v190_v23 = vand.u32 4294901760, %v88_v5  ;;  %v193_v24 = vand.u32 4294901760, %v89_v6  ;;  %v94_v9 = vld [vmem:[#allocation2 + $0xf0] sm:$0xff] }
  0x47   :  { %11117 = vmatpush3.bf16.msra.mxu1 %v11116_v1  ;;  %v11118_v30 = vpack.c.bf16 %v367_v13, %v360_v8  ;;  %11097 = vmatpush3.bf16.msra.mxu0 %v12859_v16  ;;  %v15953_v33 = vand.u32 4294901760, %v12815_v40  ;;  %v15952_v34 = vand.u32 4294901760, %v12818_v43  ;;  %v142_v37 = vand.u32 4294901760, %v72_v11  ;;  %v74_v1 = vld [vmem:[#allocation2 + $0x50] sm:$0xff] }
  0x48   :  { %v12872_v42 = vsub.f32 %v71_v56, %v139_v4  ;;  %v248_v47 = vand.u32 4294901760, %v247_v18  ;;  %v255_v48 = vand.u32 4294901760, %v254_v19  ;;  %v12874_v49 = vpack.c.bf16 %v193_v24, %v190_v23  ;;  %v75_v18 = vld [vmem:[#allocation2 + $0x58] sm:$0xff] }
  0x49   :  { %11119 = vmatprep.subr.bf16.mxu1 %v11118_v30  ;;  %v12876_v50 = vsub.f32 %v88_v5, %v190_v23  ;;  %v373_v51 = vsub.f32 %v12815_v40, %v15953_v33  ;;  %v380_v52 = vsub.f32 %v12818_v43, %v15952_v34  ;;  %v145_v55 = vand.u32 4294901760, %v73_v29 }
  0x4a   :  { %v11120_v56 = vpack.c.bf16 %v255_v48, %v248_v47  ;;  %11099 = vmatprep.subr.bf16.mxu0 %v12874_v49  ;;  %v12885_v60 = vsub.f32 %v89_v6, %v193_v24  ;;  %v15950_v61 = vand.u32 4294901760, %v12823_v46  ;;  %v15948_v0 = vand.u32 4294901760, %v12841_v58 }
  0x4b   :  { %v374_v2 = vand.u32 4294901760, %v373_v51  ;;  %v381_v3 = vand.u32 4294901760, %v380_v52  ;;  %v12889_v4 = vpack.c.bf16 %v145_v55, %v142_v37  ;;  %v12891_v5 = vsub.f32 %v72_v11, %v142_v37 }
  0x4c   :  { %11121 = vmatpush3.bf16.msra.mxu1 %v11120_v56  ;;  %v261_v7 = vsub.f32 %v12823_v46, %v15950_v61  ;;  %v268_v6 = vsub.f32 %v12841_v58, %v15948_v0  ;;  %v196_v8 = vand.u32 4294901760, %v90_v57  ;;  %v199_v13 = vand.u32 4294901760, %v91_v59  ;;  %v93_v0 = vld [vmem:[#allocation2 + $0xe8] sm:$0xff] }
  0x4d   :  { %v11122_v19 = vpack.c.bf16 %v381_v3, %v374_v2  ;;  %11101 = vmatpush3.bf16.msra.mxu0 %v12889_v4  ;;  %v15949_v23 = vand.u32 4294901760, %v12845_v63  ;;  %v15951_v11 = vand.u32 4294901760, %v12857_v12  ;;  %v148_v24 = vand.u32 4294901760, %v74_v1  ;;  %v92_v3 = vld [vmem:[#allocation2 + $0xe0] sm:$0xff] }
  0x4e   :  { %v12902_v30 = vsub.f32 %v73_v29, %v145_v55  ;;  %v262_v37 = vand.u32 4294901760, %v261_v7  ;;  %v269_v47 = vand.u32 4294901760, %v268_v6  ;;  %v12904_v48 = vpack.c.bf16 %v199_v13, %v196_v8  ;;  %v76_v6 = vld [vmem:[#allocation2 + $0x60] sm:$0xff] }
  0x4f   :  { %11123 = vmatprep.subr.bf16.mxu1 %v11122_v19  ;;  %v12906_v51 = vsub.f32 %v90_v57, %v196_v8  ;;  %v387_v52 = vsub.f32 %v12845_v63, %v15949_v23  ;;  %v394_v56 = vsub.f32 %v12857_v12, %v15951_v11  ;;  %v151_v2 = vand.u32 4294901760, %v75_v18  ;;  %v77_v11 = vld [vmem:[#allocation2 + $0x68] sm:$0xff] }
  0x50   :  { %v11124_v29 = vpack.c.bf16 %v269_v47, %v262_v37  ;;  %11103 = vmatprep.subr.bf16.mxu0 %v12904_v48  ;;  %v12915_v55 = vsub.f32 %v91_v59, %v199_v13  ;;  %v15954_v7 = vand.u32 4294901760, %v12861_v17  ;;  %v15956_v57 = vand.u32 4294901760, %v12872_v42 }
  0x51   :  { %v388_v8 = vand.u32 4294901760, %v387_v52  ;;  %v395_v19 = vand.u32 4294901760, %v394_v56  ;;  %v12919_v23 = vpack.c.bf16 %v151_v2, %v148_v24  ;;  %v12921_v61 = vsub.f32 %v74_v1, %v148_v24 }
  0x52   :  { %11125 = vmatpush3.bf16.msra.mxu1 %v11124_v29  ;;  %v275_v37 = vsub.f32 %v12861_v17, %v15954_v7  ;;  %v282_v59 = vsub.f32 %v12872_v42, %v15956_v57  ;;  %v202_v13 = vand.u32 4294901760, %v92_v3  ;;  %v205_v47 = vand.u32 4294901760, %v93_v0 }
  0x53   :  { %v11126_v34 = vpack.c.bf16 %v395_v19, %v388_v8  ;;  %11105 = vmatpush3.bf16.msra.mxu0 %v12919_v23  ;;  %v15959_v52 = vand.u32 4294901760, %v12876_v50  ;;  %v15961_v1 = vand.u32 4294901760, %v12885_v60  ;;  %v154_v24 = vand.u32 4294901760, %v76_v6 }
  0x54   :  { %v12932_v56 = vsub.f32 %v75_v18, %v151_v2  ;;  %v276_v29 = vand.u32 4294901760, %v275_v37  ;;  %v283_v33 = vand.u32 4294901760, %v282_v59  ;;  %v12934_v7 = vpack.c.bf16 %v205_v47, %v202_v13  ;;  %v78_v37 = vld [vmem:[#allocation2 + $0x70] sm:$0xff] }
  0x55   :  { %11127 = vmatprep.subr.bf16.mxu1 %v11126_v34  ;;  %v12936_v10 = vsub.f32 %v92_v3, %v202_v13  ;;  %v401_v8 = vsub.f32 %v12876_v50, %v15959_v52  ;;  %v408_v19 = vsub.f32 %v12885_v60, %v15961_v1  ;;  %v157_v57 = vand.u32 4294901760, %v77_v11  ;;  %v79_v1 = vld [vmem:[#allocation2 + $0x78] sm:$0xff] }
  0x56   :  { %v11128_v18 = vpack.c.bf16 %v283_v33, %v276_v29  ;;  %11107 = vmatprep.subr.bf16.mxu0 %v12934_v7  ;;  %v12945_v2 = vsub.f32 %v93_v0, %v205_v47  ;;  %v15964_v34 = vand.u32 4294901760, %v12891_v5  ;;  %v15966_v3 = vand.u32 4294901760, %v12902_v30 }
  0x57   :  { %v402_v59 = vand.u32 4294901760, %v401_v8  ;;  %v409_v13 = vand.u32 4294901760, %v408_v19  ;;  %v12949_v52 = vpack.c.bf16 %v157_v57, %v154_v24  ;;  %v12951_v53 = vsub.f32 %v76_v6, %v154_v24 }
  0x58   :  { %11129 = vmatpush3.bf16.msra.mxu1 %v11128_v18  ;;  %v289_v33 = vsub.f32 %v12891_v5, %v15964_v34  ;;  %v296_v0 = vsub.f32 %v12902_v30, %v15966_v3  ;;  %v208_v47 = vand.u32 4294901760, %v94_v9  ;;  %v211_v29 = vand.u32 4294901760, %v95_v54 }
  0x59   :  { %16068 = vst [vmem:[#allocation9_spill] sm:$0xff] %v12949_v52  ;;  %v11130_v36 = vpack.c.bf16 %v409_v13, %v402_v59  ;;  %11109 = vmatpush3.bf16.msra.mxu0 %v12949_v52  ;;  %v15968_v8 = vand.u32 4294901760, %v12906_v51  ;;  %v15967_v6 = vand.u32 4294901760, %v12915_v55  ;;  %v160_v24 = vand.u32 4294901760, %v78_v37 }
  0x5a   :  { %v12962_v19 = vsub.f32 %v77_v11, %v157_v57  ;;  %v290_v18 = vand.u32 4294901760, %v289_v33  ;;  %v297_v35 = vand.u32 4294901760, %v296_v0  ;;  %v12964_v34 = vpack.c.bf16 %v211_v29, %v208_v47  ;;  %v62_v11 = vld [vmem:[%s15942_s0 + $0x8] sm:$0xff]  ;;  %v61_v57 = vld [vmem:[%s15942_s0] sm:$0xff] }
  0x5b   :  { %11131 = vmatprep.subr.bf16.mxu1 %v11130_v36  ;;  %v12966_v44 = vsub.f32 %v94_v9, %v208_v47  ;;  %v415_v59 = vsub.f32 %v12906_v51, %v15968_v8  ;;  %v422_v13 = vsub.f32 %v12915_v55, %v15967_v6  ;;  %v163_v3 = vand.u32 4294901760, %v79_v1 }
  0x5c   :  { %16069 = vst [vmem:[#allocation10_spill] sm:$0xff] %v12964_v34  ;;  %v11132_v36 = vpack.c.bf16 %v297_v35, %v290_v18  ;;  %11111 = vmatprep.subr.bf16.mxu0 %v12964_v34  ;;  %v12981_v9 = vsub.f32 %v95_v54, %v211_v29  ;;  %v15972_v33 = vand.u32 4294901760, %v12921_v61  ;;  %v15973_v0 = vand.u32 4294901760, %v12932_v56 }
  0x5d   :  { %v416_v47 = vand.u32 4294901760, %v415_v59  ;;  %v423_v6 = vand.u32 4294901760, %v422_v13  ;;  %v12985_v8 = vpack.c.bf16 %v163_v3, %v160_v24  ;;  %v12987_v41 = vsub.f32 %v78_v37, %v160_v24 }
  0x5e   :  { %11133 = vmatpush3.bf16.msra.mxu1 %v11132_v36  ;;  %v303_v52 = vsub.f32 %v12921_v61, %v15972_v33  ;;  %v310_v35 = vsub.f32 %v12932_v56, %v15973_v0  ;;  %v12995_v54 = vand.u32 4294901760, %v62_v11  ;;  %v12997_v29 = vand.u32 4294901760, %v61_v57 }
  0x5f   :  { %16070 = vst [vmem:[#allocation11_spill] sm:$0xff] %v12985_v8  ;;  %v11134_v18 = vpack.c.bf16 %v423_v6, %v416_v47  ;;  %11113 = vmatpush3.bf16.msra.mxu0 %v12985_v8  ;;  %v15980_v59 = vand.u32 4294901760, %v12936_v10  ;;  %v15982_v37 = vand.u32 4294901760, %v12945_v2  ;;  %v11146_v24 = vpack.c.bf16 %v12806_v32, %v12804_v31 }
  0x60   :  { %16071 = vst [vmem:[#allocation12_spill] sm:$0xff] %v12995_v54  ;;  %v304_v13 = vand.u32 4294901760, %v303_v52  ;;  %v311_v36 = vand.u32 4294901760, %v310_v35  ;;  %v13005_v33 = vsub.f32 %v62_v11, %v12995_v54  ;;  %v13008_v0 = vsub.f32 %v61_v57, %v12997_v29  ;;  %454 = vmatprep.mubr.f32.mxu1 %v12995_v54 }
  0x61   :  { %11135 = vmatprep.subr.bf16.mxu1 %v11134_v18  ;;  %v429_v6 = vsub.f32 %v12936_v10, %v15980_v59  ;;  %v436_v47 = vsub.f32 %v12945_v2, %v15982_v37  ;;  %11147 = vmatprep.subr.bf16.mxu0 %v11146_v24  ;;  %v15981_v52 = vand.u32 4294901760, %v12951_v53  ;;  %v15983_v11 = vand.u32 4294901760, %v12962_v19 }
  0x62   :  { %16072 = vst [vmem:[#allocation13_spill] sm:$0xff] %v13008_v0  ;;  %v13019_v35 = vsub.f32 %v79_v1, %v163_v3  ;;  %v11136_v57 = vpack.c.bf16 %v311_v36, %v304_v13  ;;  %v15984_v8 = vand.u32 4294901760, %v13005_v33  ;;  %v15985_v18 = vand.u32 4294901760, %v13008_v0 }
  0x63   :  { %v430_v34 = vand.u32 4294901760, %v429_v6  ;;  %v437_v54 = vand.u32 4294901760, %v436_v47  ;;  %v317_v59 = vsub.f32 %v12951_v53, %v15981_v52  ;;  %v324_v24 = vsub.f32 %v12962_v19, %v15983_v11 }
  0x64   :  { %11137 = vmatpush3.bf16.msra.mxu1 %v11136_v57  ;;  %v216_v1 = vsub.f32 %v13005_v33, %v15984_v8  ;;  %v222_v3 = vsub.f32 %v13008_v0, %v15985_v18  ;;  %v15991_v13 = vand.u32 4294901760, %v12966_v44  ;;  %v15988_v36 = vand.u32 4294901760, %v12981_v9 }
  0x65   :  { %v11138_v6 = vpack.c.bf16 %v437_v54, %v430_v34  ;;  %v318_v47 = vand.u32 4294901760, %v317_v59  ;;  %v325_v52 = vand.u32 4294901760, %v324_v24  ;;  %v11148_v37 = vpack.c.bf16 %v12790_v21, %v12786_v15 }
  0x66   :  { %v217_v11 = vand.u32 4294901760, %v216_v1  ;;  %v223_v57 = vand.u32 4294901760, %v222_v3  ;;  %v443_v8 = vsub.f32 %v12966_v44, %v15991_v13  ;;  %v450_v18 = vsub.f32 %v12981_v9, %v15988_v36 }
  0x67   :  { %11139 = vmatprep.subr.bf16.mxu1 %v11138_v6  ;;  %v11140_v0 = vpack.c.bf16 %v325_v52, %v318_v47  ;;  %v11150_v34 = vpack.c.bf16 %v12797_v26, %v12795_v25  ;;  %v15990_v54 = vand.u32 4294901760, %v12987_v41  ;;  %v15989_v59 = vand.u32 4294901760, %v13019_v35 }
  0x68   :  { %218 = vmatprep.mubr.f32.mxu0 %v217_v11  ;;  %v444_v24 = vand.u32 4294901760, %v443_v8  ;;  %v451_v1 = vand.u32 4294901760, %v450_v18  ;;  %v11152_v47 = vpack.c.bf16 %v12811_v38, %v12801_v28  ;;  %v11154_v8 = vpack.c.bf16 %v12818_v43, %v12815_v40 }
  0x69   :  { %224 = vmatmul.mubr.f32.vlgmr.msra.gmra.mrb[0].mxu0 %v223_v57  ;;  %11141 = vmatpush3.bf16.msra.mxu1 %v11140_v0  ;;  %v331_v3 = vsub.f32 %v12987_v41, %v15990_v54  ;;  %v338_v52 = vsub.f32 %v13019_v35, %v15989_v59  ;;  %v11156_v0 = vpack.c.bf16 %v12841_v58, %v12823_v46  ;;  %v16073_v57 = vand.u32 4294901760, %v12804_v31 }
  0x6a   :  { %11149 = vmatpush3.bf16.msra.mxu0 %v11148_v37  ;;  %v11142_v6 = vpack.c.bf16 %v451_v1, %v444_v24  ;;  %591 = vmatprep.mubr.f32.mxu0 %v13005_v33  ;;  %v11158_v18 = vpack.c.bf16 %v12857_v12, %v12845_v63  ;;  %v16074_v24 = vand.u32 4294901760, %v12806_v32  ;;  %v16075_v1 = vand.u32 4294901760, %v12786_v15 }
  0x6b   :  { %11151 = vmatprep.subr.bf16.mxu0 %v11150_v34  ;;  %v332_v36 = vand.u32 4294901760, %v331_v3  ;;  %v339_v11 = vand.u32 4294901760, %v338_v52  ;;  %v16076_v3 = vand.u32 4294901760, %v12790_v21  ;;  %v16077_v59 = vand.u32 4294901760, %v12795_v25 }
  0x6c   :  { %11143 = vmatprep.subr.bf16.mxu1 %v11142_v6  ;;  %v11210_v34 = vpack.c.bf16 %v16074_v24, %v16073_v57  ;;  %v16078_v6 = vand.u32 4294901760, %v12797_v26  ;;  %v16079_v13 = vand.u32 4294901760, %v12801_v28  ;;  %v16081_v31 = vand.u32 4294901760, %v12815_v40 }
  0x6d   :  { %v11144_v37 = vpack.c.bf16 %v339_v11, %v332_v36  ;;  %v11212_v52 = vpack.c.bf16 %v16076_v3, %v16075_v1  ;;  %v16080_v36 = vand.u32 4294901760, %v12811_v38  ;;  %v16082_v32 = vand.u32 4294901760, %v12818_v43  ;;  %v16097_v3 = vld [vmem:[#allocation10_spill] sm:$0xff] }
  0x6e   :  { %v11214_v54 = vpack.c.bf16 %v16078_v6, %v16077_v59  ;;  %11153 = vmatpush3.bf16.msra.mxu0 %v11152_v47  ;;  %v16083_v15 = vand.u32 4294901760, %v12823_v46  ;;  %v16084_v21 = vand.u32 4294901760, %v12841_v58  ;;  %v16085_v25 = vand.u32 4294901760, %v12845_v63  ;;  %v16098_v6 = vld [vmem:[#allocation11_spill] sm:$0xff] }
  0x6f   :  { %v11216_v11 = vpack.c.bf16 %v16080_v36, %v16079_v13  ;;  %v11218_v57 = vpack.c.bf16 %v16082_v32, %v16081_v31  ;;  %v16086_v26 = vand.u32 4294901760, %v12857_v12  ;;  %11145 = vmatpush3.bf16.msra.mxu1 %v11144_v37  ;;  %11155 = vmatprep.subr.bf16.mxu0 %v11154_v8  ;;  %v16087_v28 = vand.u32 4294901760, %v12861_v17  ;;  %v97_v32 = vld [vmem:[#allocation2 + $0x108] sm:$0xff] }
  0x70   :  { %v11220_v24 = vpack.c.bf16 %v16084_v21, %v16083_v15  ;;  %v16088_v38 = vand.u32 4294901760, %v12872_v42  ;;  %v16089_v43 = vand.u32 4294901760, %v12876_v50  ;;  %v16090_v13 = vand.u32 4294901760, %v12885_v60  ;;  %11179 = vmatprep.subr.bf16.mxu1 %v12784_v14 }
  0x71   :  { %v11222_v59 = vpack.c.bf16 %v16086_v26, %v16085_v25  ;;  %v16091_v58 = vand.u32 4294901760, %v12891_v5  ;;  %v16092_v47 = vand.u32 4294901760, %v12902_v30  ;;  %v11160_v12 = vpack.c.bf16 %v12872_v42, %v12861_v17  ;;  %v101_v25 = vld [vmem:[#allocation2 + $0x128] sm:$0xff] }
  0x72   :  { %v11224_v40 = vpack.c.bf16 %v16088_v38, %v16087_v28  ;;  %v11226_v46 = vpack.c.bf16 %v16090_v13, %v16089_v43  ;;  %456 = vmatmul.mubr.f32.vlgmr.msra.gmra.mrb[0].mxu1 %v12997_v29  ;;  %11157 = vmatpush3.bf16.msra.mxu0 %v11156_v0  ;;  %v11162_v8 = vpack.c.bf16 %v12885_v60, %v12876_v50  ;;  %v16093_v37 = vand.u32 4294901760, %v13005_v33  ;;  %v16094_v33 = vld [vmem:[#allocation13_spill] sm:$0xff]  ;;  %v16095_v0 = vld [vmem:[#allocation12_spill] sm:$0xff]  ;;  %v102_v43 = vld [vmem:[#allocation2 + $0x130] sm:$0xff] }
  0x73   :  { %v11228_v63 = vpack.c.bf16 %v16092_v47, %v16091_v58  ;;  %11181 = vmatpush3.bf16.msra.mxu1 %v12788_v20  ;;  %11159 = vmatprep.subr.bf16.mxu0 %v11158_v18  ;;  %v11164_v1 = vpack.c.bf16 %v12902_v30, %v12891_v5  ;;  %v11166_v17 = vpack.c.bf16 %v12915_v55, %v12906_v51  ;;  %v16096_v18 = vld [vmem:[#allocation9_spill] sm:$0xff]  ;;  %v16102_v36 = vand.u32 4294901760, %v12921_v61  ;;  %v103_v13 = vld [vmem:[#allocation2 + $0x138] sm:$0xff] }
  0x74   :  { %11183 = vmatprep.subr.bf16.mxu1 %v12792_v22  ;;  %698 = vmatprep.mubr.f32.mxu1 %v16093_v37  ;;  %v11168_v42 = vpack.c.bf16 %v12932_v56, %v12921_v61  ;;  %v11170_v50 = vpack.c.bf16 %v12945_v2, %v12936_v10  ;;  %v11172_v60 = vpack.c.bf16 %v12962_v19, %v12951_v53  ;;  %v96_v61 = vld [vmem:[#allocation2 + $0x100] sm:$0xff]  ;;  %v983_v15 = vand.u32 4294901760, %v97_v32 }
  0x75   :  { %v11174_v5 = vpack.c.bf16 %v12981_v9, %v12966_v44  ;;  %v11176_v30 = vpack.c.bf16 %v13019_v35, %v12987_v41  ;;  %v12687_v28 = vmov 0.0|0.0  }
  0x76   :  { %11161 = vmatpush3.bf16.msra.mxu0 %v11160_v12  ;;  %v998_v12 = vand.u32 4294901760, %v102_v43 }
  0x77   :  { %11185 = vmatpush3.bf16.msra.mxu1 %v12799_v27  ;;  %11163 = vmatprep.subr.bf16.mxu0 %v11162_v8  ;;  %v1001_v8 = vand.u32 4294901760, %v103_v13 }
  0x78   :  { %11187 = vmatprep.subr.bf16.mxu1 %v12813_v39 }
  0x7a   :  { %11165 = vmatpush3.bf16.msra.mxu0 %v11164_v1  ;;  %v104_v1 = vld [vmem:[#allocation2 + $0x140] sm:$0xff] }
  0x7b   :  { %11189 = vmatpush3.bf16.msra.mxu1 %v12821_v45  ;;  %11167 = vmatprep.subr.bf16.mxu0 %v11166_v17  ;;  %v105_v17 = vld [vmem:[#allocation2 + $0x148] sm:$0xff] }
  0x7c   :  { %11191 = vmatprep.subr.bf16.mxu1 %v12843_v62 }
  0x7e   :  { %11169 = vmatpush3.bf16.msra.mxu0 %v11168_v42  ;;  %v13223_v42 = vsub.f32 %v102_v43, %v998_v12 }
  0x7f   :  { %11193 = vmatpush3.bf16.msra.mxu1 %v12859_v16  ;;  %11171 = vmatprep.subr.bf16.mxu0 %v11170_v50  ;;  %v13225_v50 = vsub.f32 %v103_v13, %v1001_v8 }
  0x80   :  { %11195 = vmatprep.subr.bf16.mxu1 %v12874_v49 }
  0x82   :  { %11173 = vmatpush3.bf16.msra.mxu0 %v11172_v60 }
  0x83   :  { %11197 = vmatpush3.bf16.msra.mxu1 %v12889_v4  ;;  %11175 = vmatprep.subr.bf16.mxu0 %v11174_v5 }
  0x84   :  { %11199 = vmatprep.subr.bf16.mxu1 %v12904_v48 }
  0x86   :  { %11177 = vmatpush3.bf16.msra.mxu0 %v11176_v30 }
  0x87   :  { %11201 = vmatpush3.bf16.msra.mxu1 %v12919_v23  ;;  %11211 = vmatprep.subr.bf16.mxu0 %v11210_v34  ;;  %v16099_v34 = vand.u32 4294901760, %v16094_v33 }
  0x88   :  { %11203 = vmatprep.subr.bf16.mxu1 %v12934_v7 }
  0x89   :  { %594 = vmatmul.mubr.f32.vlgmr.msra.gmra.mrb[2].mxu0 %v16094_v33  ;;  %v1004_v33 = vand.u32 4294901760, %v104_v1 }
  0x8a   :  { %11213 = vmatpush3.bf16.msra.mxu0 %v11212_v52  ;;  %868 = vmatprep.mubr.f32.mxu0 %v16095_v0  ;;  %v16101_v52 = vand.u32 4294901760, %v12915_v55 }
  0x8b   :  { %11205 = vmatpush3.bf16.msra.mxu1 %v16096_v18  ;;  %11215 = vmatprep.subr.bf16.mxu0 %v11214_v54  ;;  %v16100_v54 = vand.u32 4294901760, %v12906_v51  ;;  %v16106_v51 = vand.u32 4294901760, %v12951_v53  ;;  %v16110_v53 = vand.u32 4294901760, %v12987_v41 }
  0x8c   :  { %11207 = vmatprep.subr.bf16.mxu1 %v16097_v3 }
  0x8e   :  { %11217 = vmatpush3.bf16.msra.mxu0 %v11216_v11 }
  0x8f   :  { %11209 = vmatpush3.bf16.msra.mxu1 %v16098_v6  ;;  %11219 = vmatprep.subr.bf16.mxu0 %v11218_v57  ;;  %v980_v57 = vand.u32 4294901760, %v96_v61 }
  0x90   :  { %11243 = vmatprep.subr.bf16.mxu1 %v12784_v14  ;;  %v11230_v14 = vpack.c.bf16 %v16101_v52, %v16100_v54  ;;  %v106_v54 = vld [vmem:[#allocation2 + $0x150] sm:$0xff]  ;;  %v1115_v52 = vand.u32 4294901760, %v13223_v42 }
  0x91   :  { %v13189_v41 = vpack.c.bf16 %v983_v15, %v980_v57 }
  0x92   :  { %702 = vmatmul.mubr.f32.vlgmr.msra.gmra.mrb[2].mxu1 %v16099_v34  ;;  %11221 = vmatpush3.bf16.msra.mxu0 %v11220_v24 }
  0x93   :  { %11245 = vmatpush3.bf16.msra.mxu1 %v12788_v20  ;;  %11223 = vmatprep.subr.bf16.mxu0 %v11222_v59  ;;  %v16103_v20 = vand.u32 4294901760, %v12932_v56 }
  0x94   :  { %11247 = vmatprep.subr.bf16.mxu1 %v12792_v22  ;;  %972 = vmatprep.mubr.f32.mxu1 %v16095_v0  ;;  %v16104_v22 = vand.u32 4294901760, %v12936_v10  ;;  %v16109_v10 = vand.u32 4294901760, %v12981_v9  ;;  %v1007_v0 = vand.u32 4294901760, %v105_v17 }
  0x95   :  { %v11232_v11 = vpack.c.bf16 %v16103_v20, %v16102_v36  ;;  %v107_v36 = vld [vmem:[#allocation2 + $0x158] sm:$0xff]  ;;  %v63_v20 = vld [vmem:[%s15942_s0 + $0x10] sm:$0xff] }
  0x96   :  { %11225 = vmatpush3.bf16.msra.mxu0 %v11224_v40  ;;  %v13243_v34 = vsub.f32 %v105_v17, %v1007_v0 }
  0x97   :  { %11249 = vmatpush3.bf16.msra.mxu1 %v12799_v27  ;;  %11227 = vmatprep.subr.bf16.mxu0 %v11226_v46  ;;  %v16105_v27 = vand.u32 4294901760, %v12945_v2  ;;  %v98_v2 = vld [vmem:[#allocation2 + $0x110] sm:$0xff] }
  0x98   :  { %11251 = vmatprep.subr.bf16.mxu1 %v12813_v39  ;;  %v16107_v39 = vand.u32 4294901760, %v12962_v19  ;;  %v16111_v19 = vand.u32 4294901760, %v13019_v35  ;;  %v986_v9 = vand.u32 4294901760, %v98_v2 }
  0x99   :  { %v11234_v31 = vpack.c.bf16 %v16105_v27, %v16104_v22  ;;  %v1013_v22 = vand.u32 4294901760, %v107_v36  ;;  %v108_v27 = vld [vmem:[#allocation2 + $0x160] sm:$0xff] }
  0x9a   :  { %11229 = vmatpush3.bf16.msra.mxu0 %v11228_v63  ;;  %v11236_v55 = vpack.c.bf16 %v16107_v39, %v16106_v51  ;;  %v11240_v21 = vpack.c.bf16 %v16111_v19, %v16110_v53  ;;  %v13185_v26 = vsub.f32 %v98_v2, %v986_v9  ;;  %v12689_v63 = vmov 0.0  }
  0x9b   :  { %11253 = vmatpush3.bf16.msra.mxu1 %v12821_v45  ;;  %11231 = vmatprep.subr.bf16.mxu0 %v11230_v14  ;;  %v16108_v45 = vand.u32 4294901760, %v12966_v44  ;;  %v13182_v44 = vsub.f32 %v97_v32, %v983_v15  ;;  %v13249_v14 = vpack.c.bf16 %v1001_v8, %v998_v12  ;;  %v13263_v51 = vand.u32 4294901760, %v63_v20 }
  0x9c   :  { %11255 = vmatprep.subr.bf16.mxu1 %v12843_v62  ;;  %v99_v62 = vld [vmem:[#allocation2 + $0x118] sm:$0xff]  ;;  %v1087_v58 = vand.u32 4294901760, %v13185_v26 }
  0x9d   :  { %v11238_v56 = vpack.c.bf16 %v16109_v10, %v16108_v45  ;;  %v989_v24 = vand.u32 4294901760, %v99_v62  ;;  %v1080_v40 = vand.u32 4294901760, %v13182_v44  ;;  %v13273_v45 = vsub.f32 %v107_v36, %v1013_v22 }
  0x9e   :  { %11233 = vmatpush3.bf16.msra.mxu0 %v11232_v11 }
  0x9f   :  { %11257 = vmatpush3.bf16.msra.mxu1 %v12859_v16  ;;  %11235 = vmatprep.subr.bf16.mxu0 %v11234_v31  ;;  %v13180_v16 = vsub.f32 %v96_v61, %v980_v57  ;;  %v13187_v59 = vsub.f32 %v99_v62, %v989_v24  ;;  %v109_v31 = vld [vmem:[#allocation2 + $0x168] sm:$0xff]  ;;  %v13268_v61 = vpack.c.bf16 %v1007_v0, %v1004_v33  ;;  %v110_v62 = vld [vmem:[#allocation2 + $0x170] sm:$0xff] }
  0xa0   :  { %11259 = vmatprep.subr.bf16.mxu1 %v12874_v49  ;;  %v100_v49 = vld [vmem:[#allocation2 + $0x120] sm:$0xff]  ;;  %v1019_v2 = vand.u32 4294901760, %v109_v31  ;;  %v13282_v57 = vsub.f32 %v63_v20, %v13263_v51  ;;  %v1081_v12 = vsub.f32 %v13182_v44, %v1080_v40  ;;  %v1088_v20 = vsub.f32 %v13185_v26, %v1087_v58 }
  0xa1   :  { %v992_v35 = vand.u32 4294901760, %v100_v49  ;;  %v1073_v38 = vand.u32 4294901760, %v13180_v16 }
  0xa2   :  { %11237 = vmatpush3.bf16.msra.mxu0 %v11236_v55  ;;  %v1136_v55 = vand.u32 4294901760, %v13243_v34  ;;  %v13289_v19 = vsub.f32 %v109_v31, %v1019_v2  ;;  %v1082_v36 = vand.u32 4294901760, %v1081_v12 }
  0xa3   :  { %11261 = vmatpush3.bf16.msra.mxu1 %v12889_v4  ;;  %11239 = vmatprep.subr.bf16.mxu0 %v11238_v56  ;;  %v995_v4 = vand.u32 4294901760, %v101_v25  ;;  %v13207_v47 = vpack.c.bf16 %v1080_v40, %v1073_v38  ;;  %v1016_v56 = vand.u32 4294901760, %v108_v27  ;;  %v1074_v13 = vsub.f32 %v13180_v16, %v1073_v38 }
  0xa4   :  { %11263 = vmatprep.subr.bf16.mxu1 %v12904_v48  ;;  %v13196_v48 = vsub.f32 %v100_v49, %v992_v35  ;;  %v1022_v49 = vand.u32 4294901760, %v110_v62 }
  0xa5   :  { %v13199_v46 = vsub.f32 %v101_v25, %v995_v4  ;;  %v13230_v30 = vpack.c.bf16 %v995_v4, %v992_v35  ;;  %v13287_v53 = vsub.f32 %v108_v27, %v1016_v56  ;;  %v13294_v25 = vpack.c.bf16 %v1019_v2, %v1016_v56 }
  0xa6   :  { %11241 = vmatpush3.bf16.msra.mxu0 %v11240_v21  ;;  %v1101_v60 = vand.u32 4294901760, %v13196_v48  ;;  %v111_v21 = vld [vmem:[#allocation2 + $0x178] sm:$0xff]  ;;  %v1062_v4 = vand.u32 4294901760, %v13282_v57  ;;  %v13309_v17 = vsub.f32 %v110_v62, %v1022_v49  ;;  %v1075_v40 = vand.u32 4294901760, %v1074_v13 }
  0xa7   :  { %11265 = vmatpush3.bf16.msra.mxu1 %v12919_v23  ;;  %11274 = vmatprep.subr.bf16.mxu0 %v12687_v28  ;;  %v1094_v23 = vand.u32 4294901760, %v13187_v59  ;;  %v1108_v5 = vand.u32 4294901760, %v13199_v46  ;;  %v1025_v35 = vand.u32 4294901760, %v111_v21  ;;  %v1157_v8 = vand.u32 4294901760, %v13287_v53 }
  0xa8   :  { %11267 = vmatprep.subr.bf16.mxu1 %v12934_v7  ;;  %v13210_v7 = vpack.c.bf16 %v989_v24, %v986_v9  ;;  %v1150_v24 = vand.u32 4294901760, %v13273_v45  ;;  %v1063_v38 = vsub.f32 %v13282_v57, %v1062_v4  ;;  %v1102_v56 = vsub.f32 %v13196_v48, %v1101_v60 }
  0xa9   :  { %870 = vmatmul.mubr.f32.vlgmr.msra.gmra.mrb[4].mxu0 %v12997_v29  ;;  %v13220_v37 = vpack.c.bf16 %v1094_v23, %v1087_v58  ;;  %v11299_v58 = vpack.c.bf16 %v1082_v36, %v1075_v40  ;;  %v1089_v62 = vand.u32 4294901760, %v1088_v20  ;;  %v1137_v36 = vsub.f32 %v13243_v34, %v1136_v55 }
  0xaa   :  { %11276 = vmatpush3.bf16.msra.mxu0 %v13189_v41  ;;  %9434 = vmatprep.mubr.msk.f32.mxu0 %vm12688_vm0, %v12689_v63  ;;  %v1064_v31 = vand.u32 4294901760, %v1063_v38 }
  0xab   :  { %11269 = vmatpush3.bf16.msra.mxu1 %v16096_v18  ;;  %11277 = vmatprep.subr.bf16.mxu0 %v12687_v28  ;;  %v13238_v18 = vpack.c.bf16 %v1108_v5, %v1101_v60 }
  0xac   :  { %11271 = vmatprep.subr.bf16.mxu1 %v16097_v3  ;;  %v13241_v3 = vsub.f32 %v104_v1, %v1004_v33  ;;  %v1164_v1 = vand.u32 4294901760, %v13289_v19  ;;  %v13311_v33 = vsub.f32 %v111_v21, %v1025_v35 }
  0xae   :  { %11279 = vmatpush3.bf16.msra.mxu0 %v13210_v7  ;;  %v1129_v39 = vand.u32 4294901760, %v13241_v3  ;;  %v13313_v0 = vpack.c.bf16 %v1164_v1, %v1157_v8  ;;  %v1178_v27 = vand.u32 4294901760, %v13311_v33 }
  0xaf   :  { %11273 = vmatpush3.bf16.msra.mxu1 %v16098_v6  ;;  %11280 = vmatprep.subr.bf16.mxu0 %v12687_v28  ;;  %v1122_v6 = vand.u32 4294901760, %v13225_v50 }
  0xb0   :  { %11418 = vmatprep.subr.bf16.mxu1 %v12687_v28  ;;  %v13279_v10 = vpack.c.bf16 %v1136_v55, %v1129_v39  ;;  %v1165_v55 = vsub.f32 %v13289_v19, %v1164_v1 }
  0xb1   :  { %v13259_v11 = vpack.c.bf16 %v1122_v6, %v1115_v52  ;;  %v1123_v12 = vsub.f32 %v13225_v50, %v1122_v6 }
  0xb2   :  { %974 = vmatmul.mubr.f32.vlgmr.msra.gmra.mrb[4].mxu1 %v12997_v29  ;;  %11282 = vmatpush3.bf16.msra.mxu0 %v13230_v30  ;;  %v1010_v29 = vand.u32 4294901760, %v106_v54 }
  0xb3   :  { %11283 = vmatprep.subr.bf16.mxu0 %v12687_v28  ;;  %9644 = vmatprep.mubr.msk.f32.mxu1 %vm12688_vm0, %v12689_v63  ;;  %v1124_v40 = vand.u32 4294901760, %v1123_v12  ;;  %v11329_v12 = vpack.c.bf16 %v13199_v46, %v13196_v48  ;;  %v11344_v48 = vpack.c.bf16 %v13311_v33, %v13309_v17 }
  0xb4   :  { %v13271_v32 = vsub.f32 %v106_v54, %v1010_v29  ;;  %v13285_v15 = vpack.c.bf16 %v1013_v22, %v1010_v29  ;;  %v13315_v54 = vpack.c.bf16 %v1025_v35, %v1022_v49  ;;  %v1095_v29 = vsub.f32 %v13187_v59, %v1094_v23 }
  0xb5   :  { %v1171_v22 = vand.u32 4294901760, %v13309_v17  ;;  %v1109_v23 = vsub.f32 %v13199_v46, %v1108_v5  ;;  %v1116_v49 = vsub.f32 %v13223_v42, %v1115_v52  ;;  %v1103_v35 = vand.u32 4294901760, %v1102_v56  ;;  %v1621_v46 = vld [vmem:[#allocation6] sm:$0xff] }
  0xb6   :  { %11285 = vmatpush3.bf16.msra.mxu0 %v13249_v14  ;;  %v1143_v9 = vand.u32 4294901760, %v13271_v32  ;;  %v1096_v21 = vand.u32 4294901760, %v1095_v29  ;;  %v1130_v52 = vsub.f32 %v13241_v3, %v1129_v39  ;;  %v1151_v56 = vsub.f32 %v13273_v45, %v1150_v24 }
  0xb7   :  { %11286 = vmatprep.subr.bf16.mxu0 %v12687_v28  ;;  %v13333_v2 = vpack.c.bf16 %v1178_v27, %v1171_v22  ;;  %v1110_v13 = vand.u32 4294901760, %v1109_v23  ;;  %v1117_v5 = vand.u32 4294901760, %v1116_v49 }
  0xb8   :  { %v13297_v43 = vpack.c.bf16 %v1150_v24, %v1143_v9  ;;  %v11302_v60 = vpack.c.bf16 %v1096_v21, %v1089_v62  ;;  %v1144_v6 = vsub.f32 %v13271_v32, %v1143_v9  ;;  %v1131_v29 = vand.u32 4294901760, %v1130_v52 }
  0xb9   :  { %v11305_v38 = vpack.c.bf16 %v1110_v13, %v1103_v35  ;;  %v11308_v20 = vpack.c.bf16 %v1124_v40, %v1117_v5  ;;  %v1152_v21 = vand.u32 4294901760, %v1151_v56  ;;  %v1172_v9 = vsub.f32 %v13309_v17, %v1171_v22  ;;  %v1625_v5 = vld [vmem:[#allocation6 + $0x20] sm:$0xff]  ;;  %v1627_v17 = vld [vmem:[#allocation6 + $0x30] sm:$0xff] }
  0xba   :  { %11288 = vmatpush3.bf16.msra.mxu0 %v13268_v61  ;;  %v1145_v62 = vand.u32 4294901760, %v1144_v6  ;;  %v1179_v24 = vsub.f32 %v13311_v33, %v1178_v27  ;;  %v11323_v22 = vpack.c.bf16 %v13182_v44, %v13180_v16  ;;  %v11326_v27 = vpack.c.bf16 %v13187_v59, %v13185_v26  ;;  %v1628_v33 = vld [vmem:[#allocation6 + $0x38] sm:$0xff] }
  0xbb   :  { %11289 = vmatprep.subr.bf16.mxu0 %v12687_v28  ;;  %v1173_v35 = vand.u32 4294901760, %v1172_v9  ;;  %v11332_v16 = vpack.c.bf16 %v13225_v50, %v13223_v42  ;;  %v11335_v44 = vpack.c.bf16 %v13243_v34, %v13241_v3  ;;  %v11338_v26 = vpack.c.bf16 %v13273_v45, %v13271_v32  ;;  %v1622_v42 = vld [vmem:[#allocation6 + $0x8] sm:$0xff]  ;;  %v1623_v50 = vld [vmem:[#allocation6 + $0x10] sm:$0xff]  ;;  %v1624_v32 = vld [vmem:[#allocation6 + $0x18] sm:$0xff] }
  0xbc   :  { %v11314_v23 = vpack.c.bf16 %v1152_v21, %v1145_v62  ;;  %v1180_v13 = vand.u32 4294901760, %v1179_v24  ;;  %v11341_v59 = vpack.c.bf16 %v13289_v19, %v13287_v53  ;;  %v1643_v3 = vand.u32 4294901760, %v1621_v46 }
  0xbd   :  { %v1646_v34 = vand.u32 4294901760, %v1622_v42  ;;  %v1649_v45 = vand.u32 4294901760, %v1623_v50  ;;  %v1652_v19 = vand.u32 4294901760, %v1624_v32 }
  0xbe   :  { %11291 = vmatpush3.bf16.msra.mxu0 %v13285_v15  ;;  %v11320_v1 = vpack.c.bf16 %v1180_v13, %v1173_v35 }
  0xbf   :  { %11292 = vmatprep.subr.bf16.mxu0 %v12687_v28  ;;  %v13399_v52 = vpack.c.bf16 %v1646_v34, %v1643_v3  ;;  %v13403_v6 = vsub.f32 %v1622_v42, %v1646_v34  ;;  %v13406_v56 = vpack.c.bf16 %v1652_v19, %v1649_v45  ;;  %v1633_v34 = vld [vmem:[#allocation6 + $0x60] sm:$0xff] }
  0xc1   :  { %11420 = vmatpush3.bf16.msra.mxu1 %v13399_v52 }
  0xc2   :  { %11294 = vmatpush3.bf16.msra.mxu0 %v13294_v25  ;;  %11421 = vmatprep.subr.bf16.mxu1 %v12687_v28 }
  0xc3   :  { %11295 = vmatprep.subr.bf16.mxu0 %v12687_v28 }
  0xc5   :  { %11423 = vmatpush3.bf16.msra.mxu1 %v13406_v56 }
  0xc6   :  { %11297 = vmatpush3.bf16.msra.mxu0 %v13315_v54  ;;  %11424 = vmatprep.subr.bf16.mxu1 %v12687_v28 }
  0xc7   :  { %11298 = vmatprep.subr.bf16.mxu0 %v12687_v28 }
  0xc9   :  { %9435 = vmatmul.mubr.f32.vlgmr.msra.gmra.mrb[6].mxu0 %v1064_v31  ;;  %v1138_v31 = vand.u32 4294901760, %v1137_v36  ;;  %v13401_v36 = vsub.f32 %v1621_v46, %v1643_v3  ;;  %v1631_v46 = vld [vmem:[#allocation6 + $0x50] sm:$0xff] }
  0xca   :  { %11300 = vmatpush3.bf16.msra.mxu0 %v11299_v58  ;;  %9469 = vmatprep.mubr.msk.f32.mxu0 %vm12688_vm0, %v12689_v63  ;;  %v1158_v58 = vsub.f32 %v13287_v53, %v1157_v8  ;;  %v1626_v53 = vld [vmem:[#allocation6 + $0x28] sm:$0xff]  ;;  %v1673_v42 = vand.u32 4294901760, %v1631_v46 }
  0xcb   :  { %11301 = vmatprep.subr.bf16.mxu0 %v12687_v28  ;;  %v11311_v39 = vpack.c.bf16 %v1138_v31, %v1131_v29  ;;  %v1658_v40 = vand.u32 4294901760, %v1626_v53  ;;  %v1629_v29 = vld [vmem:[#allocation6 + $0x40] sm:$0xff]  ;;  %v1630_v31 = vld [vmem:[#allocation6 + $0x48] sm:$0xff] }
  0xcc   :  { %v1159_v49 = vand.u32 4294901760, %v1158_v58  ;;  %v13408_v58 = vsub.f32 %v1623_v50, %v1649_v45 }
  0xcd   :  { %v13415_v21 = vsub.f32 %v1626_v53, %v1658_v40  ;;  %v1635_v53 = vld [vmem:[#allocation6 + $0x70] sm:$0xff] }
  0xce   :  { %11303 = vmatpush3.bf16.msra.mxu0 %v11302_v60  ;;  %v1166_v60 = vand.u32 4294901760, %v1165_v55  ;;  %v1664_v55 = vand.u32 4294901760, %v1628_v33 }
  0xcf   :  { %11304 = vmatprep.subr.bf16.mxu0 %v12687_v28 }
  0xd0   :  { %v11317_v8 = vpack.c.bf16 %v1166_v60, %v1159_v49  ;;  %v1670_v49 = vand.u32 4294901760, %v1630_v31  ;;  %v13421_v60 = vsub.f32 %v1628_v33, %v1664_v55  ;;  %v1743_v33 = vand.u32 4294901760, %v13403_v6 }
  0xd2   :  { %11306 = vmatpush3.bf16.msra.mxu0 %v11305_v38  ;;  %v1655_v38 = vand.u32 4294901760, %v1625_v5 }
  0xd3   :  { %11307 = vmatprep.subr.bf16.mxu0 %v12687_v28 }
  0xd4   :  { %v13413_v62 = vsub.f32 %v1625_v5, %v1655_v38  ;;  %v13429_v35 = vpack.c.bf16 %v1658_v40, %v1655_v38  ;;  %v1685_v38 = vand.u32 4294901760, %v1635_v53 }
  0xd6   :  { %11309 = vmatpush3.bf16.msra.mxu0 %v11308_v20  ;;  %v1661_v20 = vand.u32 4294901760, %v1627_v17  ;;  %11426 = vmatpush3.bf16.msra.mxu1 %v13429_v35 }
  0xd7   :  { %11310 = vmatprep.subr.bf16.mxu0 %v12687_v28  ;;  %11427 = vmatprep.subr.bf16.mxu1 %v12687_v28 }
  0xd8   :  { %v13417_v9 = vsub.f32 %v1627_v17, %v1661_v20  ;;  %v13435_v13 = vpack.c.bf16 %v1664_v55, %v1661_v20  ;;  %v1736_v17 = vand.u32 4294901760, %v13401_v36  ;;  %v13519_v55 = vsub.f32 %v1631_v46, %v1673_v42 }
  0xda   :  { %11312 = vmatpush3.bf16.msra.mxu0 %v11311_v39  ;;  %v13410_v39 = vsub.f32 %v1624_v32, %v1652_v19  ;;  %11429 = vmatpush3.bf16.msra.mxu1 %v13435_v13  ;;  %v1679_v32 = vand.u32 4294901760, %v1633_v34  ;;  %v1636_v19 = vld [vmem:[#allocation6 + $0x78] sm:$0xff] }
  0xdb   :  { %11313 = vmatprep.subr.bf16.mxu0 %v12687_v28  ;;  %11430 = vmatprep.subr.bf16.mxu1 %v12687_v28  ;;  %v1688_v40 = vand.u32 4294901760, %v1636_v19 }
  0xdd   :  { %v13511_v20 = vpack.c.bf16 %v1688_v40, %v1685_v38 }
  0xde   :  { %11315 = vmatpush3.bf16.msra.mxu0 %v11314_v23  ;;  %v1667_v23 = vand.u32 4294901760, %v1629_v29 }
  0xdf   :  { %11316 = vmatprep.subr.bf16.mxu0 %v12687_v28 }
  0xe0   :  { %v13424_v24 = vsub.f32 %v1629_v29, %v1667_v23  ;;  %v1737_v29 = vsub.f32 %v13401_v36, %v1736_v17 }
  0xe2   :  { %11318 = vmatpush3.bf16.msra.mxu0 %v11317_v8  ;;  %v13426_v8 = vsub.f32 %v1630_v31, %v1670_v49  ;;  %v1744_v31 = vsub.f32 %v13403_v6, %v1743_v33 }
  0xe3   :  { %11319 = vmatprep.subr.bf16.mxu0 %v12687_v28 }
  0xe6   :  { %11321 = vmatpush3.bf16.msra.mxu0 %v11320_v1  ;;  %v13441_v1 = vpack.c.bf16 %v1670_v49, %v1667_v23  ;;  %v13523_v49 = vsub.f32 %v1633_v34, %v1679_v32 }
  0xe7   :  { %11322 = vmatprep.subr.bf16.mxu0 %v12687_v28 }
  0xe8   :  { %11432 = vmatpush3.bf16.msra.mxu1 %v13441_v1 }
  0xe9   :  { %9470 = vmatmul.mubr.f32.vlgmr.msra.gmra.mrb[6].mxu0 %v13263_v51  ;;  %11433 = vmatprep.subr.bf16.mxu1 %v12687_v28 }
  0xea   :  { %11324 = vmatpush3.bf16.msra.mxu0 %v11323_v22  ;;  %9504 = vmatprep.mubr.msk.f32.mxu0 %vm12688_vm0, %v12689_v63 }
  0xeb   :  { %11325 = vmatprep.subr.bf16.mxu0 %v12687_v28 }
  0xee   :  { %11327 = vmatpush3.bf16.msra.mxu0 %v11326_v27 }
  0xef   :  { %11328 = vmatprep.subr.bf16.mxu0 %v12687_v28 }
  0xf2   :  { %11330 = vmatpush3.bf16.msra.mxu0 %v11329_v12 }
  0xf3   :  { %11331 = vmatprep.subr.bf16.mxu0 %v12687_v28 }
  0xf6   :  { %11333 = vmatpush3.bf16.msra.mxu0 %v11332_v16 }
  0xf7   :  { %11334 = vmatprep.subr.bf16.mxu0 %v12687_v28 }
  0xfa   :  { %11336 = vmatpush3.bf16.msra.mxu0 %v11335_v44 }
  0xfb   :  { %11337 = vmatprep.subr.bf16.mxu0 %v12687_v28 }
  0xfe   :  { %11339 = vmatpush3.bf16.msra.mxu0 %v11338_v26 }
  0xff   :  { %11340 = vmatprep.subr.bf16.mxu0 %v12687_v28 }
 0x102   :  { %11342 = vmatpush3.bf16.msra.mxu0 %v11341_v59 }
 0x103   :  { %11343 = vmatprep.subr.bf16.mxu0 %v12687_v28 }
 0x106   :  { %11345 = vmatpush3.bf16.msra.mxu0 %v11344_v48 }
 0x107   :  { %11346 = vmatprep.subr.bf16.mxu0 %v12687_v28 }
 0x109   :  { %9505 = vmatmul.mubr.f32.vlgmr.msra.gmra.mrb[6].mxu0 %v13282_v57 }
 0x10a   :  { %11348 = vmatpush3.bf16.msra.mxu0 %v13189_v41  ;;  %9539 = vmatprep.mubr.msk.f32.mxu0 %vm12688_vm0, %v12689_v63 }
 0x10b   :  { %11349 = vmatprep.subr.bf16.mxu0 %v12687_v28 }
 0x10e   :  { %11351 = vmatpush3.bf16.msra.mxu0 %v13210_v7 }
 0x10f   :  { %11352 = vmatprep.subr.bf16.mxu0 %v12687_v28 }
 0x112   :  { %11354 = vmatpush3.bf16.msra.mxu0 %v13230_v30 }
 0x113   :  { %11355 = vmatprep.subr.bf16.mxu0 %v12687_v28 }
 0x116   :  { %11357 = vmatpush3.bf16.msra.mxu0 %v13249_v14 }
 0x117   :  { %11358 = vmatprep.subr.bf16.mxu0 %v12687_v28 }
 0x11a   :  { %11360 = vmatpush3.bf16.msra.mxu0 %v13268_v61 }
 0x11b   :  { %11361 = vmatprep.subr.bf16.mxu0 %v12687_v28 }
 0x11e   :  { %11363 = vmatpush3.bf16.msra.mxu0 %v13285_v15 }
 0x11f   :  { %11364 = vmatprep.subr.bf16.mxu0 %v12687_v28 }
 0x122   :  { %11366 = vmatpush3.bf16.msra.mxu0 %v13294_v25 }
 0x123   :  { %11367 = vmatprep.subr.bf16.mxu0 %v12687_v28 }
 0x126   :  { %11369 = vmatpush3.bf16.msra.mxu0 %v13315_v54 }
 0x127   :  { %11370 = vmatprep.subr.bf16.mxu0 %v12687_v28 }
 0x129   :  { %9540 = vmatmul.mubr.f32.vlgmr.msra.gmra.mrb[6].mxu0 %v1062_v4 }
 0x12a   :  { %11372 = vmatpush3.bf16.msra.mxu0 %v13207_v47  ;;  %9574 = vmatprep.mubr.msk.f32.mxu0 %vm12688_vm0, %v12689_v63 }
 0x12b   :  { %11373 = vmatprep.subr.bf16.mxu0 %v12687_v28 }
 0x12e   :  { %11375 = vmatpush3.bf16.msra.mxu0 %v13220_v37  ;;  %v8304_v37 = vld [vmem:[%s15946_s4] ss:$0 sm:$0xff] }
 0x12f   :  { %11376 = vmatprep.subr.bf16.mxu0 %v12687_v28 }
 0x132   :  { %11378 = vmatpush3.bf16.msra.mxu0 %v13238_v18 }
 0x133   :  { %11379 = vmatprep.subr.bf16.mxu0 %v12687_v28 }
 0x136   :  { %11381 = vmatpush3.bf16.msra.mxu0 %v13259_v11 }
 0x137   :  { %11382 = vmatprep.subr.bf16.mxu0 %v12687_v28 }
 0x13a   :  { %11384 = vmatpush3.bf16.msra.mxu0 %v13279_v10 }
 0x13b   :  { %11385 = vmatprep.subr.bf16.mxu0 %v12687_v28 }
 0x13c   :  { %v8408_v47 = vpop.f32.mrb[0].mxu0 }
 0x13d   :  { %v8409_v57 = vpop.f32.mrb[1].mxu0 }
 0x13e   :  { %v8410_v4 = vadd.f32 %v8409_v57, %v8408_v47  ;;  %11387 = vmatpush3.bf16.msra.mxu0 %v13297_v43  ;;  %v13528_v57 = vsub.f32 %v1635_v53, %v1685_v38 }
 0x13f   :  { %11388 = vmatprep.subr.bf16.mxu0 %v12687_v28 }
 0x140   :  { %v226_v10 = vadd.f32 %v8410_v4, %v8304_v37  ;;  %v13530_v4 = vsub.f32 %v1636_v19, %v1688_v40  ;;  %v1738_v37 = vand.u32 4294901760, %v1737_v29  ;;  %v15997_v19 = vand.u32 4294901760, %v13519_v55 }
 0x142   :  { %11390 = vmatpush3.bf16.msra.mxu0 %v13313_v0  ;;  %v1807_v29 = vsub.f32 %v13519_v55, %v15997_v19 }
 0x143   :  { %11391 = vmatprep.subr.bf16.mxu0 %v12687_v28 }
 0x145   :  { %v8443_v18 = vpop.f32.mrb[0].mxu1 }
 0x146   :  { %v8444_v11 = vpop.f32.mrb[1].mxu1  ;;  %11393 = vmatpush3.bf16.msra.mxu0 %v13333_v2 }
 0x147   :  { %v8445_v22 = vadd.f32 %v8444_v11, %v8443_v18  ;;  %11394 = vmatprep.subr.bf16.mxu0 %v12687_v28  ;;  %v1745_v18 = vand.u32 4294901760, %v1744_v31  ;;  %v16005_v11 = vand.u32 4294901760, %v13408_v58 }
 0x149   :  { %v458_v27 = vadd.f32 %v8445_v22, %v226_v10  ;;  %9575 = vmatmul.mubr.f32.vlgmr.msra.gmra.mrb[6].mxu0 %v13263_v51  ;;  %v16004_v10 = vand.u32 4294901760, %v13410_v39  ;;  %v13535_v22 = vpack.c.bf16 %v1745_v18, %v1738_v37  ;;  %v1808_v37 = vand.u32 4294901760, %v1807_v29 }
 0x14a   :  { %11396 = vmatpush3.bf16.msra.mxu0 %v13189_v41  ;;  %9609 = vmatprep.mubr.msk.f32.mxu0 %vm12688_vm0, %v12689_v63  ;;  %v11470_v29 = vpack.c.bf16 %v13410_v39, %v13408_v58 }
 0x14b   :  { %11397 = vmatprep.subr.bf16.mxu0 %v12687_v28 }
 0x14e   :  { %11399 = vmatpush3.bf16.msra.mxu0 %v13210_v7 }
 0x14f   :  { %11400 = vmatprep.subr.bf16.mxu0 %v12687_v28 }
 0x152   :  { %11402 = vmatpush3.bf16.msra.mxu0 %v13230_v30 }
 0x153   :  { %11403 = vmatprep.subr.bf16.mxu0 %v12687_v28 }
 0x156   :  { %11405 = vmatpush3.bf16.msra.mxu0 %v13249_v14 }
 0x157   :  { %11406 = vmatprep.subr.bf16.mxu0 %v12687_v28 }
 0x15a   :  { %11408 = vmatpush3.bf16.msra.mxu0 %v13268_v61 }
 0x15b   :  { %11409 = vmatprep.subr.bf16.mxu0 %v12687_v28 }
 0x15c   :  { %v8478_v41 = vpop.f32.mrb[2].mxu0 }
 0x15d   :  { %v8479_v43 = vpop.f32.mrb[3].mxu0 }
 0x15e   :  { %v8480_v0 = vadd.f32 %v8479_v43, %v8478_v41  ;;  %11411 = vmatpush3.bf16.msra.mxu0 %v13285_v15  ;;  %v1758_v41 = vsub.f32 %v13410_v39, %v16004_v10  ;;  %v16003_v43 = vand.u32 4294901760, %v13413_v62 }
 0x15f   :  { %11412 = vmatprep.subr.bf16.mxu0 %v12687_v28 }
 0x160   :  { %v596_v7 = vadd.f32 %v8480_v0, %v458_v27  ;;  %v1751_v27 = vsub.f32 %v13408_v58, %v16005_v11  ;;  %v16002_v0 = vand.u32 4294901760, %v13415_v21 }
 0x162   :  { %11414 = vmatpush3.bf16.msra.mxu0 %v13294_v25 }
 0x163   :  { %11415 = vmatprep.subr.bf16.mxu0 %v12687_v28 }
 0x165   :  { %v8513_v30 = vpop.f32.mrb[2].mxu1 }
 0x166   :  { %v8514_v14 = vpop.f32.mrb[3].mxu1  ;;  %11417 = vmatpush3.bf16.msra.mxu0 %v13315_v54  ;;  %v1632_v54 = vld [vmem:[#allocation6 + $0x58] sm:$0xff] }
 0x167   :  { %v8515_v2 = vadd.f32 %v8514_v14, %v8513_v30  ;;  %11562 = vmatprep.subr.bf16.mxu0 %v12687_v28  ;;  %v1676_v50 = vand.u32 4294901760, %v1632_v54  ;;  %v1759_v30 = vand.u32 4294901760, %v1758_v41  ;;  %v1765_v14 = vsub.f32 %v13413_v62, %v16003_v43 }
 0x169   :  { %v704_v61 = vadd.f32 %v8515_v2, %v596_v7  ;;  %9610 = vmatmul.mubr.f32.vlgmr.msra.gmra.mrb[6].mxu0 %v13263_v51  ;;  %v13501_v3 = vpack.c.bf16 %v1676_v50, %v1673_v42  ;;  %v1634_v51 = vld [vmem:[#allocation6 + $0x68] sm:$0xff]  ;;  %v13521_v23 = vsub.f32 %v1632_v54, %v1676_v50  ;;  %v1752_v7 = vand.u32 4294901760, %v1751_v27 }
 0x16a   :  { %9854 = vmatprep.mubr.msk.f32.mxu0 %vm12688_vm0, %v12689_v63  ;;  %v1682_v45 = vand.u32 4294901760, %v1634_v51  ;;  %v1772_v2 = vsub.f32 %v13415_v21, %v16002_v0  ;;  %v15999_v42 = vand.u32 4294901760, %v13424_v24  ;;  %v15998_v50 = vand.u32 4294901760, %v13426_v8 }
 0x16b   :  { %11435 = vmatpush3.bf16.msra.mxu1 %v13501_v3  ;;  %v15996_v38 = vand.u32 4294901760, %v13521_v23  ;;  %v15995_v27 = vand.u32 4294901760, %v13523_v49 }
 0x16c   :  { %11436 = vmatprep.subr.bf16.mxu1 %v12687_v28  ;;  %v13505_v5 = vpack.c.bf16 %v1682_v45, %v1679_v32  ;;  %v13525_v47 = vsub.f32 %v1634_v51, %v1682_v45  ;;  %v1793_v51 = vsub.f32 %v13424_v24, %v15999_v42  ;;  %v1800_v32 = vsub.f32 %v13426_v8, %v15998_v50  ;;  %v2294_v42 = vld [vmem:[#allocation6 + $0xc8] sm:$0xff] }
 0x16d   :  { %v1814_v31 = vsub.f32 %v13521_v23, %v15996_v38 }
 0x16e   :  { %v1794_v45 = vand.u32 4294901760, %v1793_v51  ;;  %v1801_v53 = vand.u32 4294901760, %v1800_v32  ;;  %v15994_v41 = vand.u32 4294901760, %v13525_v47 }
 0x16f   :  { %11438 = vmatpush3.bf16.msra.mxu1 %v13505_v5  ;;  %v1815_v18 = vand.u32 4294901760, %v1814_v31  ;;  %v11473_v31 = vpack.c.bf16 %v13415_v21, %v13413_v62 }
 0x170   :  { %11439 = vmatprep.subr.bf16.mxu1 %v12687_v28  ;;  %v11455_v40 = vpack.c.bf16 %v1801_v53, %v1794_v45  ;;  %v11467_v53 = vpack.c.bf16 %v13403_v6, %v13401_v36  ;;  %v16114_v36 = vand.u32 4294901760, %v13413_v62  ;;  %v16115_v6 = vand.u32 4294901760, %v13415_v21 }
 0x171   :  { %v16120_v62 = vand.u32 4294901760, %v13519_v55  ;;  %v16121_v21 = vand.u32 4294901760, %v13521_v23 }
 0x173   :  { %11441 = vmatpush3.bf16.msra.mxu1 %v13511_v20 }
 0x174   :  { %11442 = vmatprep.subr.bf16.mxu1 %v12687_v28 }
 0x17c   :  { %v8548_v15 = vpop.f32.mrb[4].mxu0 }
 0x17d   :  { %v8549_v12 = vpop.f32.mrb[5].mxu0 }
 0x17e   :  { %v8550_v16 = vadd.f32 %v8549_v12, %v8548_v15  ;;  %v1766_v15 = vand.u32 4294901760, %v1765_v14  ;;  %v1773_v12 = vand.u32 4294901760, %v1772_v2  ;;  %v1828_v14 = vsub.f32 %v13525_v47, %v15994_v41 }
 0x180   :  { %v872_v44 = vadd.f32 %v8550_v16, %v704_v61  ;;  %v11446_v61 = vpack.c.bf16 %v1759_v30, %v1752_v7  ;;  %v16001_v16 = vand.u32 4294901760, %v13417_v9  ;;  %v11458_v7 = vpack.c.bf16 %v1815_v18, %v1808_v37 }
 0x181   :  { %v1821_v30 = vsub.f32 %v13523_v49, %v15995_v27  ;;  %v11476_v37 = vpack.c.bf16 %v13421_v60, %v13417_v9  ;;  %v11479_v18 = vpack.c.bf16 %v13426_v8, %v13424_v24 }
 0x183   :  { %v1822_v2 = vand.u32 4294901760, %v1821_v30  ;;  %v11482_v30 = vpack.c.bf16 %v13521_v23, %v13519_v55  ;;  %v2298_v55 = vld [vmem:[#allocation6 + $0xe8] sm:$0xff] }
 0x184   :  { %v2346_v23 = vand.u32 4294901760, %v2298_v55 }
 0x185   :  { %v8583_v25 = vpop.f32.mrb[4].mxu1 }
 0x186   :  { %v8584_v26 = vpop.f32.mrb[5].mxu1 }
 0x187   :  { %v8585_v59 = vadd.f32 %v8584_v26, %v8583_v25  ;;  %v11449_v25 = vpack.c.bf16 %v1773_v12, %v1766_v15  ;;  %v1779_v26 = vsub.f32 %v13417_v9, %v16001_v16  ;;  %v1829_v15 = vand.u32 4294901760, %v1828_v14 }
 0x188   :  { %v15993_v12 = vand.u32 4294901760, %v13528_v57  ;;  %v11485_v14 = vpack.c.bf16 %v13525_v47, %v13523_v49 }
 0x189   :  { %v13499_v48 = vadd.f32 %v8585_v59, %v872_v44  ;;  %v16000_v44 = vand.u32 4294901760, %v13421_v60  ;;  %v1780_v46 = vand.u32 4294901760, %v1779_v26  ;;  %v15992_v26 = vand.u32 4294901760, %v13530_v4 }
 0x18b   :  { %v1786_v59 = vsub.f32 %v13421_v60, %v16000_v44 }
 0x18d   :  { %v1787_v54 = vand.u32 4294901760, %v1786_v59  ;;  %v11461_v59 = vpack.c.bf16 %v1829_v15, %v1822_v2  ;;  %v11488_v2 = vpack.c.bf16 %v13530_v4, %v13528_v57 }
 0x18f   :  { %v11452_v34 = vpack.c.bf16 %v1787_v54, %v1780_v46  ;;  %v1835_v46 = vsub.f32 %v13528_v57, %v15993_v12  ;;  %v1842_v54 = vsub.f32 %v13530_v4, %v15992_v26 }
 0x191   :  { %v1836_v51 = vand.u32 4294901760, %v1835_v46  ;;  %v1843_v32 = vand.u32 4294901760, %v1842_v54 }
 0x193   :  { %v11464_v45 = vpack.c.bf16 %v1843_v32, %v1836_v51 }
 0x23c   :  { %v1616_v15 = vpop.f32.mrb[6].mxu0 }
 0x23d   :  { %v12426_v46 = vadd.f32 %v1616_v15, %v13499_v48  ;;  %v9611_v54 = vpop.f32.mrb[7].mxu0  ;;  %v2285_v48 = vld [vmem:[#allocation6 + $0x80] sm:$0xff] }
 0x23e   :  { %v2292_v54 = vld [vmem:[#allocation6 + $0xb8] sm:$0xff] }
 0x23f   :  { %v1620_v51 = vmax.f32 %v12426_v46, 0.0  ;;  %v2291_v46 = vld [vmem:[#allocation6 + $0xb0] sm:$0xff]  ;;  %v2328_v11 = vand.u32 4294901760, %v2292_v54 }
 0x240   :  { %v2325_v10 = vand.u32 4294901760, %v2291_v46 }
 0x241   :  { %v13608_v32 = vand.u32 4294901760, %v1620_v51 }
 0x243   :  { %v13611_v26 = vsub.f32 %v1620_v51, %v13608_v32  ;;  %v2293_v51 = vld [vmem:[#allocation6 + $0xc0] sm:$0xff] }
 0x245   :  { %v1725_v12 = vand.u32 4294901760, %v13611_v26 }
 0x247   :  { %v1726_v41 = vsub.f32 %v13611_v26, %v1725_v12 }
 0x249   :  { %v1727_v27 = vand.u32 4294901760, %v1726_v41  ;;  %v2289_v41 = vld [vmem:[#allocation6 + $0xa0] sm:$0xff] }
 0x24b   :  { %9645 = vmatmul.mubr.f32.vlgmr.msra.gmra.mrb[6].mxu1 %v1727_v27 }
 0x24c   :  { %11444 = vmatpush3.bf16.msra.mxu1 %v13535_v22  ;;  %9679 = vmatprep.mubr.msk.f32.mxu1 %vm12688_vm0, %v12689_v63  ;;  %v2286_v22 = vld [vmem:[#allocation6 + $0x88] sm:$0xff] }
 0x24d   :  { %11445 = vmatprep.subr.bf16.mxu1 %v12687_v28 }
 0x250   :  { %11447 = vmatpush3.bf16.msra.mxu1 %v11446_v61  ;;  %v2287_v61 = vld [vmem:[#allocation6 + $0x90] sm:$0xff] }
 0x251   :  { %11448 = vmatprep.subr.bf16.mxu1 %v12687_v28  ;;  %v2313_v27 = vand.u32 4294901760, %v2287_v61 }
 0x253   :  { %v13638_v50 = vsub.f32 %v2287_v61, %v2313_v27  ;;  %v13651_v61 = vsub.f32 %v2291_v46, %v2325_v10 }
 0x254   :  { %11450 = vmatpush3.bf16.msra.mxu1 %v11449_v25  ;;  %v2307_v25 = vand.u32 4294901760, %v2285_v48 }
 0x255   :  { %11451 = vmatprep.subr.bf16.mxu1 %v12687_v28 }
 0x258   :  { %11453 = vmatpush3.bf16.msra.mxu1 %v11452_v34  ;;  %v2310_v34 = vand.u32 4294901760, %v2286_v22 }
 0x259   :  { %11454 = vmatprep.subr.bf16.mxu1 %v12687_v28 }
 0x25a   :  { %v13632_v38 = vpack.c.bf16 %v2310_v34, %v2307_v25  ;;  %v13636_v19 = vsub.f32 %v2286_v22, %v2310_v34  ;;  %v2334_v22 = vand.u32 4294901760, %v2294_v42 }
 0x25c   :  { %11456 = vmatpush3.bf16.msra.mxu1 %v11455_v40  ;;  %v2288_v40 = vld [vmem:[#allocation6 + $0x98] sm:$0xff]  ;;  %11564 = vmatpush3.bf16.msra.mxu0 %v13632_v38 }
 0x25d   :  { %11457 = vmatprep.subr.bf16.mxu1 %v12687_v28  ;;  %11565 = vmatprep.subr.bf16.mxu0 %v12687_v28 }
 0x260   :  { %11459 = vmatpush3.bf16.msra.mxu1 %v11458_v7  ;;  %v2290_v7 = vld [vmem:[#allocation6 + $0xa8] sm:$0xff] }
 0x261   :  { %11460 = vmatprep.subr.bf16.mxu1 %v12687_v28  ;;  %v2322_v15 = vand.u32 4294901760, %v2290_v7 }
 0x263   :  { %v13647_v43 = vsub.f32 %v2290_v7, %v2322_v15 }
 0x264   :  { %11462 = vmatpush3.bf16.msra.mxu1 %v11461_v59  ;;  %v2316_v59 = vand.u32 4294901760, %v2288_v40 }
 0x265   :  { %11463 = vmatprep.subr.bf16.mxu1 %v12687_v28 }
 0x266   :  { %v13640_v44 = vpack.c.bf16 %v2316_v59, %v2313_v27  ;;  %v13642_v16 = vsub.f32 %v2288_v40, %v2316_v59  ;;  %v13657_v40 = vsub.f32 %v2294_v42, %v2334_v22  ;;  %v13671_v42 = vpack.c.bf16 %v2328_v11, %v2325_v10 }
 0x267   :  { %v16112_v10 = vand.u32 4294901760, %v13408_v58  ;;  %v16117_v58 = vand.u32 4294901760, %v13421_v60  ;;  %v16123_v60 = vand.u32 4294901760, %v13525_v47  ;;  %v2300_v47 = vld [vmem:[#allocation6 + $0xf8] sm:$0xff] }
 0x268   :  { %11465 = vmatpush3.bf16.msra.mxu1 %v11464_v45  ;;  %v2319_v45 = vand.u32 4294901760, %v2289_v41  ;;  %11567 = vmatpush3.bf16.msra.mxu0 %v13640_v44 }
 0x269   :  { %11466 = vmatprep.subr.bf16.mxu1 %v12687_v28  ;;  %11568 = vmatprep.subr.bf16.mxu0 %v12687_v28 }
 0x26a   :  { %v13644_v0 = vsub.f32 %v2289_v41, %v2319_v45  ;;  %v2407_v41 = vand.u32 4294901760, %v13636_v19 }
 0x26b   :  { %9680 = vmatmul.mubr.f32.vlgmr.msra.gmra.mrb[6].mxu1 %v13608_v32 }
 0x26c   :  { %11468 = vmatpush3.bf16.msra.mxu1 %v11467_v53  ;;  %9714 = vmatprep.mubr.msk.f32.mxu1 %vm12688_vm0, %v12689_v63  ;;  %v13634_v53 = vsub.f32 %v2285_v48, %v2307_v25  ;;  %v2331_v48 = vand.u32 4294901760, %v2293_v51  ;;  %v13653_v25 = vsub.f32 %v2292_v54, %v2328_v11  ;;  %v11515_v11 = vpack.c.bf16 %v1743_v33, %v1736_v17 }
 0x26d   :  { %11469 = vmatprep.subr.bf16.mxu1 %v12687_v28  ;;  %v11521_v17 = vpack.c.bf16 %v16115_v6, %v16114_v36  ;;  %v16116_v33 = vand.u32 4294901760, %v13417_v9  ;;  %v16122_v9 = vand.u32 4294901760, %v13523_v49  ;;  %v2299_v49 = vld [vmem:[#allocation6 + $0xf0] sm:$0xff] }
 0x26e   :  { %v13655_v34 = vsub.f32 %v2293_v51, %v2331_v48  ;;  %v13806_v51 = vsub.f32 %v2298_v55, %v2346_v23 }
 0x270   :  { %11471 = vmatpush3.bf16.msra.mxu1 %v11470_v29  ;;  %v13663_v29 = vpack.c.bf16 %v2322_v15, %v2319_v45  ;;  %v2408_v45 = vsub.f32 %v13636_v19, %v2407_v41 }
 0x271   :  { %11472 = vmatprep.subr.bf16.mxu1 %v12687_v28 }
 0x272   :  { %11570 = vmatpush3.bf16.msra.mxu0 %v13663_v29 }
 0x273   :  { %11571 = vmatprep.subr.bf16.mxu0 %v12687_v28 }
 0x274   :  { %11474 = vmatpush3.bf16.msra.mxu1 %v11473_v31  ;;  %v13679_v31 = vpack.c.bf16 %v2334_v22, %v2331_v48 }
 0x275   :  { %11475 = vmatprep.subr.bf16.mxu1 %v12687_v28 }
 0x276   :  { %11573 = vmatpush3.bf16.msra.mxu0 %v13671_v42 }
 0x277   :  { %11574 = vmatprep.subr.bf16.mxu0 %v12687_v28 }
 0x278   :  { %11477 = vmatpush3.bf16.msra.mxu1 %v11476_v37  ;;  %v16113_v37 = vand.u32 4294901760, %v13410_v39  ;;  %v11524_v39 = vpack.c.bf16 %v16117_v58, %v16116_v33  ;;  %v16017_v33 = vand.u32 4294901760, %v13644_v0  ;;  %v16016_v58 = vand.u32 4294901760, %v13647_v43 }
 0x279   :  { %11478 = vmatprep.subr.bf16.mxu1 %v12687_v28 }
 0x27a   :  { %11576 = vmatpush3.bf16.msra.mxu0 %v13679_v31 }
 0x27b   :  { %11577 = vmatprep.subr.bf16.mxu0 %v12687_v28 }
 0x27c   :  { %11480 = vmatpush3.bf16.msra.mxu1 %v11479_v18  ;;  %v11518_v18 = vpack.c.bf16 %v16113_v37, %v16112_v10  ;;  %v2409_v10 = vand.u32 4294901760, %v2408_v45  ;;  %v16019_v37 = vand.u32 4294901760, %v13638_v50 }
 0x27d   :  { %11481 = vmatprep.subr.bf16.mxu1 %v12687_v28 }
 0x27e   :  { %v2415_v6 = vsub.f32 %v13638_v50, %v16019_v37 }
 0x280   :  { %11483 = vmatpush3.bf16.msra.mxu1 %v11482_v30 }
 0x281   :  { %11484 = vmatprep.subr.bf16.mxu1 %v12687_v28 }
 0x284   :  { %11486 = vmatpush3.bf16.msra.mxu1 %v11485_v14  ;;  %v11530_v14 = vpack.c.bf16 %v16121_v21, %v16120_v62 }
 0x285   :  { %11487 = vmatprep.subr.bf16.mxu1 %v12687_v28 }
 0x288   :  { %11489 = vmatpush3.bf16.msra.mxu1 %v11488_v2  ;;  %v11533_v2 = vpack.c.bf16 %v16123_v60, %v16122_v9  ;;  %v16015_v9 = vand.u32 4294901760, %v13651_v61  ;;  %v16014_v60 = vand.u32 4294901760, %v13653_v25 }
 0x289   :  { %11490 = vmatprep.subr.bf16.mxu1 %v12687_v28 }
 0x28b   :  { %9715 = vmatmul.mubr.f32.vlgmr.msra.gmra.mrb[6].mxu1 %v13611_v26  ;;  %v16119_v26 = vand.u32 4294901760, %v13426_v8  ;;  %v16125_v8 = vand.u32 4294901760, %v13530_v4  ;;  %v2352_v4 = vand.u32 4294901760, %v2300_v47 }
 0x28c   :  { %11492 = vmatpush3.bf16.msra.mxu1 %v13399_v52  ;;  %9749 = vmatprep.mubr.msk.f32.mxu1 %vm12688_vm0, %v12689_v63 }
 0x28d   :  { %11493 = vmatprep.subr.bf16.mxu1 %v12687_v28  ;;  %v13811_v22 = vsub.f32 %v2300_v47, %v2352_v4 }
 0x290   :  { %11495 = vmatpush3.bf16.msra.mxu1 %v13406_v56 }
 0x291   :  { %11496 = vmatprep.subr.bf16.mxu1 %v12687_v28 }
 0x294   :  { %11498 = vmatpush3.bf16.msra.mxu1 %v13429_v35 }
 0x295   :  { %11499 = vmatprep.subr.bf16.mxu1 %v12687_v28 }
 0x298   :  { %11501 = vmatpush3.bf16.msra.mxu1 %v13435_v13 }
 0x299   :  { %11502 = vmatprep.subr.bf16.mxu1 %v12687_v28 }
 0x29c   :  { %11504 = vmatpush3.bf16.msra.mxu1 %v13441_v1 }
 0x29d   :  { %11505 = vmatprep.subr.bf16.mxu1 %v12687_v28 }
 0x2a0   :  { %11507 = vmatpush3.bf16.msra.mxu1 %v13501_v3 }
 0x2a1   :  { %11508 = vmatprep.subr.bf16.mxu1 %v12687_v28 }
 0x2a4   :  { %11510 = vmatpush3.bf16.msra.mxu1 %v13505_v5 }
 0x2a5   :  { %11511 = vmatprep.subr.bf16.mxu1 %v12687_v28 }
 0x2a8   :  { %11513 = vmatpush3.bf16.msra.mxu1 %v13511_v20 }
 0x2a9   :  { %11514 = vmatprep.subr.bf16.mxu1 %v12687_v28 }
 0x2ab   :  { %9750 = vmatmul.mubr.f32.vlgmr.msra.gmra.mrb[6].mxu1 %v1725_v12  ;;  %v16118_v12 = vand.u32 4294901760, %v13424_v24  ;;  %v16124_v24 = vand.u32 4294901760, %v13528_v57  ;;  %v2349_v57 = vand.u32 4294901760, %v2299_v49 }
 0x2ac   :  { %11516 = vmatpush3.bf16.msra.mxu1 %v11515_v11  ;;  %9784 = vmatprep.mubr.msk.f32.mxu1 %vm12688_vm0, %v12689_v63 }
 0x2ad   :  { %11517 = vmatprep.subr.bf16.mxu1 %v12687_v28  ;;  %v11527_v30 = vpack.c.bf16 %v16119_v26, %v16118_v12  ;;  %v11536_v27 = vpack.c.bf16 %v16125_v8, %v16124_v24  ;;  %v13792_v7 = vpack.c.bf16 %v2352_v4, %v2349_v57  ;;  %v13809_v48 = vsub.f32 %v2299_v49, %v2349_v57 }
 0x2ae   :  { %v2429_v26 = vsub.f32 %v13644_v0, %v16017_v33  ;;  %v2443_v24 = vsub.f32 %v13651_v61, %v16015_v9  ;;  %v2450_v8 = vsub.f32 %v13653_v25, %v16014_v60 }
 0x2b0   :  { %11519 = vmatpush3.bf16.msra.mxu1 %v11518_v18  ;;  %v16018_v18 = vand.u32 4294901760, %v13642_v16  ;;  %v2430_v21 = vand.u32 4294901760, %v2429_v26 }
 0x2b1   :  { %11520 = vmatprep.subr.bf16.mxu1 %v12687_v28 }
 0x2b4   :  { %11522 = vmatpush3.bf16.msra.mxu1 %v11521_v17  ;;  %v2422_v17 = vsub.f32 %v13642_v16, %v16018_v18 }
 0x2b5   :  { %11523 = vmatprep.subr.bf16.mxu1 %v12687_v28 }
 0x2b6   :  { %v2423_v12 = vand.u32 4294901760, %v2422_v17 }
 0x2b8   :  { %11525 = vmatpush3.bf16.msra.mxu1 %v11524_v39  ;;  %v2416_v39 = vand.u32 4294901760, %v2415_v6  ;;  %v16008_v6 = vand.u32 4294901760, %v13806_v51 }
 0x2b9   :  { %11526 = vmatprep.subr.bf16.mxu1 %v12687_v28 }
 0x2ba   :  { %v11590_v62 = vpack.c.bf16 %v2423_v12, %v2416_v39  ;;  %v2492_v12 = vsub.f32 %v13806_v51, %v16008_v6 }
 0x2bc   :  { %11528 = vmatpush3.bf16.msra.mxu1 %v11527_v30  ;;  %v2436_v30 = vsub.f32 %v13647_v43, %v16016_v58 }
 0x2bd   :  { %11529 = vmatprep.subr.bf16.mxu1 %v12687_v28 }
 0x2c0   :  { %11531 = vmatpush3.bf16.msra.mxu1 %v11530_v14  ;;  %v2437_v14 = vand.u32 4294901760, %v2436_v30  ;;  %v2493_v30 = vand.u32 4294901760, %v2492_v12  ;;  %v11632_v12 = vpack.c.bf16 %v13811_v22, %v13809_v48 }
 0x2c1   :  { %11532 = vmatprep.subr.bf16.mxu1 %v12687_v28 }
 0x2c4   :  { %11534 = vmatpush3.bf16.msra.mxu1 %v11533_v2  ;;  %v11593_v2 = vpack.c.bf16 %v2437_v14, %v2430_v21  ;;  %v16007_v21 = vand.u32 4294901760, %v13809_v48  ;;  %v16006_v14 = vand.u32 4294901760, %v13811_v22 }
 0x2c5   :  { %11535 = vmatprep.subr.bf16.mxu1 %v12687_v28 }
 0x2c8   :  { %11537 = vmatpush3.bf16.msra.mxu1 %v11536_v27  ;;  %v2444_v27 = vand.u32 4294901760, %v2443_v24 }
 0x2c9   :  { %11538 = vmatprep.subr.bf16.mxu1 %v12687_v28 }
 0x2cb   :  { %9785 = vmatmul.mubr.f32.vlgmr.msra.gmra.mrb[6].mxu1 %v13608_v32 }
 0x2cc   :  { %11540 = vmatpush3.bf16.msra.mxu1 %v13399_v52  ;;  %9819 = vmatprep.mubr.msk.f32.mxu1 %vm12688_vm0, %v12689_v63  ;;  %v2295_v52 = vld [vmem:[#allocation6 + $0xd0] sm:$0xff] }
 0x2cd   :  { %11541 = vmatprep.subr.bf16.mxu1 %v12687_v28 }
 0x2d0   :  { %11543 = vmatpush3.bf16.msra.mxu1 %v13406_v56  ;;  %v2296_v56 = vld [vmem:[#allocation6 + $0xd8] sm:$0xff] }
 0x2d1   :  { %11544 = vmatprep.subr.bf16.mxu1 %v12687_v28 }
 0x2d4   :  { %11546 = vmatpush3.bf16.msra.mxu1 %v13429_v35  ;;  %v2337_v35 = vand.u32 4294901760, %v2295_v52 }
 0x2d5   :  { %11547 = vmatprep.subr.bf16.mxu1 %v12687_v28 }
 0x2d6   :  { %v13800_v15 = vsub.f32 %v2295_v52, %v2337_v35  ;;  %v2451_v52 = vand.u32 4294901760, %v2450_v8  ;;  %v2499_v8 = vsub.f32 %v13809_v48, %v16007_v21 }
 0x2d8   :  { %11549 = vmatpush3.bf16.msra.mxu1 %v13435_v13  ;;  %v2340_v13 = vand.u32 4294901760, %v2296_v56  ;;  %v16011_v49 = vand.u32 4294901760, %v13800_v15 }
 0x2d9   :  { %11550 = vmatprep.subr.bf16.mxu1 %v12687_v28 }
 0x2da   :  { %v13802_v46 = vsub.f32 %v2296_v56, %v2340_v13  ;;  %v16013_v56 = vand.u32 4294901760, %v13655_v34  ;;  %v2471_v4 = vsub.f32 %v13800_v15, %v16011_v49 }
 0x2dc   :  { %11552 = vmatpush3.bf16.msra.mxu1 %v13441_v1  ;;  %v13782_v1 = vpack.c.bf16 %v2340_v13, %v2337_v35  ;;  %v16012_v35 = vand.u32 4294901760, %v13657_v40  ;;  %v11596_v13 = vpack.c.bf16 %v2451_v52, %v2444_v27  ;;  %v16010_v47 = vand.u32 4294901760, %v13802_v46 }
 0x2dd   :  { %11553 = vmatprep.subr.bf16.mxu1 %v12687_v28  ;;  %v2472_v45 = vand.u32 4294901760, %v2471_v4  ;;  %v2506_v27 = vsub.f32 %v13811_v22, %v16006_v14  ;;  %v2500_v52 = vand.u32 4294901760, %v2499_v8  ;;  %v11617_v4 = vpack.c.bf16 %v13647_v43, %v13644_v0 }
 0x2de   :  { %11579 = vmatpush3.bf16.msra.mxu0 %v13782_v1  ;;  %v2464_v55 = vsub.f32 %v13657_v40, %v16012_v35 }
 0x2df   :  { %11580 = vmatprep.subr.bf16.mxu0 %v12687_v28 }
 0x2e0   :  { %11555 = vmatpush3.bf16.msra.mxu1 %v13501_v3  ;;  %v2297_v3 = vld [vmem:[#allocation6 + $0xe0] sm:$0xff] }
 0x2e1   :  { %11556 = vmatprep.subr.bf16.mxu1 %v12687_v28 }
 0x2e4   :  { %11558 = vmatpush3.bf16.msra.mxu1 %v13505_v5  ;;  %v2343_v5 = vand.u32 4294901760, %v2297_v3 }
 0x2e5   :  { %11559 = vmatprep.subr.bf16.mxu1 %v12687_v28 }
 0x2e6   :  { %v13804_v54 = vsub.f32 %v2297_v3, %v2343_v5  ;;  %v2457_v3 = vsub.f32 %v13655_v34, %v16013_v56  ;;  %v2958_v56 = vld [vmem:[#allocation6 + $0x148] sm:$0xff] }
 0x2e8   :  { %11561 = vmatpush3.bf16.msra.mxu1 %v13511_v20  ;;  %v13786_v20 = vpack.c.bf16 %v2346_v23, %v2343_v5  ;;  %v2458_v5 = vand.u32 4294901760, %v2457_v3  ;;  %v2465_v23 = vand.u32 4294901760, %v2464_v55  ;;  %v2507_v3 = vand.u32 4294901760, %v2506_v27 }
 0x2e9   :  { %11706 = vmatprep.subr.bf16.mxu1 %v12687_v28 }
 0x2ea   :  { %11582 = vmatpush3.bf16.msra.mxu0 %v13786_v20  ;;  %v11599_v57 = vpack.c.bf16 %v2465_v23, %v2458_v5  ;;  %v11608_v55 = vpack.c.bf16 %v2507_v3, %v2500_v52  ;;  %v11611_v5 = vpack.c.bf16 %v13636_v19, %v13634_v53  ;;  %v11614_v23 = vpack.c.bf16 %v13642_v16, %v13638_v50 }
 0x2eb   :  { %9820 = vmatmul.mubr.f32.vlgmr.msra.gmra.mrb[6].mxu1 %v13608_v32  ;;  %v2400_v32 = vand.u32 4294901760, %v13634_v53  ;;  %11583 = vmatprep.subr.bf16.mxu0 %v12687_v28  ;;  %v16128_v19 = vand.u32 4294901760, %v13644_v0  ;;  %v16135_v0 = vand.u32 4294901760, %v13802_v46 }
 0x2ec   :  { %10064 = vmatprep.mubr.msk.f32.mxu1 %vm12688_vm0, %v12689_v63 }
 0x2ed   :  { %v2401_v59 = vsub.f32 %v13634_v53, %v2400_v32  ;;  %v16129_v53 = vand.u32 4294901760, %v13647_v43  ;;  %v16134_v43 = vand.u32 4294901760, %v13800_v15 }
 0x2ee   :  { %11585 = vmatpush3.bf16.msra.mxu0 %v13792_v7 }
 0x2ef   :  { %11586 = vmatprep.subr.bf16.mxu0 %v12687_v28  ;;  %v2402_v11 = vand.u32 4294901760, %v2401_v59  ;;  %v2478_v59 = vsub.f32 %v13802_v46, %v16010_v47 }
 0x2f1   :  { %v13816_v36 = vpack.c.bf16 %v2409_v10, %v2402_v11  ;;  %v2479_v11 = vand.u32 4294901760, %v2478_v59  ;;  %v16009_v10 = vand.u32 4294901760, %v13804_v54  ;;  %v11620_v59 = vpack.c.bf16 %v13653_v25, %v13651_v61 }
 0x2f3   :  { %v11602_v17 = vpack.c.bf16 %v2479_v11, %v2472_v45  ;;  %v2485_v39 = vsub.f32 %v13804_v54, %v16009_v10  ;;  %v11623_v45 = vpack.c.bf16 %v13657_v40, %v13655_v34  ;;  %v11626_v11 = vpack.c.bf16 %v13802_v46, %v13800_v15  ;;  %v2962_v15 = vld [vmem:[#allocation6 + $0x168] sm:$0xff] }
 0x2f4   :  { %v3010_v46 = vand.u32 4294901760, %v2962_v15 }
 0x2f5   :  { %v2486_v26 = vand.u32 4294901760, %v2485_v39  ;;  %v11629_v39 = vpack.c.bf16 %v13806_v51, %v13804_v54 }
 0x2f7   :  { %v11605_v24 = vpack.c.bf16 %v2493_v30, %v2486_v26  ;;  %v8305_v26 = vld [vmem:[%s15946_s4 + $0x1] ss:$0 sm:$0xff] }
 0x3be   :  { %v2279_v30 = vpop.f32.mrb[6].mxu1 }
 0x3bf   :  { %v12427_v8 = vadd.f32 %v8305_v26, %v2279_v30  ;;  %v9821_v27 = vpop.f32.mrb[7].mxu1 }
 0x3c0   :  { %v2956_v27 = vld [vmem:[#allocation6 + $0x138] sm:$0xff] }
 0x3c1   :  { %v2283_v52 = vmax.f32 %v12427_v8, 0.0  ;;  %v2955_v8 = vld [vmem:[#allocation6 + $0x130] sm:$0xff]  ;;  %v2992_v37 = vand.u32 4294901760, %v2956_v27 }
 0x3c2   :  { %v2989_v18 = vand.u32 4294901760, %v2955_v8 }
 0x3c3   :  { %v13891_v3 = vand.u32 4294901760, %v2283_v52 }
 0x3c5   :  { %v13894_v14 = vsub.f32 %v2283_v52, %v13891_v3  ;;  %v2957_v52 = vld [vmem:[#allocation6 + $0x140] sm:$0xff] }
 0x3c7   :  { %v2389_v21 = vand.u32 4294901760, %v13894_v14 }
 0x3c9   :  { %v2390_v6 = vsub.f32 %v13894_v14, %v2389_v21 }
 0x3cb   :  { %v2391_v10 = vand.u32 4294901760, %v2390_v6 }
 0x3cd   :  { %9855 = vmatmul.mubr.f32.vlgmr.msra.gmra.mrb[8].mxu0 %v2391_v10  ;;  %v2952_v10 = vld [vmem:[#allocation6 + $0x118] sm:$0xff] }
 0x3ce   :  { %11588 = vmatpush3.bf16.msra.mxu0 %v13816_v36  ;;  %9889 = vmatprep.mubr.msk.f32.mxu0 %vm12688_vm0, %v12689_v63  ;;  %v2949_v36 = vld [vmem:[#allocation6 + $0x100] sm:$0xff] }
 0x3cf   :  { %11589 = vmatprep.subr.bf16.mxu0 %v12687_v28 }
 0x3d2   :  { %11591 = vmatpush3.bf16.msra.mxu0 %v11590_v62  ;;  %v2950_v62 = vld [vmem:[#allocation6 + $0x108] sm:$0xff] }
 0x3d3   :  { %11592 = vmatprep.subr.bf16.mxu0 %v12687_v28 }
 0x3d6   :  { %11594 = vmatpush3.bf16.msra.mxu0 %v11593_v2  ;;  %v2951_v2 = vld [vmem:[#allocation6 + $0x110] sm:$0xff] }
 0x3d7   :  { %11595 = vmatprep.subr.bf16.mxu0 %v12687_v28  ;;  %v2977_v6 = vand.u32 4294901760, %v2951_v2 }
 0x3d9   :  { %v13921_v35 = vsub.f32 %v2951_v2, %v2977_v6  ;;  %v13934_v2 = vsub.f32 %v2955_v8, %v2989_v18 }
 0x3da   :  { %11597 = vmatpush3.bf16.msra.mxu0 %v11596_v13  ;;  %v2971_v13 = vand.u32 4294901760, %v2949_v36 }
 0x3db   :  { %11598 = vmatprep.subr.bf16.mxu0 %v12687_v28 }
 0x3de   :  { %11600 = vmatpush3.bf16.msra.mxu0 %v11599_v57  ;;  %v2974_v57 = vand.u32 4294901760, %v2950_v62 }
 0x3df   :  { %11601 = vmatprep.subr.bf16.mxu0 %v12687_v28 }
 0x3e0   :  { %v13915_v47 = vpack.c.bf16 %v2974_v57, %v2971_v13  ;;  %v13919_v49 = vsub.f32 %v2950_v62, %v2974_v57  ;;  %v2998_v62 = vand.u32 4294901760, %v2958_v56 }
 0x3e2   :  { %11603 = vmatpush3.bf16.msra.mxu0 %v11602_v17  ;;  %v2953_v17 = vld [vmem:[#allocation6 + $0x120] sm:$0xff]  ;;  %11708 = vmatpush3.bf16.msra.mxu1 %v13915_v47 }
 0x3e3   :  { %11604 = vmatprep.subr.bf16.mxu0 %v12687_v28  ;;  %v2983_v26 = vand.u32 4294901760, %v2953_v17  ;;  %11709 = vmatprep.subr.bf16.mxu1 %v12687_v28 }
 0x3e5   :  { %v13927_v58 = vsub.f32 %v2953_v17, %v2983_v26  ;;  %v3071_v17 = vand.u32 4294901760, %v13919_v49 }
 0x3e6   :  { %11606 = vmatpush3.bf16.msra.mxu0 %v11605_v24  ;;  %v2954_v24 = vld [vmem:[#allocation6 + $0x128] sm:$0xff] }
 0x3e7   :  { %11607 = vmatprep.subr.bf16.mxu0 %v12687_v28  ;;  %v2986_v30 = vand.u32 4294901760, %v2954_v24 }
 0x3e9   :  { %v13930_v33 = vsub.f32 %v2954_v24, %v2986_v30 }
 0x3ea   :  { %11609 = vmatpush3.bf16.msra.mxu0 %v11608_v55  ;;  %v2980_v55 = vand.u32 4294901760, %v2952_v10 }
 0x3eb   :  { %11610 = vmatprep.subr.bf16.mxu0 %v12687_v28 }
 0x3ec   :  { %v13923_v60 = vpack.c.bf16 %v2980_v55, %v2977_v6  ;;  %v13925_v9 = vsub.f32 %v2952_v10, %v2980_v55  ;;  %v13940_v10 = vsub.f32 %v2958_v56, %v2998_v62  ;;  %v13954_v56 = vpack.c.bf16 %v2992_v37, %v2989_v18 }
 0x3ed   :  { %9890 = vmatmul.mubr.f32.vlgmr.msra.gmra.mrb[8].mxu0 %v13891_v3  ;;  %v16126_v18 = vand.u32 4294901760, %v13638_v50  ;;  %v16131_v50 = vand.u32 4294901760, %v13653_v25  ;;  %v16137_v25 = vand.u32 4294901760, %v13806_v51  ;;  %v2964_v51 = vld [vmem:[#allocation6 + $0x178] sm:$0xff] }
 0x3ee   :  { %11612 = vmatpush3.bf16.msra.mxu0 %v11611_v5  ;;  %9924 = vmatprep.mubr.msk.f32.mxu0 %vm12688_vm0, %v12689_v63  ;;  %v13917_v5 = vsub.f32 %v2949_v36, %v2971_v13  ;;  %v2995_v36 = vand.u32 4294901760, %v2957_v52  ;;  %v13936_v13 = vsub.f32 %v2956_v27, %v2992_v37  ;;  %v11659_v37 = vpack.c.bf16 %v2407_v41, %v2400_v32 }
 0x3ef   :  { %11613 = vmatprep.subr.bf16.mxu0 %v12687_v28  ;;  %11711 = vmatpush3.bf16.msra.mxu1 %v13923_v60  ;;  %v11665_v32 = vpack.c.bf16 %v16129_v53, %v16128_v19  ;;  %v16130_v41 = vand.u32 4294901760, %v13651_v61  ;;  %v16136_v61 = vand.u32 4294901760, %v13804_v54  ;;  %v2963_v54 = vld [vmem:[#allocation6 + $0x170] sm:$0xff] }
 0x3f0   :  { %v13938_v57 = vsub.f32 %v2957_v52, %v2995_v36  ;;  %11712 = vmatprep.subr.bf16.mxu1 %v12687_v28  ;;  %v14089_v52 = vsub.f32 %v2962_v15, %v3010_v46 }
 0x3f2   :  { %11615 = vmatpush3.bf16.msra.mxu0 %v11614_v23  ;;  %v13946_v23 = vpack.c.bf16 %v2986_v30, %v2983_v26  ;;  %v3072_v26 = vsub.f32 %v13919_v49, %v3071_v17 }
 0x3f3   :  { %11616 = vmatprep.subr.bf16.mxu0 %v12687_v28 }
 0x3f4   :  { %11714 = vmatpush3.bf16.msra.mxu1 %v13946_v23 }
 0x3f5   :  { %11715 = vmatprep.subr.bf16.mxu1 %v12687_v28 }
 0x3f6   :  { %11618 = vmatpush3.bf16.msra.mxu0 %v11617_v4  ;;  %v13962_v4 = vpack.c.bf16 %v2998_v62, %v2995_v36 }
 0x3f7   :  { %11619 = vmatprep.subr.bf16.mxu0 %v12687_v28 }
 0x3f8   :  { %11717 = vmatpush3.bf16.msra.mxu1 %v13954_v56 }
 0x3f9   :  { %11718 = vmatprep.subr.bf16.mxu1 %v12687_v28 }
 0x3fa   :  { %11621 = vmatpush3.bf16.msra.mxu0 %v11620_v59  ;;  %v16127_v59 = vand.u32 4294901760, %v13642_v16  ;;  %v11668_v16 = vpack.c.bf16 %v16131_v50, %v16130_v41  ;;  %v3092_v41 = vand.u32 4294901760, %v13927_v58  ;;  %v3099_v50 = vand.u32 4294901760, %v13930_v33 }
 0x3fb   :  { %11622 = vmatprep.subr.bf16.mxu0 %v12687_v28 }
 0x3fc   :  { %11720 = vmatpush3.bf16.msra.mxu1 %v13962_v4 }
 0x3fd   :  { %11721 = vmatprep.subr.bf16.mxu1 %v12687_v28 }
 0x3fe   :  { %11624 = vmatpush3.bf16.msra.mxu0 %v11623_v45  ;;  %v11662_v45 = vpack.c.bf16 %v16127_v59, %v16126_v18  ;;  %v3073_v18 = vand.u32 4294901760, %v3072_v26  ;;  %v3078_v59 = vand.u32 4294901760, %v13921_v35 }
 0x3ff   :  { %11625 = vmatprep.subr.bf16.mxu0 %v12687_v28 }
 0x400   :  { %v3079_v53 = vsub.f32 %v13921_v35, %v3078_v59 }
 0x402   :  { %11627 = vmatpush3.bf16.msra.mxu0 %v11626_v11 }
 0x403   :  { %11628 = vmatprep.subr.bf16.mxu0 %v12687_v28 }
 0x406   :  { %11630 = vmatpush3.bf16.msra.mxu0 %v11629_v39  ;;  %v11674_v39 = vpack.c.bf16 %v16135_v0, %v16134_v43 }
 0x407   :  { %11631 = vmatprep.subr.bf16.mxu0 %v12687_v28 }
 0x40a   :  { %11633 = vmatpush3.bf16.msra.mxu0 %v11632_v12  ;;  %v11677_v12 = vpack.c.bf16 %v16137_v25, %v16136_v61  ;;  %v3106_v61 = vand.u32 4294901760, %v13934_v2  ;;  %v3113_v25 = vand.u32 4294901760, %v13936_v13 }
 0x40b   :  { %11634 = vmatprep.subr.bf16.mxu0 %v12687_v28 }
 0x40d   :  { %9925 = vmatmul.mubr.f32.vlgmr.msra.gmra.mrb[8].mxu0 %v13894_v14  ;;  %v16133_v14 = vand.u32 4294901760, %v13657_v40  ;;  %v16139_v40 = vand.u32 4294901760, %v13811_v22  ;;  %v3016_v22 = vand.u32 4294901760, %v2964_v51 }
 0x40e   :  { %11636 = vmatpush3.bf16.msra.mxu0 %v13632_v38  ;;  %9959 = vmatprep.mubr.msk.f32.mxu0 %vm12688_vm0, %v12689_v63 }
 0x40f   :  { %11637 = vmatprep.subr.bf16.mxu0 %v12687_v28  ;;  %v14094_v62 = vsub.f32 %v2964_v51, %v3016_v22 }
 0x412   :  { %11639 = vmatpush3.bf16.msra.mxu0 %v13640_v44 }
 0x413   :  { %11640 = vmatprep.subr.bf16.mxu0 %v12687_v28 }
 0x416   :  { %11642 = vmatpush3.bf16.msra.mxu0 %v13663_v29 }
 0x417   :  { %11643 = vmatprep.subr.bf16.mxu0 %v12687_v28 }
 0x41a   :  { %11645 = vmatpush3.bf16.msra.mxu0 %v13671_v42 }
 0x41b   :  { %11646 = vmatprep.subr.bf16.mxu0 %v12687_v28 }
 0x41e   :  { %11648 = vmatpush3.bf16.msra.mxu0 %v13679_v31 }
 0x41f   :  { %11649 = vmatprep.subr.bf16.mxu0 %v12687_v28 }
 0x422   :  { %11651 = vmatpush3.bf16.msra.mxu0 %v13782_v1 }
 0x423   :  { %11652 = vmatprep.subr.bf16.mxu0 %v12687_v28 }
 0x426   :  { %11654 = vmatpush3.bf16.msra.mxu0 %v13786_v20 }
 0x427   :  { %11655 = vmatprep.subr.bf16.mxu0 %v12687_v28 }
 0x42a   :  { %11657 = vmatpush3.bf16.msra.mxu0 %v13792_v7 }
 0x42b   :  { %11658 = vmatprep.subr.bf16.mxu0 %v12687_v28 }
 0x42d   :  { %9960 = vmatmul.mubr.f32.vlgmr.msra.gmra.mrb[8].mxu0 %v2389_v21  ;;  %v16132_v21 = vand.u32 4294901760, %v13655_v34  ;;  %v16138_v34 = vand.u32 4294901760, %v13809_v48  ;;  %v3013_v48 = vand.u32 4294901760, %v2963_v54 }
 0x42e   :  { %11660 = vmatpush3.bf16.msra.mxu0 %v11659_v37  ;;  %9994 = vmatprep.mubr.msk.f32.mxu0 %vm12688_vm0, %v12689_v63 }
 0x42f   :  { %11661 = vmatprep.subr.bf16.mxu0 %v12687_v28  ;;  %v11671_v11 = vpack.c.bf16 %v16133_v14, %v16132_v21  ;;  %v11680_v6 = vpack.c.bf16 %v16139_v40, %v16138_v34  ;;  %v14075_v24 = vpack.c.bf16 %v3016_v22, %v3013_v48  ;;  %v14092_v36 = vsub.f32 %v2963_v54, %v3013_v48 }
 0x430   :  { %v3093_v14 = vsub.f32 %v13927_v58, %v3092_v41  ;;  %v3107_v34 = vsub.f32 %v13934_v2, %v3106_v61  ;;  %v3114_v40 = vsub.f32 %v13936_v13, %v3113_v25 }
 0x432   :  { %11663 = vmatpush3.bf16.msra.mxu0 %v11662_v45  ;;  %v3085_v45 = vand.u32 4294901760, %v13925_v9  ;;  %v3094_v0 = vand.u32 4294901760, %v3093_v14 }
 0x433   :  { %11664 = vmatprep.subr.bf16.mxu0 %v12687_v28 }
 0x436   :  { %11666 = vmatpush3.bf16.msra.mxu0 %v11665_v32  ;;  %v3086_v32 = vsub.f32 %v13925_v9, %v3085_v45 }
 0x437   :  { %11667 = vmatprep.subr.bf16.mxu0 %v12687_v28 }
 0x438   :  { %v3087_v21 = vand.u32 4294901760, %v3086_v32 }
 0x43a   :  { %11669 = vmatpush3.bf16.msra.mxu0 %v11668_v16  ;;  %v3080_v16 = vand.u32 4294901760, %v3079_v53  ;;  %v16022_v53 = vand.u32 4294901760, %v14089_v52 }
 0x43b   :  { %11670 = vmatprep.subr.bf16.mxu0 %v12687_v28 }
 0x43c   :  { %v11734_v43 = vpack.c.bf16 %v3087_v21, %v3080_v16  ;;  %v3156_v21 = vsub.f32 %v14089_v52, %v16022_v53 }
 0x43e   :  { %11672 = vmatpush3.bf16.msra.mxu0 %v11671_v11  ;;  %v3100_v11 = vsub.f32 %v13930_v33, %v3099_v50 }
 0x43f   :  { %11673 = vmatprep.subr.bf16.mxu0 %v12687_v28 }
 0x442   :  { %11675 = vmatpush3.bf16.msra.mxu0 %v11674_v39  ;;  %v3101_v39 = vand.u32 4294901760, %v3100_v11  ;;  %v3157_v11 = vand.u32 4294901760, %v3156_v21  ;;  %v11776_v21 = vpack.c.bf16 %v14094_v62, %v14092_v36 }
 0x443   :  { %11676 = vmatprep.subr.bf16.mxu0 %v12687_v28 }
 0x446   :  { %11678 = vmatpush3.bf16.msra.mxu0 %v11677_v12  ;;  %v11737_v12 = vpack.c.bf16 %v3101_v39, %v3094_v0  ;;  %v16021_v0 = vand.u32 4294901760, %v14092_v36  ;;  %v16020_v39 = vand.u32 4294901760, %v14094_v62 }
 0x447   :  { %11679 = vmatprep.subr.bf16.mxu0 %v12687_v28 }
 0x44a   :  { %11681 = vmatpush3.bf16.msra.mxu0 %v11680_v6  ;;  %v3108_v6 = vand.u32 4294901760, %v3107_v34 }
 0x44b   :  { %11682 = vmatprep.subr.bf16.mxu0 %v12687_v28 }
 0x44d   :  { %9995 = vmatmul.mubr.f32.vlgmr.msra.gmra.mrb[8].mxu0 %v13891_v3 }
 0x44e   :  { %11684 = vmatpush3.bf16.msra.mxu0 %v13632_v38  ;;  %10029 = vmatprep.mubr.msk.f32.mxu0 %vm12688_vm0, %v12689_v63  ;;  %v2960_v38 = vld [vmem:[#allocation6 + $0x158] sm:$0xff] }
 0x44f   :  { %11685 = vmatprep.subr.bf16.mxu0 %v12687_v28 }
 0x452   :  { %11687 = vmatpush3.bf16.msra.mxu0 %v13640_v44  ;;  %v2959_v44 = vld [vmem:[#allocation6 + $0x150] sm:$0xff] }
 0x453   :  { %11688 = vmatprep.subr.bf16.mxu0 %v12687_v28 }
 0x456   :  { %11690 = vmatpush3.bf16.msra.mxu0 %v13663_v29  ;;  %v3001_v29 = vand.u32 4294901760, %v2959_v44 }
 0x457   :  { %11691 = vmatprep.subr.bf16.mxu0 %v12687_v28 }
 0x458   :  { %v14083_v30 = vsub.f32 %v2959_v44, %v3001_v29  ;;  %v3115_v44 = vand.u32 4294901760, %v3114_v40  ;;  %v3163_v40 = vsub.f32 %v14092_v36, %v16021_v0 }
 0x45a   :  { %11693 = vmatpush3.bf16.msra.mxu0 %v13671_v42  ;;  %v3004_v42 = vand.u32 4294901760, %v2960_v38  ;;  %v3134_v54 = vand.u32 4294901760, %v14083_v30 }
 0x45b   :  { %11694 = vmatprep.subr.bf16.mxu0 %v12687_v28 }
 0x45c   :  { %v14085_v8 = vsub.f32 %v2960_v38, %v3004_v42  ;;  %v3120_v38 = vand.u32 4294901760, %v13938_v57  ;;  %v3135_v22 = vsub.f32 %v14083_v30, %v3134_v54 }
 0x45e   :  { %11696 = vmatpush3.bf16.msra.mxu0 %v13679_v31  ;;  %v14065_v31 = vpack.c.bf16 %v3004_v42, %v3001_v29  ;;  %v3127_v29 = vand.u32 4294901760, %v13940_v10  ;;  %v11740_v42 = vpack.c.bf16 %v3115_v44, %v3108_v6  ;;  %v3141_v51 = vand.u32 4294901760, %v14085_v8 }
 0x45f   :  { %11697 = vmatprep.subr.bf16.mxu0 %v12687_v28  ;;  %v3136_v26 = vand.u32 4294901760, %v3135_v22  ;;  %v3170_v6 = vsub.f32 %v14094_v62, %v16020_v39  ;;  %v3164_v44 = vand.u32 4294901760, %v3163_v40  ;;  %v11761_v22 = vpack.c.bf16 %v13930_v33, %v13927_v58 }
 0x460   :  { %11723 = vmatpush3.bf16.msra.mxu1 %v14065_v31  ;;  %v3128_v15 = vsub.f32 %v13940_v10, %v3127_v29  ;;  %v11818_v33 = vpack.c.bf16 %v3141_v51, %v3134_v54 }
 0x461   :  { %11724 = vmatprep.subr.bf16.mxu1 %v12687_v28 }
 0x462   :  { %11699 = vmatpush3.bf16.msra.mxu0 %v13782_v1  ;;  %v2961_v1 = vld [vmem:[#allocation6 + $0x160] sm:$0xff] }
 0x463   :  { %11700 = vmatprep.subr.bf16.mxu0 %v12687_v28 }
 0x466   :  { %11702 = vmatpush3.bf16.msra.mxu0 %v13786_v20  ;;  %v3007_v20 = vand.u32 4294901760, %v2961_v1 }
 0x467   :  { %11703 = vmatprep.subr.bf16.mxu0 %v12687_v28 }
 0x468   :  { %v14087_v27 = vsub.f32 %v2961_v1, %v3007_v20  ;;  %v3121_v1 = vsub.f32 %v13938_v57, %v3120_v38 }
 0x46a   :  { %11705 = vmatpush3.bf16.msra.mxu0 %v13792_v7  ;;  %v14069_v7 = vpack.c.bf16 %v3010_v46, %v3007_v20  ;;  %v3122_v20 = vand.u32 4294901760, %v3121_v1  ;;  %v3129_v46 = vand.u32 4294901760, %v3128_v15  ;;  %v3171_v1 = vand.u32 4294901760, %v3170_v6 }
 0x46b   :  { %11850 = vmatprep.subr.bf16.mxu0 %v12687_v28  ;;  %v16140_v58 = vand.u32 4294901760, %v14087_v27 }
 0x46c   :  { %11726 = vmatpush3.bf16.msra.mxu1 %v14069_v7  ;;  %v11743_v48 = vpack.c.bf16 %v3129_v46, %v3122_v20  ;;  %v11752_v15 = vpack.c.bf16 %v3171_v1, %v3164_v44  ;;  %v11755_v20 = vpack.c.bf16 %v13919_v49, %v13917_v5  ;;  %v11758_v46 = vpack.c.bf16 %v13925_v9, %v13921_v35 }
 0x46d   :  { %10030 = vmatmul.mubr.f32.vlgmr.msra.gmra.mrb[8].mxu0 %v13891_v3  ;;  %v3064_v3 = vand.u32 4294901760, %v13917_v5  ;;  %11727 = vmatprep.subr.bf16.mxu1 %v12687_v28  ;;  %v11809_v49 = vpack.c.bf16 %v3099_v50, %v3092_v41  ;;  %v11812_v9 = vpack.c.bf16 %v3113_v25, %v3106_v61  ;;  %v11815_v35 = vpack.c.bf16 %v3127_v29, %v3120_v38 }
 0x46e   :  { %10274 = vmatprep.mubr.msk.f32.mxu0 %vm12688_vm0, %v12689_v63  ;;  %v12692_v41 = vmov 2475754826   ;;  %v12693_v25 = vmov 2131351028   ;;  %v12694_v29 = vmov 2102212464  }
 0x46f   :  { %v3065_v55 = vsub.f32 %v13917_v5, %v3064_v3  ;;  %v16141_v5 = vand.u32 4294901760, %v14089_v52 }
 0x470   :  { %11729 = vmatpush3.bf16.msra.mxu1 %v14075_v24 }
 0x471   :  { %11730 = vmatprep.subr.bf16.mxu1 %v12687_v28  ;;  %v3066_v37 = vand.u32 4294901760, %v3065_v55  ;;  %v3142_v55 = vsub.f32 %v14085_v8, %v3141_v51  ;;  %v12695_v51 = vmov 920167782  }
 0x473   :  { %v14099_v19 = vpack.c.bf16 %v3073_v18, %v3066_v37  ;;  %v3143_v37 = vand.u32 4294901760, %v3142_v55  ;;  %v16023_v18 = vand.u32 4294901760, %v14087_v27  ;;  %v11764_v55 = vpack.c.bf16 %v13936_v13, %v13934_v2 }
 0x474   :  { %v11821_v2 = vpack.c.bf16 %v16141_v5, %v16140_v58  ;;  %v16142_v13 = vand.u32 4294901760, %v14092_v36 }
 0x475   :  { %v11746_v32 = vpack.c.bf16 %v3143_v37, %v3136_v26  ;;  %v3149_v16 = vsub.f32 %v14087_v27, %v16023_v18  ;;  %v11767_v26 = vpack.c.bf16 %v13940_v10, %v13938_v57  ;;  %v11770_v37 = vpack.c.bf16 %v14085_v8, %v14083_v30 }
 0x476   :  { %v16143_v57 = vand.u32 4294901760, %v14094_v62 }
 0x477   :  { %v3150_v14 = vand.u32 4294901760, %v3149_v16  ;;  %v11773_v16 = vpack.c.bf16 %v14089_v52, %v14087_v27 }
 0x478   :  { %v11824_v10 = vpack.c.bf16 %v16143_v57, %v16142_v13 }
 0x479   :  { %v11749_v34 = vpack.c.bf16 %v3157_v11, %v3150_v14  ;;  %v8306_v14 = vld [vmem:[%s15946_s4 + $0x2] ss:$0 sm:$0xff] }
 0x540   :  { %v2943_v11 = vpop.f32.mrb[8].mxu0 }
 0x541   :  { %v12428_v40 = vadd.f32 %v8306_v14, %v2943_v11  ;;  %v10031_v6 = vpop.f32.mrb[9].mxu0 }
 0x543   :  { %v2947_v44 = vmax.f32 %v12428_v40, 0.0 }
 0x545   :  { %v14174_v1 = vand.u32 4294901760, %v2947_v44 }
 0x547   :  { %v3052_v39 = vsub.f32 %v2947_v44, %v14174_v1 }
 0x549   :  { %v3053_v0 = vand.u32 4294901760, %v3052_v39 }
 0x54b   :  { %v3054_v53 = vsub.f32 %v3052_v39, %v3053_v0 }
 0x54d   :  { %v3055_v18 = vand.u32 4294901760, %v3054_v53  ;;  %v12696_v53 = vmov 1326507024  }
 0x54f   :  { %10065 = vmatmul.mubr.f32.vlgmr.msra.gmra.mrb[8].mxu1 %v3055_v18 }
 0x550   :  { %11732 = vmatpush3.bf16.msra.mxu1 %v14099_v19  ;;  %10099 = vmatprep.mubr.msk.f32.mxu1 %vm12688_vm0, %v12689_v63  ;;  %v11803_v19 = vpack.c.bf16 %v3071_v17, %v3064_v3 }
 0x551   :  { %11733 = vmatprep.subr.bf16.mxu1 %v12687_v28 }
 0x554   :  { %11735 = vmatpush3.bf16.msra.mxu1 %v11734_v43  ;;  %v11806_v43 = vpack.c.bf16 %v3085_v45, %v3078_v59  ;;  %v12691_v59 = vmov 683565275  }
 0x555   :  { %11736 = vmatprep.subr.bf16.mxu1 %v12687_v28 }
 0x558   :  { %11738 = vmatpush3.bf16.msra.mxu1 %v11737_v12 }
 0x559   :  { %11739 = vmatprep.subr.bf16.mxu1 %v12687_v28 }
 0x55c   :  { %11741 = vmatpush3.bf16.msra.mxu1 %v11740_v42 }
 0x55d   :  { %11742 = vmatprep.subr.bf16.mxu1 %v12687_v28 }
 0x560   :  { %11744 = vmatpush3.bf16.msra.mxu1 %v11743_v48 }
 0x561   :  { %11745 = vmatprep.subr.bf16.mxu1 %v12687_v28 }
 0x564   :  { %11747 = vmatpush3.bf16.msra.mxu1 %v11746_v32 }
 0x565   :  { %11748 = vmatprep.subr.bf16.mxu1 %v12687_v28 }
 0x568   :  { %11750 = vmatpush3.bf16.msra.mxu1 %v11749_v34 }
 0x569   :  { %11751 = vmatprep.subr.bf16.mxu1 %v12687_v28 }
 0x56c   :  { %11753 = vmatpush3.bf16.msra.mxu1 %v11752_v15 }
 0x56d   :  { %11754 = vmatprep.subr.bf16.mxu1 %v12687_v28 }
 0x56f   :  { %10100 = vmatmul.mubr.f32.vlgmr.msra.gmra.mrb[8].mxu1 %v14174_v1 }
 0x570   :  { %11756 = vmatpush3.bf16.msra.mxu1 %v11755_v20  ;;  %10134 = vmatprep.mubr.msk.f32.mxu1 %vm12688_vm0, %v12689_v63 }
 0x571   :  { %11757 = vmatprep.subr.bf16.mxu1 %v12687_v28 }
 0x574   :  { %11759 = vmatpush3.bf16.msra.mxu1 %v11758_v46 }
 0x575   :  { %11760 = vmatprep.subr.bf16.mxu1 %v12687_v28 }
 0x578   :  { %11762 = vmatpush3.bf16.msra.mxu1 %v11761_v22 }
 0x579   :  { %11763 = vmatprep.subr.bf16.mxu1 %v12687_v28 }
 0x57c   :  { %11765 = vmatpush3.bf16.msra.mxu1 %v11764_v55 }
 0x57d   :  { %11766 = vmatprep.subr.bf16.mxu1 %v12687_v28 }
 0x580   :  { %11768 = vmatpush3.bf16.msra.mxu1 %v11767_v26 }
 0x581   :  { %11769 = vmatprep.subr.bf16.mxu1 %v12687_v28 }
 0x584   :  { %11771 = vmatpush3.bf16.msra.mxu1 %v11770_v37 }
 0x585   :  { %11772 = vmatprep.subr.bf16.mxu1 %v12687_v28 }
 0x588   :  { %11774 = vmatpush3.bf16.msra.mxu1 %v11773_v16 }
 0x589   :  { %11775 = vmatprep.subr.bf16.mxu1 %v12687_v28 }
 0x58c   :  { %11777 = vmatpush3.bf16.msra.mxu1 %v11776_v21 }
 0x58d   :  { %11778 = vmatprep.subr.bf16.mxu1 %v12687_v28 }
 0x58f   :  { %10135 = vmatmul.mubr.f32.vlgmr.msra.gmra.mrb[8].mxu1 %v3052_v39 }
 0x590   :  { %11780 = vmatpush3.bf16.msra.mxu1 %v13915_v47  ;;  %10169 = vmatprep.mubr.msk.f32.mxu1 %vm12688_vm0, %v12689_v63 }
 0x591   :  { %11781 = vmatprep.subr.bf16.mxu1 %v12687_v28 }
 0x594   :  { %11783 = vmatpush3.bf16.msra.mxu1 %v13923_v60 }
 0x595   :  { %11784 = vmatprep.subr.bf16.mxu1 %v12687_v28 }
 0x598   :  { %11786 = vmatpush3.bf16.msra.mxu1 %v13946_v23 }
 0x599   :  { %11787 = vmatprep.subr.bf16.mxu1 %v12687_v28 }
 0x59c   :  { %11789 = vmatpush3.bf16.msra.mxu1 %v13954_v56 }
 0x59d   :  { %11790 = vmatprep.subr.bf16.mxu1 %v12687_v28 }
 0x5a0   :  { %11792 = vmatpush3.bf16.msra.mxu1 %v13962_v4 }
 0x5a1   :  { %11793 = vmatprep.subr.bf16.mxu1 %v12687_v28 }
 0x5a4   :  { %11795 = vmatpush3.bf16.msra.mxu1 %v14065_v31 }
 0x5a5   :  { %11796 = vmatprep.subr.bf16.mxu1 %v12687_v28 }
 0x5a8   :  { %11798 = vmatpush3.bf16.msra.mxu1 %v14069_v7 }
 0x5a9   :  { %11799 = vmatprep.subr.bf16.mxu1 %v12687_v28 }
 0x5ac   :  { %11801 = vmatpush3.bf16.msra.mxu1 %v14075_v24 }
 0x5ad   :  { %11802 = vmatprep.subr.bf16.mxu1 %v12687_v28 }
 0x5af   :  { %10170 = vmatmul.mubr.f32.vlgmr.msra.gmra.mrb[8].mxu1 %v3053_v0 }
 0x5b0   :  { %11804 = vmatpush3.bf16.msra.mxu1 %v11803_v19  ;;  %10204 = vmatprep.mubr.msk.f32.mxu1 %vm12688_vm0, %v12689_v63 }
 0x5b1   :  { %11805 = vmatprep.subr.bf16.mxu1 %v12687_v28 }
 0x5b4   :  { %11807 = vmatpush3.bf16.msra.mxu1 %v11806_v43 }
 0x5b5   :  { %11808 = vmatprep.subr.bf16.mxu1 %v12687_v28 }
 0x5b8   :  { %11810 = vmatpush3.bf16.msra.mxu1 %v11809_v49 }
 0x5b9   :  { %11811 = vmatprep.subr.bf16.mxu1 %v12687_v28 }
 0x5bc   :  { %11813 = vmatpush3.bf16.msra.mxu1 %v11812_v9 }
 0x5bd   :  { %11814 = vmatprep.subr.bf16.mxu1 %v12687_v28 }
 0x5c0   :  { %11816 = vmatpush3.bf16.msra.mxu1 %v11815_v35 }
 0x5c1   :  { %11817 = vmatprep.subr.bf16.mxu1 %v12687_v28 }
 0x5c4   :  { %11819 = vmatpush3.bf16.msra.mxu1 %v11818_v33 }
 0x5c5   :  { %11820 = vmatprep.subr.bf16.mxu1 %v12687_v28 }
 0x5c8   :  { %11822 = vmatpush3.bf16.msra.mxu1 %v11821_v2 }
 0x5c9   :  { %11823 = vmatprep.subr.bf16.mxu1 %v12687_v28 }
 0x5cc   :  { %11825 = vmatpush3.bf16.msra.mxu1 %v11824_v10 }
 0x5cd   :  { %11826 = vmatprep.subr.bf16.mxu1 %v12687_v28 }
 0x5cf   :  { %10205 = vmatmul.mubr.f32.vlgmr.msra.gmra.mrb[8].mxu1 %v14174_v1 }
 0x5d0   :  { %11828 = vmatpush3.bf16.msra.mxu1 %v13915_v47  ;;  %10239 = vmatprep.mubr.msk.f32.mxu1 %vm12688_vm0, %v12689_v63 }
 0x5d1   :  { %11829 = vmatprep.subr.bf16.mxu1 %v12687_v28 }
 0x5d4   :  { %11831 = vmatpush3.bf16.msra.mxu1 %v13923_v60  ;;  %v8307_v60 = vld [vmem:[%s15946_s4 + $0x3] ss:$0 sm:$0xff] }
 0x5d5   :  { %11832 = vmatprep.subr.bf16.mxu1 %v12687_v28 }
 0x5d8   :  { %11834 = vmatpush3.bf16.msra.mxu1 %v13946_v23 }
 0x5d9   :  { %11835 = vmatprep.subr.bf16.mxu1 %v12687_v28 }
 0x5dc   :  { %11837 = vmatpush3.bf16.msra.mxu1 %v13954_v56 }
 0x5dd   :  { %11838 = vmatprep.subr.bf16.mxu1 %v12687_v28 }
 0x5e0   :  { %11840 = vmatpush3.bf16.msra.mxu1 %v13962_v4 }
 0x5e1   :  { %11841 = vmatprep.subr.bf16.mxu1 %v12687_v28 }
 0x5e4   :  { %11843 = vmatpush3.bf16.msra.mxu1 %v14065_v31 }
 0x5e5   :  { %11844 = vmatprep.subr.bf16.mxu1 %v12687_v28 }
 0x5e8   :  { %11846 = vmatpush3.bf16.msra.mxu1 %v14069_v7 }
 0x5e9   :  { %11847 = vmatprep.subr.bf16.mxu1 %v12687_v28 }
 0x5ec   :  { %11849 = vmatpush3.bf16.msra.mxu1 %v14075_v24 }
 0x5ed   :  { %11994 = vmatprep.subr.bf16.mxu1 %v12687_v28 }
 0x5ef   :  { %10240 = vmatmul.mubr.f32.vlgmr.msra.gmra.mrb[8].mxu1 %v14174_v1 }
 0x5f0   :  { %10484 = vmatprep.mubr.msk.f32.mxu1 %vm12688_vm0, %v12689_v63 }
 0x6c2   :  { %v3607_v47 = vpop.f32.mrb[8].mxu1 }
 0x6c3   :  { %v14284_v23 = vadd.f32 %v8307_v60, %v3607_v47  ;;  %v10241_v56 = vpop.f32.mrb[9].mxu1 }
 0x6c5   :  { %v14288_v4 = vmul.f32 %v14284_v23, %v14284_v23  ;;  %v14291_v31 = vmul.f32 0.1, %v14284_v23 }
 0x6c7   :  { %3613 = vrot.lane.b32.xlu0 %v14288_v4, %s12690_s16  ;;  %v3640_v7 = vand.u32 2139095040, %v14291_v31  ;;  %v3637_v30 = vand.u32 2147483647, %v14291_v31  ;;  %vm3639_vm8 = vcmp.lt.s32.totalorder %v14291_v31, 0  ;;  %vm3729_vm13 = vweird.f32 %v14291_v31 }
 0x6c9   :  { %v3641_v3 = vshrl.u32 %v3640_v7, 23  ;;  %v3644_v52 = vand.u32 8388607, %v3637_v30  ;;  %vm3638_vm9 = vcmp.le.f32.partialorder %v3637_v30, 0.7853982 }
 0x6cb   :  { %v8308_v17 = vadd.s32 4294967169, %v3641_v3  ;;  %v3645_v0 = vor.u32 8388608, %v3644_v52 }
 0x6cd   :  { %v3647_v24 = vadd.s32 1, %v8308_v17  ;;  %v3685_v40 = vshll.u32 %v3645_v0, 8 }
 0x6cf   :  { %vm3648_vm1 = vcmp.gt.s32.totalorder %v3647_v24, 0 }
 0x6d0   :  { %v3649_v8 = vsel %vm3648_vm1, %v3647_v24, 0 }
 0x6d1   :  { %v3651_v27 = vand.u32 31, %v3649_v8  ;;  %v3650_v62 = vshrl.u32 %v3649_v8, 5 }
 0x6d3   :  { %v3652_v36 = vsub.s32 32, %v3651_v27  ;;  %v3654_v45 = vshll.u32 %v12691_v59, %v3651_v27  ;;  %v3657_v50 = vshll.u32 %v12692_v41, %v3651_v27  ;;  %v3660_v38 = vshll.u32 %v12693_v25, %v3651_v27 }
 0x6d4   :  { %v3663_v54 = vshll.u32 %v12694_v29, %v3651_v27  ;;  %v3666_v18 = vshll.u32 %v12695_v51, %v3651_v27  ;;  %vm3669_vm2 = vcmp.lt.s32.totalorder %v3650_v62, 1  ;;  %vm3672_vm3 = vcmp.lt.s32.totalorder %v3650_v62, 4 }
 0x6d5   :  { %v3655_v61 = vshrl.u32 %v12692_v41, %v3652_v36  ;;  %v3658_v12 = vshrl.u32 %v12693_v25, %v3652_v36  ;;  %v3661_v42 = vshrl.u32 %v12694_v29, %v3652_v36  ;;  %v3664_v48 = vshrl.u32 %v12695_v51, %v3652_v36 }
 0x6d6   :  { %v3667_v32 = vshrl.u32 %v12696_v53, %v3652_v36  ;;  %v3653_v37 = vshrl.u32 %v12691_v59, %v3652_v36  ;;  %vm3671_vm4 = vcmp.lt.s32.totalorder %v3650_v62, 3  ;;  %vm3670_vm5 = vcmp.lt.s32.totalorder %v3650_v62, 2 }
 0x6d7   :  { %v3656_v39 = vor.u32 %v3655_v61, %v3654_v45  ;;  %v3659_v34 = vor.u32 %v3658_v12, %v3657_v50  ;;  %v3662_v15 = vor.u32 %v3661_v42, %v3660_v38  ;;  %v3665_v20 = vor.u32 %v3664_v48, %v3663_v54 }
 0x6d8   :  { %v3668_v46 = vor.u32 %v3667_v32, %v3666_v18 }
 0x6d9   :  { %v3674_v22 = vsel %vm3672_vm3, %v3662_v15, 2102212464  ;;  %v3677_v55 = vsel %vm3669_vm2, %v3656_v39, %v3659_v34  ;;  %v3681_v26 = vsel %vm3669_vm2, %v3659_v34, %v3662_v15  ;;  %v3678_v16 = vsel %vm3672_vm3, %v3665_v20, 920167782 }
 0x6da   :  { %v3682_v21 = vsel %vm3672_vm3, %v3668_v46, 1326507024  ;;  %v3679_v14 = vsel %vm3671_vm4, %v3662_v15, %v3678_v16  ;;  %v3673_v6 = vsel %vm3669_vm2, %v3653_v37, %v3656_v39  ;;  %v3675_v44 = vsel %vm3671_vm4, %v3659_v34, %v3674_v22 }
 0x6db   :  { %v3683_v11 = vsel %vm3671_vm4, %v3665_v20, %v3682_v21  ;;  %v3680_v1 = vsel %vm3670_vm5, %v3677_v55, %v3679_v14  ;;  %v3676_v33 = vsel %vm3670_vm5, %v3673_v6, %v3675_v44 }
 0x6dc   :  { %v3684_v19 = vsel %vm3670_vm5, %v3681_v26, %v3683_v11  ;;  %v14313_v9 = vmul.u32.u64.low %v3685_v40, %v3680_v1  ;;  %v14314_v35 = vmul.u32.u64.high %v3685_v40, %v3680_v1, %v14313_v9  ;;  %v3692_v5 = vmul.u32 %v3685_v40, %v3676_v33 }
 0x6dd   :  { %v14310_v43 = vmul.u32.u64.low %v3685_v40, %v3684_v19  ;;  %v14311_v49 = vmul.u32.u64.high %v3685_v40, %v3684_v19, %v14310_v43 }
 0x6de   :  { %v3695_v58 = vadd.s32 1, %v14314_v35 }
 0x6df   :  { %vm3694_vm6 = vc.u32 %v14311_v49, %v14313_v9  ;;  %v3693_v8 = vadd.s32 %v14313_v9, %v14311_v49  ;;  %v3621_v9 = vsub.f32 0.0, %v14284_v23 }
 0x6e0   :  { %v3696_v2 = vsel %vm3694_vm6, %v3695_v58, %v14314_v35 }
 0x6e1   :  { %v3697_v13 = vadd.s32 %v3696_v2, %v3692_v5 }
 0x6e3   :  { %v3698_v57 = vadd.s32 536870912, %v3697_v13 }
 0x6e5   :  { %v3699_v10 = vshrl.u32 %v3698_v57, 30 }
 0x6e7   :  { %v3700_v60 = vshll.u32 %v3699_v10, 30  ;;  %v3723_v32 = vsub.s32 4, %v3699_v10 }
 0x6e9   :  { %v3701_v47 = vsub.s32 %v3697_v13, %v3700_v60  ;;  %v3724_v39 = vsel %vm3639_vm8, %v3723_v32, %v3699_v10 }
 0x6ea   :  { %v3726_v34 = vsel %vm3638_vm9, 0, %v3724_v39 }
 0x6eb   :  { %v3703_v56 = vsub.s32 0, %v3701_v47  ;;  %v3730_v15 = vand.u32 3, %v3726_v34  ;;  %v3833_v40 = vadd.s32 3, %v3726_v34 }
 0x6ed   :  { %v8309_v7 = vmin.u32 %v3703_v56, %v3701_v47  ;;  %vm3735_vm10 = vcmp.eq.s32.totalorder %v3730_v15, 2  ;;  %vm3732_vm11 = vcmp.eq.s32.totalorder %v3730_v15, 0  ;;  %vm3731_vm12 = vcmp.lt.s32.totalorder %v3730_v15, 2 }
 0x6ee   :  { %v3834_v6 = vand.u32 3, %v3833_v40 }
 0x6ef   :  { %v3705_v3 = vclz %v8309_v7 }
 0x6f0   :  { %vm3836_vm15 = vcmp.eq.s32.totalorder %v3834_v6, 0  ;;  %vm3839_vm1 = vcmp.eq.s32.totalorder %v3834_v6, 2  ;;  %vm3835_vm2 = vcmp.lt.s32.totalorder %v3834_v6, 2 }
 0x6f1   :  { %v8310_v17 = vadd.s32 4294967294, %v3705_v3 }
 0x6f3   :  { %vm8311_vm7 = vcmp.lt.s32.totalorder %v8310_v17, 0 }
 0x6f4   :  { %v3708_v24 = vsel %vm8311_vm7, 0, %v8310_v17 }
 0x6f5   :  { %v3709_v27 = vsub.s32 32, %v3708_v24  ;;  %v3713_v52 = vsub.s32 4294967266, %v3708_v24  ;;  %v3710_v36 = vshll.u32 %v3701_v47, %v3708_v24 }
 0x6f7   :  { %v3711_v62 = vshrl.u32 %v3693_v8, %v3709_v27  ;;  %v3714_v45 = vadd.s32 127, %v3713_v52 }
 0x6f9   :  { %v3712_v50 = vor.u32 %v3711_v62, %v3710_v36  ;;  %v3715_v61 = vshll.u32 %v3714_v45, 23 }
 0x6fb   :  { %v3716_v12 = vor.u32 4788187, %v3715_v61  ;;  %v3719_v42 = vcvt.s32.f32 %v3712_v50 }
 0x6fd   :  { %v3717_v38 = vand.u32 2147483647, %v3716_v12 }
 0x6ff   :  { %v3720_v54 = vmul.f32 %v3719_v42, %v3717_v38 }
 0x701   :  { %v3721_v48 = vxor.u32 2147483648, %v3720_v54 }
 0x703   :  { %v3722_v18 = vsel %vm3639_vm8, %v3721_v48, %v3720_v54 }
 0x704   :  { %v3725_v0 = vsel %vm3638_vm9, %v14291_v31, %v3722_v18 }
 0x705   :  { %12578 = vcosq.f32 %v3725_v0 }
 0x706   :  { %12580 = vsinq.f32 %v3725_v0 }
 0x70f   :  { %v12579_v20 = vpop.eup %12578 }
 0x710   :  { %v12581_v46 = vpop.eup %12580  ;;  %v3736_v22 = vxor.u32 2147483648, %v12579_v20 }
 0x711   :  { %v3733_v55 = vxor.u32 2147483648, %v12581_v46 }
 0x712   :  { %v3737_v26 = vsel %vm3735_vm10, %v3736_v22, %v12581_v46  ;;  %v3841_v1 = vsel %vm3839_vm1, %v3736_v22, %v12581_v46 }
 0x713   :  { %v3734_v37 = vsel %vm3732_vm11, %v12579_v20, %v3733_v55  ;;  %v3838_v44 = vsel %vm3836_vm15, %v12579_v20, %v3733_v55 }
 0x714   :  { %v3738_v30 = vsel %vm3731_vm12, %v3734_v37, %v3737_v26  ;;  %v3842_v49 = vsel %vm3835_vm2, %v3838_v44, %v3841_v1 }
 0x715   :  { %v3739_v16 = vsel %vm3729_vm13, nan, %v3738_v30 }
 0x739   :  { %v3614_v21 = vpop.permute.xlu0 %3613 }
 0x73a   :  { %v3616_v14 = vadd.f32 %v3614_v21, %v14288_v4  ;;  %v3843_v4 = vsel %vm3729_vm13, nan, %v3842_v49 }
 0x73c   :  { %vm3617_vm14 = vcmp.gt.f32.partialorder %v3616_v14, 0.0 }
 0x73d   :  { %v3618_v11 = vsel %vm3617_vm14, %v3616_v14, 1.0 }
 0x73e   :  { %12582 = vrsqrt.f32 %v3618_v11 }
 0x748   :  { %v12583_v19 = vpop.eup %12582 }
 0x749   :  { %v3620_v43 = vsel %vm3617_vm14, %v12583_v19, 1.0 }
 0x74a   :  { %3623 = vrot.lane.b32.xlu0 %v3620_v43, %s12697_s2  ;;  %v3632_v58 = vmul.f32 %v14284_v23, %v3620_v43 }
 0x74c   :  { %v14343_v31 = vsel %vm3617_vm14, %v3632_v58, 1.0 }
 0x74e   :  { %3850 = vrot.lane.b32.xlu0 %v3843_v4, %s12698_s17 }
 0x7bc   :  { %v3624_v35 = vpop.permute.xlu0 %3623 }
 0x7bd   :  { %v3626_v33 = vmul.f32 %v3624_v35, %v3621_v9 }
 0x7bf   :  { %3628 = vrot.lane.b32.xlu1 %v3626_v33, %s12690_s16 }
 0x7c0   :  { %v14340_v13 = vpop.permute.xlu0 %3850 }
 0x7c3   :  { %3845 = vrot.lane.b32.xlu1 %v3739_v16, %s12698_s17 }
 0x831   :  { %v3629_v5 = vpop.permute.xlu1 %3628 }
 0x832   :  { %v14338_v2 = vsel %vm3617_vm14, %v3629_v5, 0.0 }
 0x833   :  { %v3856_v10 = vmul.f32 %v14340_v13, %v14338_v2 }
 0x835   :  { %v14345_v57 = vpop.permute.xlu1 %3845 }
 0x836   :  { %v3855_v60 = vmul.f32 %v14345_v57, %v14343_v31 }
 0x838   :  { %v14351_v47 = vadd.f32 %v3856_v10, %v3855_v60 }
 0x83a   :  { %v3858_v56 = vmul.f32 -9.81, %v14351_v47 }
 0x83c   :  { %v3859_v7 = vmul.f32 0.1, %v3858_v56 }
 0x83e   :  { %3861 = vrot.lane.b32.xlu1 %v3859_v7, %s12699_s18 }
 0x8b0   :  { %v3862_v3 = vpop.permute.xlu1 %3861 }
 0x8b1   :  { %v14356_v17 = vadd.f32 %v14284_v23, %v3862_v3 }
 0x8b3   :  { %v14359_v24 = vmul.f32 0.1, %v14356_v17 }
 0x8b5   :  { %v3891_v8 = vand.u32 2139095040, %v14359_v24  ;;  %v3888_v62 = vand.u32 2147483647, %v14359_v24  ;;  %vm3890_vm10 = vcmp.lt.s32.totalorder %v14359_v24, 0 }
 0x8b7   :  { %v3892_v27 = vshrl.u32 %v3891_v8, 23  ;;  %v3895_v12 = vand.u32 8388607, %v3888_v62  ;;  %vm3889_vm11 = vcmp.le.f32.partialorder %v3888_v62, 0.7853982 }
 0x8b9   :  { %v8316_v52 = vadd.s32 4294967169, %v3892_v27  ;;  %v3896_v46 = vor.u32 8388608, %v3895_v12 }
 0x8bb   :  { %v3898_v36 = vadd.s32 1, %v8316_v52  ;;  %v3936_v19 = vshll.u32 %v3896_v46, 8 }
 0x8bd   :  { %vm3899_vm3 = vcmp.gt.s32.totalorder %v3898_v36, 0 }
 0x8be   :  { %v3900_v45 = vsel %vm3899_vm3, %v3898_v36, 0  ;;  %vm3980_vm3 = vweird.f32 %v14359_v24 }
 0x8bf   :  { %v3902_v50 = vand.u32 31, %v3900_v45  ;;  %v3901_v38 = vshrl.u32 %v3900_v45, 5 }
 0x8c1   :  { %v3903_v61 = vsub.s32 32, %v3902_v50  ;;  %v3905_v42 = vshll.u32 %v12691_v59, %v3902_v50  ;;  %v3908_v54 = vshll.u32 %v12692_v41, %v3902_v50  ;;  %v3911_v32 = vshll.u32 %v12693_v25, %v3902_v50 }
 0x8c2   :  { %v3914_v39 = vshll.u32 %v12694_v29, %v3902_v50  ;;  %v3917_v15 = vshll.u32 %v12695_v51, %v3902_v50  ;;  %vm3920_vm4 = vcmp.lt.s32.totalorder %v3901_v38, 1  ;;  %vm3923_vm5 = vcmp.lt.s32.totalorder %v3901_v38, 4 }
 0x8c3   :  { %v3906_v48 = vshrl.u32 %v12692_v41, %v3903_v61  ;;  %v3909_v18 = vshrl.u32 %v12693_v25, %v3903_v61  ;;  %v3912_v0 = vshrl.u32 %v12694_v29, %v3903_v61  ;;  %v3915_v34 = vshrl.u32 %v12695_v51, %v3903_v61 }
 0x8c4   :  { %v3918_v20 = vshrl.u32 %v12696_v53, %v3903_v61  ;;  %v3904_v11 = vshrl.u32 %v12691_v59, %v3903_v61  ;;  %vm3922_vm6 = vcmp.lt.s32.totalorder %v3901_v38, 3  ;;  %vm3921_vm7 = vcmp.lt.s32.totalorder %v3901_v38, 2 }
 0x8c5   :  { %v3907_v22 = vor.u32 %v3906_v48, %v3905_v42  ;;  %v3910_v55 = vor.u32 %v3909_v18, %v3908_v54  ;;  %v3913_v26 = vor.u32 %v3912_v0, %v3911_v32  ;;  %v3916_v37 = vor.u32 %v3915_v34, %v3914_v39 }
 0x8c6   :  { %v3919_v30 = vor.u32 %v3918_v20, %v3917_v15 }
 0x8c7   :  { %v3925_v16 = vsel %vm3923_vm5, %v3913_v26, 2102212464  ;;  %v3928_v21 = vsel %vm3920_vm4, %v3907_v22, %v3910_v55  ;;  %v3932_v14 = vsel %vm3920_vm4, %v3910_v55, %v3913_v26  ;;  %v3929_v40 = vsel %vm3923_vm5, %v3916_v37, 920167782 }
 0x8c8   :  { %v3933_v6 = vsel %vm3923_vm5, %v3919_v30, 1326507024  ;;  %v3930_v44 = vsel %vm3922_vm6, %v3913_v26, %v3929_v40  ;;  %v3924_v43 = vsel %vm3920_vm4, %v3904_v11, %v3907_v22  ;;  %v3926_v49 = vsel %vm3922_vm6, %v3910_v55, %v3925_v16 }
 0x8c9   :  { %v3934_v1 = vsel %vm3922_vm6, %v3916_v37, %v3933_v6  ;;  %v3931_v4 = vsel %vm3921_vm7, %v3928_v21, %v3930_v44  ;;  %v3927_v10 = vsel %vm3921_vm7, %v3924_v43, %v3926_v49 }
 0x8ca   :  { %v3935_v9 = vsel %vm3921_vm7, %v3932_v14, %v3934_v1  ;;  %v14379_v58 = vmul.u32.u64.low %v3936_v19, %v3931_v4  ;;  %v14380_v5 = vmul.u32.u64.high %v3936_v19, %v3931_v4, %v14379_v58  ;;  %v3943_v56 = vmul.u32 %v3936_v19, %v3927_v10 }
 0x8cb   :  { %v14376_v35 = vmul.u32.u64.low %v3936_v19, %v3935_v9  ;;  %v14377_v33 = vmul.u32.u64.high %v3936_v19, %v3935_v9, %v14376_v35  ;;  %v3853_v10 = vmul.f32 %v14340_v13, %v14343_v31 }
 0x8cc   :  { %v3946_v60 = vadd.s32 1, %v14380_v5 }
 0x8cd   :  { %vm3945_vm8 = vc.u32 %v14377_v33, %v14379_v58  ;;  %v3944_v42 = vadd.s32 %v14379_v58, %v14377_v33 }
 0x8ce   :  { %v3947_v7 = vsel %vm3945_vm8, %v3946_v60, %v14380_v5  ;;  %v3848_v5 = vmul.f32 %v14345_v57, %v14338_v2 }
 0x8cf   :  { %v3948_v3 = vadd.s32 %v3947_v7, %v3943_v56  ;;  %v3886_v56 = vsub.f32 0.0, %v14351_v47 }
 0x8d0   :  { %v14397_v60 = vsub.f32 %v3848_v5, %v3853_v10 }
 0x8d1   :  { %v3949_v8 = vadd.s32 536870912, %v3948_v3 }
 0x8d3   :  { %v3950_v27 = vshrl.u32 %v3949_v8, 30 }
 0x8d5   :  { %v3951_v52 = vshll.u32 %v3950_v27, 30  ;;  %v3974_v55 = vsub.s32 4, %v3950_v27 }
 0x8d7   :  { %v3952_v36 = vsub.s32 %v3948_v3, %v3951_v52  ;;  %v3975_v30 = vsel %vm3890_vm10, %v3974_v55, %v3950_v27 }
 0x8d8   :  { %v3977_v21 = vsel %vm3889_vm11, 0, %v3975_v30 }
 0x8d9   :  { %v3954_v45 = vsub.s32 0, %v3952_v36  ;;  %v4084_v14 = vadd.s32 3, %v3977_v21  ;;  %v3981_v40 = vand.u32 3, %v3977_v21 }
 0x8db   :  { %v8317_v50 = vmin.u32 %v3954_v45, %v3952_v36  ;;  %v4085_v11 = vand.u32 3, %v4084_v14  ;;  %vm3986_vm13 = vcmp.eq.s32.totalorder %v3981_v40, 2  ;;  %vm3983_vm15 = vcmp.eq.s32.totalorder %v3981_v40, 0 }
 0x8dc   :  { %vm3982_vm2 = vcmp.lt.s32.totalorder %v3981_v40, 2 }
 0x8dd   :  { %v3956_v61 = vclz %v8317_v50  ;;  %vm4090_vm12 = vcmp.eq.s32.totalorder %v4085_v11, 2  ;;  %vm4087_vm14 = vcmp.eq.s32.totalorder %v4085_v11, 0  ;;  %vm4086_vm1 = vcmp.lt.s32.totalorder %v4085_v11, 2 }
 0x8df   :  { %v8318_v12 = vadd.s32 4294967294, %v3956_v61 }
 0x8e1   :  { %vm8319_vm9 = vcmp.lt.s32.totalorder %v8318_v12, 0 }
 0x8e2   :  { %v3959_v38 = vsel %vm8319_vm9, 0, %v8318_v12 }
 0x8e3   :  { %v3960_v54 = vsub.s32 32, %v3959_v38  ;;  %v3964_v48 = vsub.s32 4294967266, %v3959_v38  ;;  %v3961_v18 = vshll.u32 %v3952_v36, %v3959_v38 }
 0x8e5   :  { %v3962_v32 = vshrl.u32 %v3944_v42, %v3960_v54  ;;  %v3965_v0 = vadd.s32 127, %v3964_v48 }
 0x8e7   :  { %v3963_v39 = vor.u32 %v3962_v32, %v3961_v18  ;;  %v3966_v34 = vshll.u32 %v3965_v0, 23 }
 0x8e9   :  { %v3967_v15 = vor.u32 4788187, %v3966_v34  ;;  %v3970_v46 = vcvt.s32.f32 %v3963_v39 }
 0x8eb   :  { %v3968_v20 = vand.u32 2147483647, %v3967_v15 }
 0x8ed   :  { %v3971_v22 = vmul.f32 %v3970_v46, %v3968_v20 }
 0x8ef   :  { %v3972_v26 = vxor.u32 2147483648, %v3971_v22 }
 0x8f1   :  { %v3973_v37 = vsel %vm3890_vm10, %v3972_v26, %v3971_v22 }
 0x8f2   :  { %v3976_v16 = vsel %vm3889_vm11, %v14359_v24, %v3973_v37 }
 0x8f3   :  { %12584 = vcosq.f32 %v3976_v16 }
 0x8f4   :  { %12586 = vsinq.f32 %v3976_v16 }
 0x8fd   :  { %v12585_v6 = vpop.eup %12584 }
 0x8fe   :  { %v12587_v44 = vpop.eup %12586  ;;  %v3987_v1 = vxor.u32 2147483648, %v12585_v6 }
 0x8ff   :  { %v3984_v19 = vxor.u32 2147483648, %v12587_v44 }
 0x900   :  { %v4092_v43 = vsel %vm4090_vm12, %v3987_v1, %v12587_v44  ;;  %v3988_v62 = vsel %vm3986_vm13, %v3987_v1, %v12587_v44 }
 0x901   :  { %v4089_v49 = vsel %vm4087_vm14, %v12585_v6, %v3984_v19  ;;  %v3985_v4 = vsel %vm3983_vm15, %v12585_v6, %v3984_v19 }
 0x902   :  { %v4093_v9 = vsel %vm4086_vm1, %v4089_v49, %v4092_v43  ;;  %v3989_v35 = vsel %vm3982_vm2, %v3985_v4, %v3988_v62 }
 0x903   :  { %v4094_v33 = vsel %vm3980_vm3, nan, %v4093_v9  ;;  %v3990_v58 = vsel %vm3980_vm3, nan, %v3989_v35 }
 0x904   :  { %4101 = vrot.lane.b32.xlu1 %v4094_v33, %s12698_s17  ;;  %4096 = vrot.lane.b32.xlu0 %v3990_v58, %s12698_s17 }
 0x976   :  { %v14400_v7 = vpop.permute.xlu1 %4101  ;;  %v14402_v24 = vpop.permute.xlu0 %4096 }
 0x977   :  { %v4107_v3 = vmul.f32 %v14400_v7, %v3886_v56  ;;  %v4106_v8 = vmul.f32 %v14402_v24, %v14397_v60 }
 0x979   :  { %v14409_v27 = vadd.f32 %v4107_v3, %v4106_v8 }
 0x97b   :  { %v4109_v2 = vmul.f32 -9.81, %v14409_v27 }
 0x97d   :  { %v4110_v13 = vmul.f32 0.1, %v4109_v2 }
 0x97f   :  { %4112 = vrot.lane.b32.xlu0 %v4110_v13, %s12699_s18 }
 0x9f1   :  { %v4113_v31 = vpop.permute.xlu0 %4112 }
 0x9f2   :  { %v14414_v57 = vadd.f32 %v4113_v31, %v14356_v17 }
 0x9f4   :  { %v14417_v52 = vmul.f32 0.1, %v14414_v57 }
 0x9f6   :  { %v4142_v36 = vand.u32 2139095040, %v14417_v52  ;;  %v4139_v12 = vand.u32 2147483647, %v14417_v52  ;;  %vm4141_vm11 = vcmp.lt.s32.totalorder %v14417_v52, 0 }
 0x9f8   :  { %v4143_v45 = vshrl.u32 %v4142_v36, 23  ;;  %v4146_v48 = vand.u32 8388607, %v4139_v12  ;;  %vm4140_vm12 = vcmp.le.f32.partialorder %v4139_v12, 0.7853982 }
 0x9fa   :  { %v8324_v50 = vadd.s32 4294967169, %v4143_v45  ;;  %v4147_v37 = vor.u32 8388608, %v4146_v48 }
 0x9fc   :  { %v4149_v61 = vadd.s32 1, %v8324_v50  ;;  %v4187_v4 = vshll.u32 %v4147_v37, 8 }
 0x9fe   :  { %vm4150_vm4 = vcmp.gt.s32.totalorder %v4149_v61, 0 }
 0x9ff   :  { %v4151_v38 = vsel %vm4150_vm4, %v4149_v61, 0  ;;  %vm4231_vm4 = vweird.f32 %v14417_v52 }
 0xa00   :  { %v4153_v42 = vand.u32 31, %v4151_v38  ;;  %v4152_v18 = vshrl.u32 %v4151_v38, 5 }
 0xa02   :  { %v4154_v54 = vsub.s32 32, %v4153_v42  ;;  %v4156_v32 = vshll.u32 %v12691_v59, %v4153_v42  ;;  %v4159_v0 = vshll.u32 %v12692_v41, %v4153_v42  ;;  %v4162_v15 = vshll.u32 %v12693_v25, %v4153_v42 }
 0xa03   :  { %v4165_v46 = vshll.u32 %v12694_v29, %v4153_v42  ;;  %v4168_v55 = vshll.u32 %v12695_v51, %v4153_v42  ;;  %vm4171_vm5 = vcmp.lt.s32.totalorder %v4152_v18, 1  ;;  %vm4174_vm6 = vcmp.lt.s32.totalorder %v4152_v18, 4 }
 0xa04   :  { %v4157_v39 = vshrl.u32 %v12692_v41, %v4154_v54  ;;  %v4160_v34 = vshrl.u32 %v12693_v25, %v4154_v54  ;;  %v4163_v20 = vshrl.u32 %v12694_v29, %v4154_v54  ;;  %v4166_v22 = vshrl.u32 %v12695_v51, %v4154_v54 }
 0xa05   :  { %v4169_v26 = vshrl.u32 %v12696_v53, %v4154_v54  ;;  %v4155_v1 = vshrl.u32 %v12691_v59, %v4154_v54  ;;  %vm4173_vm7 = vcmp.lt.s32.totalorder %v4152_v18, 3  ;;  %vm4172_vm8 = vcmp.lt.s32.totalorder %v4152_v18, 2 }
 0xa06   :  { %v4158_v30 = vor.u32 %v4157_v39, %v4156_v32  ;;  %v4161_v16 = vor.u32 %v4160_v34, %v4159_v0  ;;  %v4164_v21 = vor.u32 %v4163_v20, %v4162_v15  ;;  %v4167_v14 = vor.u32 %v4166_v22, %v4165_v46 }
 0xa07   :  { %v4170_v11 = vor.u32 %v4169_v26, %v4168_v55 }
 0xa08   :  { %v4176_v40 = vsel %vm4174_vm6, %v4164_v21, 2102212464  ;;  %v4179_v6 = vsel %vm4171_vm5, %v4158_v30, %v4161_v16  ;;  %v4183_v44 = vsel %vm4171_vm5, %v4161_v16, %v4164_v21  ;;  %v4180_v19 = vsel %vm4174_vm6, %v4167_v14, 920167782 }
 0xa09   :  { %v4184_v43 = vsel %vm4174_vm6, %v4170_v11, 1326507024  ;;  %v4181_v62 = vsel %vm4173_vm7, %v4164_v21, %v4180_v19  ;;  %v4175_v9 = vsel %vm4171_vm5, %v4155_v1, %v4158_v30  ;;  %v4177_v35 = vsel %vm4173_vm7, %v4161_v16, %v4176_v40 }
 0xa0a   :  { %v4185_v49 = vsel %vm4173_vm7, %v4167_v14, %v4184_v43  ;;  %v4182_v33 = vsel %vm4172_vm8, %v4179_v6, %v4181_v62  ;;  %v4178_v2 = vsel %vm4172_vm8, %v4175_v9, %v4177_v35 }
 0xa0b   :  { %v4186_v58 = vsel %vm4172_vm8, %v4183_v44, %v4185_v49  ;;  %v14437_v3 = vmul.u32.u64.low %v4187_v4, %v4182_v33  ;;  %v14438_v8 = vmul.u32.u64.high %v4187_v4, %v4182_v33, %v14437_v3  ;;  %v4194_v31 = vmul.u32 %v4187_v4, %v4178_v2 }
 0xa0c   :  { %v14434_v5 = vmul.u32.u64.low %v4187_v4, %v4186_v58  ;;  %v14435_v10 = vmul.u32.u64.high %v4187_v4, %v4186_v58, %v14434_v5 }
 0xa0d   :  { %v4197_v13 = vadd.s32 1, %v14438_v8 }
 0xa0e   :  { %vm4196_vm9 = vc.u32 %v14435_v10, %v14437_v3  ;;  %v4195_v39 = vadd.s32 %v14437_v3, %v14435_v10 }
 0xa0f   :  { %v4198_v36 = vsel %vm4196_vm9, %v4197_v13, %v14438_v8  ;;  %v4104_v13 = vmul.f32 %v14400_v7, %v14397_v60 }
 0xa10   :  { %v4199_v45 = vadd.s32 %v4198_v36, %v4194_v31  ;;  %v4099_v31 = vmul.f32 %v14402_v24, %v3886_v56 }
 0xa12   :  { %v4200_v50 = vadd.s32 536870912, %v4199_v45  ;;  %v14456_v36 = vsub.f32 %v4099_v31, %v4104_v13 }
 0xa14   :  { %v4201_v61 = vshrl.u32 %v4200_v50, 30 }
 0xa16   :  { %v4202_v38 = vshll.u32 %v4201_v61, 30  ;;  %v4225_v14 = vsub.s32 4, %v4201_v61 }
 0xa18   :  { %v4203_v42 = vsub.s32 %v4199_v45, %v4202_v38  ;;  %v4226_v6 = vsel %vm4141_vm11, %v4225_v14, %v4201_v61  ;;  %v4137_v45 = vsub.f32 0.0, %v14409_v27 }
 0xa19   :  { %v4228_v1 = vsel %vm4140_vm12, 0, %v4226_v6 }
 0xa1a   :  { %v4205_v54 = vsub.s32 0, %v4203_v42  ;;  %v4335_v19 = vadd.s32 3, %v4228_v1  ;;  %v4232_v62 = vand.u32 3, %v4228_v1 }
 0xa1c   :  { %v8325_v48 = vmin.u32 %v4205_v54, %v4203_v42  ;;  %v4336_v43 = vand.u32 3, %v4335_v19  ;;  %vm4237_vm14 = vcmp.eq.s32.totalorder %v4232_v62, 2  ;;  %vm4234_vm1 = vcmp.eq.s32.totalorder %v4232_v62, 0 }
 0xa1d   :  { %vm4233_vm3 = vcmp.lt.s32.totalorder %v4232_v62, 2 }
 0xa1e   :  { %v4207_v18 = vclz %v8325_v48  ;;  %vm4341_vm13 = vcmp.eq.s32.totalorder %v4336_v43, 2  ;;  %vm4338_vm15 = vcmp.eq.s32.totalorder %v4336_v43, 0  ;;  %vm4337_vm2 = vcmp.lt.s32.totalorder %v4336_v43, 2 }
 0xa20   :  { %v8326_v32 = vadd.s32 4294967294, %v4207_v18 }
 0xa22   :  { %vm8327_vm10 = vcmp.lt.s32.totalorder %v8326_v32, 0 }
 0xa23   :  { %v4210_v0 = vsel %vm8327_vm10, 0, %v8326_v32 }
 0xa24   :  { %v4211_v34 = vsub.s32 32, %v4210_v0  ;;  %v4215_v15 = vsub.s32 4294967266, %v4210_v0  ;;  %v4212_v20 = vshll.u32 %v4203_v42, %v4210_v0 }
 0xa26   :  { %v4213_v46 = vshrl.u32 %v4195_v39, %v4211_v34  ;;  %v4216_v22 = vadd.s32 127, %v4215_v15 }
 0xa28   :  { %v4214_v55 = vor.u32 %v4213_v46, %v4212_v20  ;;  %v4217_v26 = vshll.u32 %v4216_v22, 23 }
 0xa2a   :  { %v4218_v37 = vor.u32 4788187, %v4217_v26  ;;  %v4221_v16 = vcvt.s32.f32 %v4214_v55 }
 0xa2c   :  { %v4219_v30 = vand.u32 2147483647, %v4218_v37 }
 0xa2e   :  { %v4222_v21 = vmul.f32 %v4221_v16, %v4219_v30 }
 0xa30   :  { %v4223_v11 = vxor.u32 2147483648, %v4222_v21 }
 0xa32   :  { %v4224_v40 = vsel %vm4141_vm11, %v4223_v11, %v4222_v21 }
 0xa33   :  { %v4227_v44 = vsel %vm4140_vm12, %v14417_v52, %v4224_v40 }
 0xa34   :  { %12588 = vcosq.f32 %v4227_v44 }
 0xa35   :  { %12590 = vsinq.f32 %v4227_v44 }
 0xa3e   :  { %v12589_v49 = vpop.eup %12588 }
 0xa3f   :  { %v12591_v4 = vpop.eup %12590  ;;  %v4238_v9 = vxor.u32 2147483648, %v12589_v49 }
 0xa40   :  { %v4235_v35 = vxor.u32 2147483648, %v12591_v4 }
 0xa41   :  { %v4343_v33 = vsel %vm4341_vm13, %v4238_v9, %v12591_v4  ;;  %v4239_v12 = vsel %vm4237_vm14, %v4238_v9, %v12591_v4 }
 0xa42   :  { %v4340_v58 = vsel %vm4338_vm15, %v12589_v49, %v4235_v35  ;;  %v4236_v5 = vsel %vm4234_vm1, %v12589_v49, %v4235_v35 }
 0xa43   :  { %v4344_v10 = vsel %vm4337_vm2, %v4340_v58, %v4343_v33  ;;  %v4240_v3 = vsel %vm4233_vm3, %v4236_v5, %v4239_v12 }
 0xa44   :  { %v4345_v8 = vsel %vm4231_vm4, nan, %v4344_v10  ;;  %v4241_v2 = vsel %vm4231_vm4, nan, %v4240_v3 }
 0xa45   :  { %4352 = vrot.lane.b32.xlu0 %v4345_v8, %s12698_s17  ;;  %4347 = vrot.lane.b32.xlu1 %v4241_v2, %s12698_s17 }
 0xab7   :  { %v14459_v52 = vpop.permute.xlu0 %4352  ;;  %v14461_v50 = vpop.permute.xlu1 %4347 }
 0xab8   :  { %v4358_v61 = vmul.f32 %v14459_v52, %v4137_v45  ;;  %v4357_v38 = vmul.f32 %v14461_v50, %v14456_v36 }
 0xaba   :  { %v14468_v7 = vadd.f32 %v4358_v61, %v4357_v38 }
 0xabc   :  { %v4360_v42 = vmul.f32 -9.81, %v14468_v7 }
 0xabe   :  { %v4361_v56 = vmul.f32 0.1, %v4360_v42 }
 0xac0   :  { %4363 = vrot.lane.b32.xlu1 %v4361_v56, %s12699_s18 }
 0xb32   :  { %v4364_v24 = vpop.permute.xlu1 %4363 }
 0xb33   :  { %v14473_v54 = vadd.f32 %v4364_v24, %v14414_v57 }
 0xb35   :  { %v14476_v48 = vmul.f32 0.1, %v14473_v54 }
 0xb37   :  { %v4393_v18 = vand.u32 2139095040, %v14476_v48  ;;  %v4390_v34 = vand.u32 2147483647, %v14476_v48  ;;  %vm4392_vm12 = vcmp.lt.s32.totalorder %v14476_v48, 0 }
 0xb39   :  { %v4394_v32 = vshrl.u32 %v4393_v18, 23  ;;  %v4397_v22 = vand.u32 8388607, %v4390_v34  ;;  %vm4391_vm13 = vcmp.le.f32.partialorder %v4390_v34, 0.7853982 }
 0xb3b   :  { %v8332_v0 = vadd.s32 4294967169, %v4394_v32  ;;  %v4398_v1 = vor.u32 8388608, %v4397_v22 }
 0xb3d   :  { %v4400_v39 = vadd.s32 1, %v8332_v0  ;;  %v4438_v8 = vshll.u32 %v4398_v1, 8 }
 0xb3f   :  { %vm4401_vm5 = vcmp.gt.s32.totalorder %v4400_v39, 0 }
 0xb40   :  { %v4402_v15 = vsel %vm4401_vm5, %v4400_v39, 0  ;;  %vm4482_vm5 = vweird.f32 %v14476_v48 }
 0xb41   :  { %v4404_v20 = vand.u32 31, %v4402_v15  ;;  %v4403_v55 = vshrl.u32 %v4402_v15, 5 }
 0xb43   :  { %v4405_v46 = vsub.s32 32, %v4404_v20  ;;  %v4407_v26 = vshll.u32 %v12691_v59, %v4404_v20  ;;  %v4410_v37 = vshll.u32 %v12692_v41, %v4404_v20  ;;  %v4413_v21 = vshll.u32 %v12693_v25, %v4404_v20 }
 0xb44   :  { %v4416_v11 = vshll.u32 %v12694_v29, %v4404_v20  ;;  %v4419_v6 = vshll.u32 %v12695_v51, %v4404_v20  ;;  %vm4422_vm6 = vcmp.lt.s32.totalorder %v4403_v55, 1  ;;  %vm4425_vm7 = vcmp.lt.s32.totalorder %v4403_v55, 4 }
 0xb45   :  { %v4408_v30 = vshrl.u32 %v12692_v41, %v4405_v46  ;;  %v4411_v16 = vshrl.u32 %v12693_v25, %v4405_v46  ;;  %v4414_v14 = vshrl.u32 %v12694_v29, %v4405_v46  ;;  %v4417_v40 = vshrl.u32 %v12695_v51, %v4405_v46 }
 0xb46   :  { %v4420_v44 = vshrl.u32 %v12696_v53, %v4405_v46  ;;  %v4406_v12 = vshrl.u32 %v12691_v59, %v4405_v46  ;;  %vm4424_vm8 = vcmp.lt.s32.totalorder %v4403_v55, 3  ;;  %vm4423_vm9 = vcmp.lt.s32.totalorder %v4403_v55, 2 }
 0xb47   :  { %v4409_v19 = vor.u32 %v4408_v30, %v4407_v26  ;;  %v4412_v43 = vor.u32 %v4411_v16, %v4410_v37  ;;  %v4415_v62 = vor.u32 %v4414_v14, %v4413_v21  ;;  %v4418_v49 = vor.u32 %v4417_v40, %v4416_v11 }
 0xb48   :  { %v4421_v4 = vor.u32 %v4420_v44, %v4419_v6 }
 0xb49   :  { %v4427_v9 = vsel %vm4425_vm7, %v4415_v62, 2102212464  ;;  %v4430_v35 = vsel %vm4422_vm6, %v4409_v19, %v4412_v43  ;;  %v4434_v33 = vsel %vm4422_vm6, %v4412_v43, %v4415_v62  ;;  %v4431_v58 = vsel %vm4425_vm7, %v4418_v49, 920167782 }
 0xb4a   :  { %v4435_v5 = vsel %vm4425_vm7, %v4421_v4, 1326507024  ;;  %v4432_v10 = vsel %vm4424_vm8, %v4415_v62, %v4431_v58  ;;  %v4426_v2 = vsel %vm4422_vm6, %v4406_v12, %v4409_v19  ;;  %v4428_v13 = vsel %vm4424_vm8, %v4412_v43, %v4427_v9 }
 0xb4b   :  { %v4436_v3 = vsel %vm4424_vm8, %v4418_v49, %v4435_v5  ;;  %v4433_v31 = vsel %vm4423_vm9, %v4430_v35, %v4432_v10  ;;  %v4429_v18 = vsel %vm4423_vm9, %v4426_v2, %v4428_v13 }
 0xb4c   :  { %v4437_v61 = vsel %vm4423_vm9, %v4434_v33, %v4436_v3  ;;  %v14496_v56 = vmul.u32.u64.low %v4438_v8, %v4433_v31  ;;  %v14497_v24 = vmul.u32.u64.high %v4438_v8, %v4433_v31, %v14496_v56  ;;  %v4445_v0 = vmul.u32 %v4438_v8, %v4429_v18 }
 0xb4d   :  { %v14493_v38 = vmul.u32.u64.low %v4438_v8, %v4437_v61  ;;  %v14494_v42 = vmul.u32.u64.high %v4438_v8, %v4437_v61, %v14493_v38 }
 0xb4e   :  { %v4448_v32 = vadd.s32 1, %v14497_v24 }
 0xb4f   :  { %vm4447_vm10 = vc.u32 %v14494_v42, %v14496_v56  ;;  %v4446_v14 = vadd.s32 %v14496_v56, %v14494_v42 }
 0xb50   :  { %v4449_v39 = vsel %vm4447_vm10, %v4448_v32, %v14497_v24 }
 0xb51   :  { %v4450_v15 = vadd.s32 %v4449_v39, %v4445_v0 }
 0xb53   :  { %v4451_v20 = vadd.s32 536870912, %v4450_v15 }
 0xb55   :  { %v4452_v46 = vshrl.u32 %v4451_v20, 30  ;;  %v4350_v20 = vmul.f32 %v14461_v50, %v4137_v45 }
 0xb57   :  { %v4453_v22 = vshll.u32 %v4452_v46, 30  ;;  %v4476_v35 = vsub.s32 4, %v4452_v46 }
 0xb59   :  { %v4454_v55 = vsub.s32 %v4450_v15, %v4453_v22  ;;  %v4477_v58 = vsel %vm4392_vm12, %v4476_v35, %v4452_v46  ;;  %v4355_v15 = vmul.f32 %v14459_v52, %v14456_v36  ;;  %v4388_v22 = vsub.f32 0.0, %v14468_v7 }
 0xb5a   :  { %v4479_v10 = vsel %vm4391_vm13, 0, %v4477_v58 }
 0xb5b   :  { %v4456_v26 = vsub.s32 0, %v4454_v55  ;;  %v4586_v3 = vadd.s32 3, %v4479_v10  ;;  %v4483_v2 = vand.u32 3, %v4479_v10  ;;  %v14515_v46 = vsub.f32 %v4350_v20, %v4355_v15 }
 0xb5d   :  { %v8333_v37 = vmin.u32 %v4456_v26, %v4454_v55  ;;  %v4587_v8 = vand.u32 3, %v4586_v3  ;;  %vm4488_vm15 = vcmp.eq.s32.totalorder %v4483_v2, 2  ;;  %vm4485_vm2 = vcmp.eq.s32.totalorder %v4483_v2, 0 }
 0xb5e   :  { %vm4484_vm4 = vcmp.lt.s32.totalorder %v4483_v2, 2 }
 0xb5f   :  { %v4458_v30 = vclz %v8333_v37  ;;  %vm4592_vm14 = vcmp.eq.s32.totalorder %v4587_v8, 2  ;;  %vm4589_vm1 = vcmp.eq.s32.totalorder %v4587_v8, 0  ;;  %vm4588_vm3 = vcmp.lt.s32.totalorder %v4587_v8, 2 }
 0xb61   :  { %v8334_v16 = vadd.s32 4294967294, %v4458_v30 }
 0xb63   :  { %vm8335_vm11 = vcmp.lt.s32.totalorder %v8334_v16, 0 }
 0xb64   :  { %v4461_v21 = vsel %vm8335_vm11, 0, %v8334_v16 }
 0xb65   :  { %v4462_v11 = vsub.s32 32, %v4461_v21  ;;  %v4466_v40 = vsub.s32 4294967266, %v4461_v21  ;;  %v4463_v6 = vshll.u32 %v4454_v55, %v4461_v21 }
 0xb67   :  { %v4464_v44 = vshrl.u32 %v4446_v14, %v4462_v11  ;;  %v4467_v1 = vadd.s32 127, %v4466_v40 }
 0xb69   :  { %v4465_v19 = vor.u32 %v4464_v44, %v4463_v6  ;;  %v4468_v43 = vshll.u32 %v4467_v1, 23 }
 0xb6b   :  { %v4469_v62 = vor.u32 4788187, %v4468_v43  ;;  %v4472_v4 = vcvt.s32.f32 %v4465_v19 }
 0xb6d   :  { %v4470_v49 = vand.u32 2147483647, %v4469_v62 }
 0xb6f   :  { %v4473_v9 = vmul.f32 %v4472_v4, %v4470_v49 }
 0xb71   :  { %v4474_v33 = vxor.u32 2147483648, %v4473_v9 }
 0xb73   :  { %v4475_v12 = vsel %vm4392_vm12, %v4474_v33, %v4473_v9 }
 0xb74   :  { %v4478_v5 = vsel %vm4391_vm13, %v14476_v48, %v4475_v12 }
 0xb75   :  { %12592 = vcosq.f32 %v4478_v5 }
 0xb76   :  { %12594 = vsinq.f32 %v4478_v5 }
 0xb7f   :  { %v12593_v13 = vpop.eup %12592 }
 0xb80   :  { %v12595_v31 = vpop.eup %12594  ;;  %v4489_v61 = vxor.u32 2147483648, %v12593_v13 }
 0xb81   :  { %v4486_v38 = vxor.u32 2147483648, %v12595_v31 }
 0xb82   :  { %v4594_v42 = vsel %vm4592_vm14, %v4489_v61, %v12595_v31  ;;  %v4490_v34 = vsel %vm4488_vm15, %v4489_v61, %v12595_v31 }
 0xb83   :  { %v4591_v56 = vsel %vm4589_vm1, %v12593_v13, %v4486_v38  ;;  %v4487_v24 = vsel %vm4485_vm2, %v12593_v13, %v4486_v38 }
 0xb84   :  { %v4595_v18 = vsel %vm4588_vm3, %v4591_v56, %v4594_v42  ;;  %v4491_v32 = vsel %vm4484_vm4, %v4487_v24, %v4490_v34 }
 0xb85   :  { %v4596_v0 = vsel %vm4482_vm5, nan, %v4595_v18  ;;  %v4492_v39 = vsel %vm4482_vm5, nan, %v4491_v32 }
 0xb86   :  { %4603 = vrot.lane.b32.xlu1 %v4596_v0, %s12698_s17  ;;  %4598 = vrot.lane.b32.xlu0 %v4492_v39, %s12698_s17 }
 0xbf8   :  { %v14518_v48 = vpop.permute.xlu1 %4603  ;;  %v14520_v55 = vpop.permute.xlu0 %4598 }
 0xbf9   :  { %v4609_v26 = vmul.f32 %v14518_v48, %v4388_v22  ;;  %v4608_v37 = vmul.f32 %v14520_v55, %v14515_v46 }
 0xbfb   :  { %v14527_v52 = vadd.f32 %v4609_v26, %v4608_v37 }
 0xbfd   :  { %v4611_v30 = vmul.f32 -9.81, %v14527_v52 }
 0xbff   :  { %v4612_v45 = vmul.f32 0.1, %v4611_v30 }
 0xc01   :  { %4614 = vrot.lane.b32.xlu0 %v4612_v45, %s12699_s18 }
 0xc73   :  { %v4615_v50 = vpop.permute.xlu0 %4614 }
 0xc74   :  { %v14532_v16 = vadd.f32 %v4615_v50, %v14473_v54 }
 0xc76   :  { %v14535_v21 = vmul.f32 0.1, %v14532_v16 }
 0xc78   :  { %v4644_v14 = vand.u32 2139095040, %v14535_v21  ;;  %v4641_v44 = vand.u32 2147483647, %v14535_v21  ;;  %vm4643_vm13 = vcmp.lt.s32.totalorder %v14535_v21, 0 }
 0xc7a   :  { %v4645_v11 = vshrl.u32 %v4644_v14, 23  ;;  %v4648_v62 = vand.u32 8388607, %v4641_v44  ;;  %vm4642_vm14 = vcmp.le.f32.partialorder %v4641_v44, 0.7853982 }
 0xc7c   :  { %v8340_v40 = vadd.s32 4294967169, %v4645_v11  ;;  %v4649_v2 = vor.u32 8388608, %v4648_v62 }
 0xc7e   :  { %v4651_v6 = vadd.s32 1, %v8340_v40  ;;  %v4689_v20 = vshll.u32 %v4649_v2, 8 }
 0xc80   :  { %vm4652_vm6 = vcmp.gt.s32.totalorder %v4651_v6, 0 }
 0xc81   :  { %v4653_v1 = vsel %vm4652_vm6, %v4651_v6, 0  ;;  %vm4733_vm6 = vweird.f32 %v14535_v21 }
 0xc82   :  { %v4655_v19 = vand.u32 31, %v4653_v1  ;;  %v4654_v49 = vshrl.u32 %v4653_v1, 5 }
 0xc84   :  { %v4656_v43 = vsub.s32 32, %v4655_v19  ;;  %v4658_v4 = vshll.u32 %v12691_v59, %v4655_v19  ;;  %v4661_v9 = vshll.u32 %v12692_v41, %v4655_v19  ;;  %v4664_v12 = vshll.u32 %v12693_v25, %v4655_v19 }
 0xc85   :  { %v4667_v5 = vshll.u32 %v12694_v29, %v4655_v19  ;;  %v4670_v3 = vshll.u32 %v12695_v51, %v4655_v19  ;;  %vm4673_vm7 = vcmp.lt.s32.totalorder %v4654_v49, 1  ;;  %vm4676_vm8 = vcmp.lt.s32.totalorder %v4654_v49, 4 }
 0xc86   :  { %v4659_v35 = vshrl.u32 %v12692_v41, %v4656_v43  ;;  %v4662_v33 = vshrl.u32 %v12693_v25, %v4656_v43  ;;  %v4665_v58 = vshrl.u32 %v12694_v29, %v4656_v43  ;;  %v4668_v10 = vshrl.u32 %v12695_v51, %v4656_v43 }
 0xc87   :  { %v4671_v8 = vshrl.u32 %v12696_v53, %v4656_v43  ;;  %v4657_v18 = vshrl.u32 %v12691_v59, %v4656_v43  ;;  %vm4675_vm9 = vcmp.lt.s32.totalorder %v4654_v49, 3  ;;  %vm4674_vm10 = vcmp.lt.s32.totalorder %v4654_v49, 2 }
 0xc88   :  { %v4660_v13 = vor.u32 %v4659_v35, %v4658_v4  ;;  %v4663_v31 = vor.u32 %v4662_v33, %v4661_v9  ;;  %v4666_v61 = vor.u32 %v4665_v58, %v4664_v12  ;;  %v4669_v38 = vor.u32 %v4668_v10, %v4667_v5 }
 0xc89   :  { %v4672_v42 = vor.u32 %v4671_v8, %v4670_v3 }
 0xc8a   :  { %v4678_v34 = vsel %vm4676_vm8, %v4666_v61, 2102212464  ;;  %v4681_v56 = vsel %vm4673_vm7, %v4660_v13, %v4663_v31  ;;  %v4685_v24 = vsel %vm4673_vm7, %v4663_v31, %v4666_v61  ;;  %v4682_v32 = vsel %vm4676_vm8, %v4669_v38, 920167782 }
 0xc8b   :  { %v4686_v0 = vsel %vm4676_vm8, %v4672_v42, 1326507024  ;;  %v4683_v39 = vsel %vm4675_vm9, %v4666_v61, %v4682_v32  ;;  %v4677_v26 = vsel %vm4673_vm7, %v4657_v18, %v4660_v13  ;;  %v4679_v37 = vsel %vm4675_vm9, %v4663_v31, %v4678_v34 }
 0xc8c   :  { %v4687_v15 = vsel %vm4675_vm9, %v4669_v38, %v4686_v0  ;;  %v4684_v30 = vsel %vm4674_vm10, %v4681_v56, %v4683_v39  ;;  %v4680_v6 = vsel %vm4674_vm10, %v4677_v26, %v4679_v37 }
 0xc8d   :  { %v4688_v45 = vsel %vm4674_vm10, %v4685_v24, %v4687_v15  ;;  %v14555_v11 = vmul.u32.u64.low %v4689_v20, %v4684_v30  ;;  %v14556_v40 = vmul.u32.u64.high %v4689_v20, %v4684_v30, %v14555_v11  ;;  %v4696_v19 = vmul.u32 %v4689_v20, %v4680_v6 }
 0xc8e   :  { %v14552_v50 = vmul.u32.u64.low %v4689_v20, %v4688_v45  ;;  %v14553_v14 = vmul.u32.u64.high %v4689_v20, %v4688_v45, %v14552_v50 }
 0xc8f   :  { %v4699_v1 = vadd.s32 1, %v14556_v40 }
 0xc90   :  { %vm4698_vm11 = vc.u32 %v14553_v14, %v14555_v11  ;;  %v4697_v3 = vadd.s32 %v14555_v11, %v14553_v14 }
 0xc91   :  { %v4700_v43 = vsel %vm4698_vm11, %v4699_v1, %v14556_v40 }
 0xc92   :  { %v4701_v62 = vadd.s32 %v4700_v43, %v4696_v19 }
 0xc94   :  { %v4702_v49 = vadd.s32 536870912, %v4701_v62 }
 0xc96   :  { %v4703_v4 = vshrl.u32 %v4702_v49, 30 }
 0xc98   :  { %v4704_v9 = vshll.u32 %v4703_v4, 30  ;;  %v4727_v32 = vsub.s32 4, %v4703_v4 }
 0xc9a   :  { %v4705_v35 = vsub.s32 %v4701_v62, %v4704_v9  ;;  %v4728_v15 = vsel %vm4643_vm13, %v4727_v32, %v4703_v4  ;;  %v4606_v9 = vmul.f32 %v14518_v48, %v14515_v46 }
 0xc9b   :  { %v4730_v26 = vsel %vm4642_vm14, 0, %v4728_v15 }
 0xc9c   :  { %v4707_v33 = vsub.s32 0, %v4705_v35  ;;  %v4837_v37 = vadd.s32 3, %v4730_v26  ;;  %v4734_v45 = vand.u32 3, %v4730_v26 }
 0xc9e   :  { %v8341_v12 = vmin.u32 %v4707_v33, %v4705_v35  ;;  %v4838_v30 = vand.u32 3, %v4837_v37  ;;  %vm4739_vm1 = vcmp.eq.s32.totalorder %v4734_v45, 2  ;;  %vm4736_vm3 = vcmp.eq.s32.totalorder %v4734_v45, 0 }
 0xc9f   :  { %vm4735_vm5 = vcmp.lt.s32.totalorder %v4734_v45, 2 }
 0xca0   :  { %v4709_v58 = vclz %v8341_v12  ;;  %vm4843_vm15 = vcmp.eq.s32.totalorder %v4838_v30, 2  ;;  %vm4840_vm2 = vcmp.eq.s32.totalorder %v4838_v30, 0  ;;  %vm4839_vm4 = vcmp.lt.s32.totalorder %v4838_v30, 2 }
 0xca1   :  { %v4639_v12 = vsub.f32 0.0, %v14527_v52 }
 0xca2   :  { %v8342_v5 = vadd.s32 4294967294, %v4709_v58 }
 0xca4   :  { %vm8343_vm12 = vcmp.lt.s32.totalorder %v8342_v5, 0 }
 0xca5   :  { %v4712_v10 = vsel %vm8343_vm12, 0, %v8342_v5 }
 0xca6   :  { %v4713_v8 = vsub.s32 32, %v4712_v10  ;;  %v4717_v2 = vsub.s32 4294967266, %v4712_v10  ;;  %v4714_v13 = vshll.u32 %v4705_v35, %v4712_v10  ;;  %v4601_v35 = vmul.f32 %v14520_v55, %v4388_v22 }
 0xca8   :  { %v4715_v31 = vshrl.u32 %v4697_v3, %v4713_v8  ;;  %v4718_v61 = vadd.s32 127, %v4717_v2  ;;  %v14574_v33 = vsub.f32 %v4601_v35, %v4606_v9 }
 0xcaa   :  { %v4716_v38 = vor.u32 %v4715_v31, %v4714_v13  ;;  %v4719_v42 = vshll.u32 %v4718_v61, 23 }
 0xcac   :  { %v4720_v34 = vor.u32 4788187, %v4719_v42  ;;  %v4723_v24 = vcvt.s32.f32 %v4716_v38 }
 0xcae   :  { %v4721_v56 = vand.u32 2147483647, %v4720_v34 }
 0xcb0   :  { %v4724_v18 = vmul.f32 %v4723_v24, %v4721_v56 }
 0xcb2   :  { %v4725_v0 = vxor.u32 2147483648, %v4724_v18 }
 0xcb4   :  { %v4726_v39 = vsel %vm4643_vm13, %v4725_v0, %v4724_v18 }
 0xcb5   :  { %v4729_v20 = vsel %vm4642_vm14, %v14535_v21, %v4726_v39 }
 0xcb6   :  { %12596 = vcosq.f32 %v4729_v20 }
 0xcb7   :  { %12598 = vsinq.f32 %v4729_v20 }
 0xcc0   :  { %v12597_v50 = vpop.eup %12596 }
 0xcc1   :  { %v12599_v14 = vpop.eup %12598  ;;  %v4740_v11 = vxor.u32 2147483648, %v12597_v50 }
 0xcc2   :  { %v4737_v40 = vxor.u32 2147483648, %v12599_v14 }
 0xcc3   :  { %v4845_v6 = vsel %vm4843_vm15, %v4740_v11, %v12599_v14  ;;  %v4741_v44 = vsel %vm4739_vm1, %v4740_v11, %v12599_v14 }
 0xcc4   :  { %v4842_v1 = vsel %vm4840_vm2, %v12597_v50, %v4737_v40  ;;  %v4738_v19 = vsel %vm4736_vm3, %v12597_v50, %v4737_v40 }
 0xcc5   :  { %v4846_v43 = vsel %vm4839_vm4, %v4842_v1, %v4845_v6  ;;  %v4742_v62 = vsel %vm4735_vm5, %v4738_v19, %v4741_v44 }
 0xcc6   :  { %v4847_v49 = vsel %vm4733_vm6, nan, %v4846_v43  ;;  %v4743_v4 = vsel %vm4733_vm6, nan, %v4742_v62 }
 0xcc7   :  { %4854 = vrot.lane.b32.xlu0 %v4847_v49, %s12698_s17  ;;  %4849 = vrot.lane.b32.xlu1 %v4743_v4, %s12698_s17 }
 0xd39   :  { %v14577_v21 = vpop.permute.xlu0 %4854  ;;  %v14579_v58 = vpop.permute.xlu1 %4849 }
 0xd3a   :  { %v4860_v5 = vmul.f32 %v14577_v21, %v4639_v12  ;;  %v4859_v10 = vmul.f32 %v14579_v58, %v14574_v33 }
 0xd3c   :  { %v14586_v48 = vadd.f32 %v4860_v5, %v4859_v10 }
 0xd3e   :  { %v4862_v3 = vmul.f32 -9.81, %v14586_v48 }
 0xd40   :  { %v4863_v22 = vmul.f32 0.1, %v4862_v3 }
 0xd42   :  { %4865 = vrot.lane.b32.xlu1 %v4863_v22, %s12699_s18 }
 0xdb4   :  { %v4866_v55 = vpop.permute.xlu1 %4865 }
 0xdb5   :  { %v14591_v8 = vadd.f32 %v4866_v55, %v14532_v16 }
 0xdb7   :  { %v14594_v2 = vmul.f32 0.1, %v14591_v8 }
 0xdb9   :  { %v4895_v13 = vand.u32 2139095040, %v14594_v2  ;;  %v4892_v42 = vand.u32 2147483647, %v14594_v2  ;;  %vm4894_vm14 = vcmp.lt.s32.totalorder %v14594_v2, 0 }
 0xdbb   :  { %v4896_v31 = vshrl.u32 %v4895_v13, 23  ;;  %v4899_v18 = vand.u32 8388607, %v4892_v42  ;;  %vm4893_vm15 = vcmp.le.f32.partialorder %v4892_v42, 0.7853982 }
 0xdbd   :  { %v8348_v61 = vadd.s32 4294967169, %v4896_v31  ;;  %v4900_v11 = vor.u32 8388608, %v4899_v18 }
 0xdbf   :  { %v4902_v38 = vadd.s32 1, %v8348_v61  ;;  %v4940_v3 = vshll.u32 %v4900_v11, 8 }
 0xdc1   :  { %vm4903_vm7 = vcmp.gt.s32.totalorder %v4902_v38, 0 }
 0xdc2   :  { %v4904_v34 = vsel %vm4903_vm7, %v4902_v38, 0  ;;  %vm4984_vm7 = vweird.f32 %v14594_v2 }
 0xdc3   :  { %v4906_v56 = vand.u32 31, %v4904_v34  ;;  %v4905_v32 = vshrl.u32 %v4904_v34, 5 }
 0xdc5   :  { %v4907_v24 = vsub.s32 32, %v4906_v56  ;;  %v4909_v0 = vshll.u32 %v12691_v59, %v4906_v56  ;;  %v4912_v39 = vshll.u32 %v12692_v41, %v4906_v56  ;;  %v4915_v26 = vshll.u32 %v12693_v25, %v4906_v56 }
 0xdc6   :  { %v4918_v30 = vshll.u32 %v12694_v29, %v4906_v56  ;;  %v4921_v50 = vshll.u32 %v12695_v51, %v4906_v56  ;;  %vm4924_vm8 = vcmp.lt.s32.totalorder %v4905_v32, 1  ;;  %vm4927_vm9 = vcmp.lt.s32.totalorder %v4905_v32, 4 }
 0xdc7   :  { %v4910_v15 = vshrl.u32 %v12692_v41, %v4907_v24  ;;  %v4913_v20 = vshrl.u32 %v12693_v25, %v4907_v24  ;;  %v4916_v37 = vshrl.u32 %v12694_v29, %v4907_v24  ;;  %v4919_v45 = vshrl.u32 %v12695_v51, %v4907_v24 }
 0xdc8   :  { %v4922_v14 = vshrl.u32 %v12696_v53, %v4907_v24  ;;  %v4908_v4 = vshrl.u32 %v12691_v59, %v4907_v24  ;;  %vm4926_vm10 = vcmp.lt.s32.totalorder %v4905_v32, 3  ;;  %vm4925_vm11 = vcmp.lt.s32.totalorder %v4905_v32, 2 }
 0xdc9   :  { %v4911_v40 = vor.u32 %v4910_v15, %v4909_v0  ;;  %v4914_v6 = vor.u32 %v4913_v20, %v4912_v39  ;;  %v4917_v44 = vor.u32 %v4916_v37, %v4915_v26  ;;  %v4920_v1 = vor.u32 %v4919_v45, %v4918_v30 }
 0xdca   :  { %v4923_v19 = vor.u32 %v4922_v14, %v4921_v50 }
 0xdcb   :  { %v4929_v43 = vsel %vm4927_vm9, %v4917_v44, 2102212464  ;;  %v4932_v62 = vsel %vm4924_vm8, %v4911_v40, %v4914_v6  ;;  %v4936_v49 = vsel %vm4924_vm8, %v4914_v6, %v4917_v44  ;;  %v4933_v9 = vsel %vm4927_vm9, %v4920_v1, 920167782 }
 0xdcc   :  { %v4937_v35 = vsel %vm4927_vm9, %v4923_v19, 1326507024  ;;  %v4934_v5 = vsel %vm4926_vm10, %v4917_v44, %v4933_v9  ;;  %v4928_v22 = vsel %vm4924_vm8, %v4908_v4, %v4911_v40  ;;  %v4930_v55 = vsel %vm4926_vm10, %v4914_v6, %v4929_v43 }
 0xdcd   :  { %v4938_v10 = vsel %vm4926_vm10, %v4920_v1, %v4937_v35  ;;  %v4935_v13 = vsel %vm4925_vm11, %v4932_v62, %v4934_v5  ;;  %v4931_v18 = vsel %vm4925_vm11, %v4928_v22, %v4930_v55 }
 0xdce   :  { %v4939_v31 = vsel %vm4925_vm11, %v4936_v49, %v4938_v10  ;;  %v14614_v34 = vmul.u32.u64.low %v4940_v3, %v4935_v13  ;;  %v14615_v56 = vmul.u32.u64.high %v4940_v3, %v4935_v13, %v14614_v34  ;;  %v4947_v0 = vmul.u32 %v4940_v3, %v4931_v18 }
 0xdcf   :  { %v14611_v61 = vmul.u32.u64.low %v4940_v3, %v4939_v31  ;;  %v14612_v38 = vmul.u32.u64.high %v4940_v3, %v4939_v31, %v14611_v61 }
 0xdd0   :  { %v4950_v24 = vadd.s32 1, %v14615_v56 }
 0xdd1   :  { %vm4949_vm12 = vc.u32 %v14612_v38, %v14614_v34  ;;  %v4948_v40 = vadd.s32 %v14614_v34, %v14612_v38 }
 0xdd2   :  { %v4951_v32 = vsel %vm4949_vm12, %v4950_v24, %v14615_v56 }
 0xdd3   :  { %v4952_v39 = vadd.s32 %v4951_v32, %v4947_v0 }
 0xdd5   :  { %v4953_v15 = vadd.s32 536870912, %v4952_v39 }
 0xdd7   :  { %v4954_v20 = vshrl.u32 %v4953_v15, 30 }
 0xdd9   :  { %v4955_v26 = vshll.u32 %v4954_v20, 30  ;;  %v4978_v10 = vsub.s32 4, %v4954_v20 }
 0xddb   :  { %v4956_v37 = vsub.s32 %v4952_v39, %v4955_v26  ;;  %v4979_v55 = vsel %vm4894_vm14, %v4978_v10, %v4954_v20 }
 0xddc   :  { %v4981_v31 = vsel %vm4893_vm15, 0, %v4979_v55 }
 0xddd   :  { %v4958_v30 = vsub.s32 0, %v4956_v37  ;;  %v5088_v61 = vadd.s32 3, %v4981_v31  ;;  %v4985_v34 = vand.u32 3, %v4981_v31 }
 0xddf   :  { %v8349_v45 = vmin.u32 %v4958_v30, %v4956_v37  ;;  %v5089_v38 = vand.u32 3, %v5088_v61  ;;  %vm4990_vm2 = vcmp.eq.s32.totalorder %v4985_v34, 2  ;;  %vm4987_vm4 = vcmp.eq.s32.totalorder %v4985_v34, 0 }
 0xde0   :  { %vm4986_vm6 = vcmp.lt.s32.totalorder %v4985_v34, 2 }
 0xde1   :  { %v4960_v50 = vclz %v8349_v45  ;;  %vm5094_vm1 = vcmp.eq.s32.totalorder %v5089_v38, 2  ;;  %vm5091_vm3 = vcmp.eq.s32.totalorder %v5089_v38, 0  ;;  %vm5090_vm5 = vcmp.lt.s32.totalorder %v5089_v38, 2 }
 0xde2   :  { %v4857_v45 = vmul.f32 %v14577_v21, %v14574_v33 }
 0xde3   :  { %v8350_v14 = vadd.s32 4294967294, %v4960_v50  ;;  %v4852_v50 = vmul.f32 %v14579_v58, %v4639_v12 }
 0xde5   :  { %vm8351_vm13 = vcmp.lt.s32.totalorder %v8350_v14, 0 }
 0xde6   :  { %v4963_v11 = vsel %vm8351_vm13, 0, %v8350_v14  ;;  %v14633_v14 = vsub.f32 %v4852_v50, %v4857_v45 }
 0xde7   :  { %v4964_v6 = vsub.s32 32, %v4963_v11  ;;  %v4968_v44 = vsub.s32 4294967266, %v4963_v11  ;;  %v4965_v1 = vshll.u32 %v4956_v37, %v4963_v11  ;;  %v4890_v11 = vsub.f32 0.0, %v14586_v48 }
 0xde9   :  { %v4966_v19 = vshrl.u32 %v4948_v40, %v4964_v6  ;;  %v4969_v43 = vadd.s32 127, %v4968_v44 }
 0xdeb   :  { %v4967_v62 = vor.u32 %v4966_v19, %v4965_v1  ;;  %v4970_v49 = vshll.u32 %v4969_v43, 23 }
 0xded   :  { %v4971_v4 = vor.u32 4788187, %v4970_v49  ;;  %v4974_v35 = vcvt.s32.f32 %v4967_v62 }
 0xdef   :  { %v4972_v9 = vand.u32 2147483647, %v4971_v4 }
 0xdf1   :  { %v4975_v5 = vmul.f32 %v4974_v35, %v4972_v9 }
 0xdf3   :  { %v4976_v3 = vxor.u32 2147483648, %v4975_v5 }
 0xdf5   :  { %v4977_v22 = vsel %vm4894_vm14, %v4976_v3, %v4975_v5 }
 0xdf6   :  { %v4980_v13 = vsel %vm4893_vm15, %v14594_v2, %v4977_v22 }
 0xdf7   :  { %12600 = vcosq.f32 %v4980_v13 }
 0xdf8   :  { %12602 = vsinq.f32 %v4980_v13 }
 0xe01   :  { %v12601_v56 = vpop.eup %12600 }
 0xe02   :  { %v12603_v18 = vpop.eup %12602  ;;  %v4991_v24 = vxor.u32 2147483648, %v12601_v56 }
 0xe03   :  { %v4988_v0 = vxor.u32 2147483648, %v12603_v18 }
 0xe04   :  { %v5096_v32 = vsel %vm5094_vm1, %v4991_v24, %v12603_v18  ;;  %v4992_v42 = vsel %vm4990_vm2, %v4991_v24, %v12603_v18 }
 0xe05   :  { %v5093_v39 = vsel %vm5091_vm3, %v12601_v56, %v4988_v0  ;;  %v4989_v15 = vsel %vm4987_vm4, %v12601_v56, %v4988_v0 }
 0xe06   :  { %v5097_v20 = vsel %vm5090_vm5, %v5093_v39, %v5096_v32  ;;  %v4993_v26 = vsel %vm4986_vm6, %v4989_v15, %v4992_v42 }
 0xe07   :  { %v5098_v37 = vsel %vm4984_vm7, nan, %v5097_v20  ;;  %v4994_v30 = vsel %vm4984_vm7, nan, %v4993_v26 }
 0xe08   :  { %5105 = vrot.lane.b32.xlu1 %v5098_v37, %s12698_s17  ;;  %5100 = vrot.lane.b32.xlu0 %v4994_v30, %s12698_s17 }
 0xe7a   :  { %v14636_v2 = vpop.permute.xlu1 %5105  ;;  %v14638_v40 = vpop.permute.xlu0 %5100 }
 0xe7b   :  { %v5111_v6 = vmul.f32 %v14636_v2, %v4890_v11  ;;  %v5110_v44 = vmul.f32 %v14638_v40, %v14633_v14 }
 0xe7d   :  { %v14645_v21 = vadd.f32 %v5111_v6, %v5110_v44 }
 0xe7f   :  { %v5113_v1 = vmul.f32 -9.81, %v14645_v21 }
 0xe81   :  { %v5114_v12 = vmul.f32 0.1, %v5113_v1 }
 0xe83   :  { %5116 = vrot.lane.b32.xlu0 %v5114_v12, %s12699_s18 }
 0xef5   :  { %v5117_v58 = vpop.permute.xlu0 %5116 }
 0xef6   :  { %v14650_v19 = vadd.f32 %v5117_v58, %v14591_v8 }
 0xef8   :  { %v14653_v43 = vmul.f32 0.1, %v14650_v19 }
 0xefa   :  { %v5146_v62 = vand.u32 2139095040, %v14653_v43  ;;  %v5143_v35 = vand.u32 2147483647, %v14653_v43  ;;  %vm5145_vm15 = vcmp.lt.s32.totalorder %v14653_v43, 0 }
 0xefc   :  { %v5147_v49 = vshrl.u32 %v5146_v62, 23  ;;  %v5150_v22 = vand.u32 8388607, %v5143_v35  ;;  %vm5144_vm1 = vcmp.le.f32.partialorder %v5143_v35, 0.7853982 }
 0xefe   :  { %v8356_v4 = vadd.s32 4294967169, %v5147_v49  ;;  %v5151_v42 = vor.u32 8388608, %v5150_v22 }
 0xf00   :  { %v5153_v9 = vadd.s32 1, %v8356_v4  ;;  %v5191_v62 = vshll.u32 %v5151_v42, 8 }
 0xf02   :  { %vm5154_vm8 = vcmp.gt.s32.totalorder %v5153_v9, 0 }
 0xf03   :  { %v5155_v5 = vsel %vm5154_vm8, %v5153_v9, 0  ;;  %vm5235_vm8 = vweird.f32 %v14653_v43 }
 0xf04   :  { %v5157_v10 = vand.u32 31, %v5155_v5  ;;  %v5156_v55 = vshrl.u32 %v5155_v5, 5 }
 0xf06   :  { %v5158_v3 = vsub.s32 32, %v5157_v10  ;;  %v5160_v13 = vshll.u32 %v12691_v59, %v5157_v10  ;;  %v5163_v31 = vshll.u32 %v12692_v41, %v5157_v10  ;;  %v5166_v34 = vshll.u32 %v12693_v25, %v5157_v10 }
 0xf07   :  { %v5169_v18 = vshll.u32 %v12694_v29, %v5157_v10  ;;  %v5172_v0 = vshll.u32 %v12695_v51, %v5157_v10  ;;  %vm5175_vm9 = vcmp.lt.s32.totalorder %v5156_v55, 1  ;;  %vm5178_vm10 = vcmp.lt.s32.totalorder %v5156_v55, 4 }
 0xf08   :  { %v5161_v61 = vshrl.u32 %v12692_v41, %v5158_v3  ;;  %v5164_v38 = vshrl.u32 %v12693_v25, %v5158_v3  ;;  %v5167_v56 = vshrl.u32 %v12694_v29, %v5158_v3  ;;  %v5170_v24 = vshrl.u32 %v12695_v51, %v5158_v3 }
 0xf09   :  { %v5173_v32 = vshrl.u32 %v12696_v53, %v5158_v3  ;;  %v5159_v6 = vshrl.u32 %v12691_v59, %v5158_v3  ;;  %vm5177_vm11 = vcmp.lt.s32.totalorder %v5156_v55, 3  ;;  %vm5176_vm12 = vcmp.lt.s32.totalorder %v5156_v55, 2 }
 0xf0a   :  { %v5162_v39 = vor.u32 %v5161_v61, %v5160_v13  ;;  %v5165_v15 = vor.u32 %v5164_v38, %v5163_v31  ;;  %v5168_v20 = vor.u32 %v5167_v56, %v5166_v34  ;;  %v5171_v26 = vor.u32 %v5170_v24, %v5169_v18 }
 0xf0b   :  { %v5174_v37 = vor.u32 %v5173_v32, %v5172_v0 }
 0xf0c   :  { %v5180_v30 = vsel %vm5178_vm10, %v5168_v20, 2102212464  ;;  %v5183_v45 = vsel %vm5175_vm9, %v5162_v39, %v5165_v15  ;;  %v5187_v50 = vsel %vm5175_vm9, %v5165_v15, %v5168_v20  ;;  %v5184_v44 = vsel %vm5178_vm10, %v5171_v26, 920167782 }
 0xf0d   :  { %v5188_v1 = vsel %vm5178_vm10, %v5174_v37, 1326507024  ;;  %v5185_v12 = vsel %vm5177_vm11, %v5168_v20, %v5184_v44  ;;  %v5179_v49 = vsel %vm5175_vm9, %v5159_v6, %v5162_v39  ;;  %v5181_v4 = vsel %vm5177_vm11, %v5165_v15, %v5180_v30 }
 0xf0e   :  { %v5189_v58 = vsel %vm5177_vm11, %v5171_v26, %v5188_v1  ;;  %v5186_v9 = vsel %vm5176_vm12, %v5183_v45, %v5185_v12  ;;  %v5182_v61 = vsel %vm5176_vm12, %v5179_v49, %v5181_v4 }
 0xf0f   :  { %v5190_v5 = vsel %vm5176_vm12, %v5187_v50, %v5189_v58  ;;  %v14673_v13 = vmul.u32.u64.low %v5191_v62, %v5186_v9  ;;  %v14674_v31 = vmul.u32.u64.high %v5191_v62, %v5186_v9, %v14673_v13  ;;  %v5198_v38 = vmul.u32 %v5191_v62, %v5182_v61 }
 0xf10   :  { %v14670_v10 = vmul.u32.u64.low %v5191_v62, %v5190_v5  ;;  %v14671_v22 = vmul.u32.u64.high %v5191_v62, %v5190_v5, %v14670_v10 }
 0xf11   :  { %v5201_v3 = vadd.s32 1, %v14674_v31 }
 0xf12   :  { %vm5200_vm13 = vc.u32 %v14671_v22, %v14673_v13  ;;  %v5199_v26 = vadd.s32 %v14673_v13, %v14671_v22 }
 0xf13   :  { %v5202_v55 = vsel %vm5200_vm13, %v5201_v3, %v14674_v31 }
 0xf14   :  { %v5203_v34 = vadd.s32 %v5202_v55, %v5198_v38 }
 0xf16   :  { %v5204_v56 = vadd.s32 536870912, %v5203_v34 }
 0xf18   :  { %v5205_v18 = vshrl.u32 %v5204_v56, 30 }
 0xf1a   :  { %v5206_v24 = vshll.u32 %v5205_v18, 30  ;;  %v5229_v4 = vsub.s32 4, %v5205_v18 }
 0xf1c   :  { %v5207_v0 = vsub.s32 %v5203_v34, %v5206_v24  ;;  %v5230_v10 = vsel %vm5145_vm15, %v5229_v4, %v5205_v18 }
 0xf1d   :  { %v5232_v13 = vsel %vm5144_vm1, 0, %v5230_v10 }
 0xf1e   :  { %v5209_v32 = vsub.s32 0, %v5207_v0  ;;  %v5339_v31 = vadd.s32 3, %v5232_v13  ;;  %v5236_v3 = vand.u32 3, %v5232_v13 }
 0xf20   :  { %v8357_v42 = vmin.u32 %v5209_v32, %v5207_v0  ;;  %v5340_v61 = vand.u32 3, %v5339_v31  ;;  %vm5241_vm3 = vcmp.eq.s32.totalorder %v5236_v3, 2  ;;  %vm5238_vm5 = vcmp.eq.s32.totalorder %v5236_v3, 0 }
 0xf21   :  { %vm5237_vm7 = vcmp.lt.s32.totalorder %v5236_v3, 2 }
 0xf22   :  { %v5211_v39 = vclz %v8357_v42  ;;  %vm5345_vm2 = vcmp.eq.s32.totalorder %v5340_v61, 2  ;;  %vm5342_vm4 = vcmp.eq.s32.totalorder %v5340_v61, 0  ;;  %vm5341_vm6 = vcmp.lt.s32.totalorder %v5340_v61, 2 }
 0xf24   :  { %v8358_v15 = vadd.s32 4294967294, %v5211_v39 }
 0xf26   :  { %vm8359_vm14 = vcmp.lt.s32.totalorder %v8358_v15, 0 }
 0xf27   :  { %v5214_v20 = vsel %vm8359_vm14, 0, %v8358_v15 }
 0xf28   :  { %v5215_v37 = vsub.s32 32, %v5214_v20  ;;  %v5219_v30 = vsub.s32 4294967266, %v5214_v20  ;;  %v5216_v45 = vshll.u32 %v5207_v0, %v5214_v20  ;;  %v5108_v20 = vmul.f32 %v14636_v2, %v14633_v14 }
 0xf2a   :  { %v5217_v50 = vshrl.u32 %v5199_v26, %v5215_v37  ;;  %v5220_v6 = vadd.s32 127, %v5219_v30  ;;  %v5103_v26 = vmul.f32 %v14638_v40, %v4890_v11  ;;  %v5141_v30 = vsub.f32 0.0, %v14645_v21 }
 0xf2b   :  { %v12700_v40 = vmov 93  }
 0xf2c   :  { %v5218_v44 = vor.u32 %v5217_v50, %v5216_v45  ;;  %v5221_v1 = vshll.u32 %v5220_v6, 23  ;;  %v14692_v37 = vsub.f32 %v5103_v26, %v5108_v20  ;;  %12566 = vset.pattern.permute.xlu1 %v12700_v40 }
 0xf2e   :  { %v5222_v12 = vor.u32 4788187, %v5221_v1  ;;  %v5225_v62 = vcvt.s32.f32 %v5218_v44  ;;  %v12701_v1 = vmov 95  }
 0xf2f   :  { %12571 = vset.pattern.permute.xlu0 %v12701_v1 }
 0xf30   :  { %v5223_v58 = vand.u32 2147483647, %v5222_v12 }
 0xf32   :  { %v5226_v49 = vmul.f32 %v5225_v62, %v5223_v58 }
 0xf34   :  { %v5227_v9 = vxor.u32 2147483648, %v5226_v49 }
 0xf36   :  { %v5228_v5 = vsel %vm5145_vm15, %v5227_v9, %v5226_v49 }
 0xf37   :  { %v5231_v22 = vsel %vm5144_vm1, %v14653_v43, %v5228_v5 }
 0xf38   :  { %12604 = vcosq.f32 %v5231_v22 }
 0xf39   :  { %12606 = vsinq.f32 %v5231_v22 }
 0xf42   :  { %v12605_v38 = vpop.eup %12604 }
 0xf43   :  { %v12607_v55 = vpop.eup %12606  ;;  %v5242_v34 = vxor.u32 2147483648, %v12605_v38 }
 0xf44   :  { %v5239_v56 = vxor.u32 2147483648, %v12607_v55 }
 0xf45   :  { %v5347_v24 = vsel %vm5345_vm2, %v5242_v34, %v12607_v55  ;;  %v5243_v35 = vsel %vm5241_vm3, %v5242_v34, %v12607_v55 }
 0xf46   :  { %v5344_v18 = vsel %vm5342_vm4, %v12605_v38, %v5239_v56  ;;  %v5240_v0 = vsel %vm5238_vm5, %v12605_v38, %v5239_v56 }
 0xf47   :  { %v5348_v32 = vsel %vm5341_vm6, %v5344_v18, %v5347_v24  ;;  %v5244_v42 = vsel %vm5237_vm7, %v5240_v0, %v5243_v35 }
 0xf48   :  { %v5349_v39 = vsel %vm5235_vm8, nan, %v5348_v32  ;;  %v5245_v15 = vsel %vm5235_vm8, nan, %v5244_v42 }
 0xf49   :  { %5356 = vrot.lane.b32.xlu0 %v5349_v39, %s12698_s17  ;;  %5351 = vrot.lane.b32.xlu1 %v5245_v15, %s12698_s17 }
 0xfbb   :  { %v14695_v43 = vpop.permute.xlu0 %5356  ;;  %v14697_v45 = vpop.permute.xlu1 %5351 }
 0xfbc   :  { %v5362_v50 = vmul.f32 %v14695_v43, %v5141_v30  ;;  %v5361_v6 = vmul.f32 %v14697_v45, %v14692_v37 }
 0xfbe   :  { %v14704_v2 = vadd.f32 %v5362_v50, %v5361_v6 }
 0xfc0   :  { %v5364_v44 = vmul.f32 -9.81, %v14704_v2 }
 0xfc2   :  { %v5365_v11 = vmul.f32 0.1, %v5364_v44 }
 0xfc4   :  { %5367 = vrot.lane.b32.xlu1 %v5365_v11, %s12699_s18 }
0x1036   :  { %v5368_v12 = vpop.permute.xlu1 %5367 }
0x1037   :  { %v14711_v58 = vadd.f32 %v5368_v12, %v14650_v19 }
0x1039   :  { %v14714_v62 = vmul.f32 0.1, %v14711_v58 }
0x103b   :  { %v5397_v49 = vand.u32 2139095040, %v14714_v62  ;;  %v5394_v10 = vand.u32 2147483647, %v14714_v62  ;;  %vm5396_vm1 = vcmp.lt.s32.totalorder %v14714_v62, 0 }
0x103d   :  { %v5398_v4 = vshrl.u32 %v5397_v49, 23  ;;  %v5401_v61 = vand.u32 8388607, %v5394_v10  ;;  %vm5395_vm2 = vcmp.le.f32.partialorder %v5394_v10, 0.7853982 }
0x103f   :  { %v8364_v9 = vadd.s32 4294967169, %v5398_v4  ;;  %v5402_v39 = vor.u32 8388608, %v5401_v61 }
0x1041   :  { %v5404_v5 = vadd.s32 1, %v8364_v9 }
0x1043   :  { %vm5405_vm9 = vcmp.gt.s32.totalorder %v5404_v5, 0 }
0x1044   :  { %v5406_v22 = vsel %vm5405_vm9, %v5404_v5, 0  ;;  %vm5486_vm9 = vweird.f32 %v14714_v62 }
0x1045   :  { %v5408_v13 = vand.u32 31, %v5406_v22  ;;  %v5407_v3 = vshrl.u32 %v5406_v22, 5 }
0x1047   :  { %v5409_v31 = vsub.s32 32, %v5408_v13  ;;  %v5411_v38 = vshll.u32 %v12691_v59, %v5408_v13  ;;  %v5414_v55 = vshll.u32 %v12692_v41, %v5408_v13  ;;  %v5417_v24 = vshll.u32 %v12693_v25, %v5408_v13 }
0x1048   :  { %v5420_v18 = vshll.u32 %v12694_v29, %v5408_v13  ;;  %v5423_v32 = vshll.u32 %v12695_v51, %v5408_v13  ;;  %vm5426_vm10 = vcmp.lt.s32.totalorder %v5407_v3, 1  ;;  %vm5429_vm11 = vcmp.lt.s32.totalorder %v5407_v3, 4 }
0x1049   :  { %v5412_v34 = vshrl.u32 %v12692_v41, %v5409_v31  ;;  %v5415_v56 = vshrl.u32 %v12693_v25, %v5409_v31  ;;  %v5418_v35 = vshrl.u32 %v12694_v29, %v5409_v31  ;;  %v5421_v0 = vshrl.u32 %v12695_v51, %v5409_v31 }
0x104a   :  { %v5424_v42 = vshrl.u32 %v12696_v53, %v5409_v31  ;;  %v5410_v11 = vshrl.u32 %v12691_v59, %v5409_v31  ;;  %vm5428_vm12 = vcmp.lt.s32.totalorder %v5407_v3, 3  ;;  %vm5427_vm13 = vcmp.lt.s32.totalorder %v5407_v3, 2 }
0x104b   :  { %v5413_v15 = vor.u32 %v5412_v34, %v5411_v38  ;;  %v5416_v20 = vor.u32 %v5415_v56, %v5414_v55  ;;  %v5419_v26 = vor.u32 %v5418_v35, %v5417_v24  ;;  %v5422_v50 = vor.u32 %v5421_v0, %v5420_v18 }
0x104c   :  { %v5425_v41 = vor.u32 %v5424_v42, %v5423_v32  ;;  %v5442_v53 = vshll.u32 %v5402_v39, 8 }
0x104d   :  { %v5431_v6 = vsel %vm5429_vm11, %v5419_v26, 2102212464  ;;  %v5434_v25 = vsel %vm5426_vm10, %v5413_v15, %v5416_v20  ;;  %v5438_v44 = vsel %vm5426_vm10, %v5416_v20, %v5419_v26  ;;  %v5435_v29 = vsel %vm5429_vm11, %v5422_v50, 920167782 }
0x104e   :  { %v5439_v12 = vsel %vm5429_vm11, %v5425_v41, 1326507024  ;;  %v5436_v51 = vsel %vm5428_vm12, %v5419_v26, %v5435_v29  ;;  %v5430_v4 = vsel %vm5426_vm10, %v5410_v11, %v5413_v15  ;;  %v5432_v9 = vsel %vm5428_vm12, %v5416_v20, %v5431_v6 }
0x104f   :  { %v5440_v49 = vsel %vm5428_vm12, %v5422_v50, %v5439_v12  ;;  %v5437_v5 = vsel %vm5427_vm13, %v5434_v25, %v5436_v51  ;;  %v5433_v34 = vsel %vm5427_vm13, %v5430_v4, %v5432_v9 }
0x1050   :  { %v5441_v22 = vsel %vm5427_vm13, %v5438_v44, %v5440_v49  ;;  %v14734_v38 = vmul.u32.u64.low %v5442_v53, %v5437_v5  ;;  %v14735_v55 = vmul.u32.u64.high %v5442_v53, %v5437_v5, %v14734_v38  ;;  %v5449_v31 = vmul.u32 %v5442_v53, %v5433_v34 }
0x1051   :  { %v14731_v13 = vmul.u32.u64.low %v5442_v53, %v5441_v22  ;;  %v14732_v61 = vmul.u32.u64.high %v5442_v53, %v5441_v22, %v14731_v13 }
0x1052   :  { %v5452_v59 = vadd.s32 1, %v14735_v55 }
0x1053   :  { %vm5451_vm14 = vc.u32 %v14732_v61, %v14734_v38  ;;  %v5450_v26 = vadd.s32 %v14734_v38, %v14732_v61 }
0x1054   :  { %v5453_v3 = vsel %vm5451_vm14, %v5452_v59, %v14735_v55 }
0x1055   :  { %v5454_v56 = vadd.s32 %v5453_v3, %v5449_v31 }
0x1057   :  { %v5455_v24 = vadd.s32 536870912, %v5454_v56 }
0x1059   :  { %v5456_v35 = vshrl.u32 %v5455_v24, 30 }
0x105b   :  { %v5457_v18 = vshll.u32 %v5456_v35, 30  ;;  %v5480_v4 = vsub.s32 4, %v5456_v35 }
0x105d   :  { %v5458_v0 = vsub.s32 %v5454_v56, %v5457_v18  ;;  %v5481_v22 = vsel %vm5396_vm1, %v5480_v4, %v5456_v35 }
0x105e   :  { %v5483_v61 = vsel %vm5395_vm2, 0, %v5481_v22 }
0x105f   :  { %v5460_v32 = vsub.s32 0, %v5458_v0  ;;  %v5590_v38 = vadd.s32 3, %v5483_v61  ;;  %v5487_v34 = vand.u32 3, %v5483_v61 }
0x1061   :  { %v8365_v42 = vmin.u32 %v5460_v32, %v5458_v0  ;;  %v5591_v55 = vand.u32 3, %v5590_v38  ;;  %vm5492_vm4 = vcmp.eq.s32.totalorder %v5487_v34, 2  ;;  %vm5489_vm6 = vcmp.eq.s32.totalorder %v5487_v34, 0 }
0x1062   :  { %vm5488_vm8 = vcmp.lt.s32.totalorder %v5487_v34, 2 }
0x1063   :  { %v5462_v39 = vclz %v8365_v42  ;;  %vm5596_vm3 = vcmp.eq.s32.totalorder %v5591_v55, 2  ;;  %vm5593_vm5 = vcmp.eq.s32.totalorder %v5591_v55, 0  ;;  %vm5592_vm7 = vcmp.lt.s32.totalorder %v5591_v55, 2 }
0x1065   :  { %v8366_v15 = vadd.s32 4294967294, %v5462_v39 }
0x1067   :  { %vm8367_vm15 = vcmp.lt.s32.totalorder %v8366_v15, 0 }
0x1068   :  { %v5465_v20 = vsel %vm8367_vm15, 0, %v8366_v15 }
0x1069   :  { %v5466_v50 = vsub.s32 32, %v5465_v20  ;;  %v5470_v41 = vsub.s32 4294967266, %v5465_v20  ;;  %v5467_v6 = vshll.u32 %v5458_v0, %v5465_v20 }
0x106b   :  { %v5468_v25 = vshrl.u32 %v5450_v26, %v5466_v50  ;;  %v5471_v44 = vadd.s32 127, %v5470_v41  ;;  %v5650_v41 = vld [vmem:[#allocation4 + $0x38] sm:$0xff] }
0x106d   :  { %v5469_v11 = vor.u32 %v5468_v25, %v5467_v6  ;;  %v5472_v29 = vshll.u32 %v5471_v44, 23 }
0x106f   :  { %v5473_v12 = vor.u32 4788187, %v5472_v29  ;;  %v5476_v49 = vcvt.s32.f32 %v5469_v11  ;;  %v5652_v11 = vld [vmem:[#allocation4 + $0x48] sm:$0xff]  ;;  %v5653_v29 = vld [vmem:[#allocation4 + $0x50] sm:$0xff] }
0x1070   :  { %v5695_v61 = vand.u32 4294901760, %v5653_v29 }
0x1071   :  { %v5474_v51 = vand.u32 2147483647, %v5473_v12 }
0x1073   :  { %v5477_v53 = vmul.f32 %v5476_v49, %v5474_v51 }
0x1075   :  { %v5478_v9 = vxor.u32 2147483648, %v5477_v53 }
0x1077   :  { %v5479_v5 = vsel %vm5396_vm1, %v5478_v9, %v5477_v53  ;;  %v5654_v53 = vld [vmem:[#allocation4 + $0x58] sm:$0xff] }
0x1078   :  { %v5482_v13 = vsel %vm5395_vm2, %v14714_v62, %v5479_v5  ;;  %v5686_v5 = vand.u32 4294901760, %v5650_v41 }
0x1079   :  { %12608 = vcosq.f32 %v5482_v13 }
0x107a   :  { %12610 = vsinq.f32 %v5482_v13  ;;  %v5692_v13 = vand.u32 4294901760, %v5652_v11  ;;  %v14805_v55 = vsub.f32 %v5650_v41, %v5686_v5 }
0x1083   :  { %v12609_v59 = vpop.eup %12608 }
0x1084   :  { %v12611_v31 = vpop.eup %12610  ;;  %v5493_v3 = vxor.u32 2147483648, %v12609_v59 }
0x1085   :  { %v5490_v56 = vxor.u32 2147483648, %v12611_v31 }
0x1086   :  { %v5598_v24 = vsel %vm5596_vm3, %v5493_v3, %v12611_v31  ;;  %v5494_v10 = vsel %vm5492_vm4, %v5493_v3, %v12611_v31  ;;  %v14809_v31 = vsub.f32 %v5652_v11, %v5692_v13  ;;  %v14811_v3 = vsub.f32 %v5653_v29, %v5695_v61 }
0x1087   :  { %v5595_v35 = vsel %vm5593_vm5, %v12609_v59, %v5490_v56  ;;  %v5491_v18 = vsel %vm5489_vm6, %v12609_v59, %v5490_v56  ;;  %v5698_v59 = vand.u32 4294901760, %v5654_v53 }
0x1088   :  { %v5599_v0 = vsel %vm5592_vm7, %v5595_v35, %v5598_v24  ;;  %v5495_v32 = vsel %vm5488_vm8, %v5491_v18, %v5494_v10 }
0x1089   :  { %v5600_v42 = vsel %vm5486_vm9, nan, %v5599_v0  ;;  %v5496_v39 = vsel %vm5486_vm9, nan, %v5495_v32  ;;  %v14816_v24 = vsub.f32 %v5654_v53, %v5698_v59  ;;  %v14828_v18 = vpack.c.bf16 %v5698_v59, %v5695_v61 }
0x108a   :  { %5607 = vrot.lane.b32.xlu1 %v5600_v42, %s12698_s17  ;;  %5602 = vrot.lane.b32.xlu0 %v5496_v39, %s12698_s17  ;;  %v5655_v42 = vld [vmem:[#allocation4 + $0x60] sm:$0xff]  ;;  %v5656_v39 = vld [vmem:[#allocation4 + $0x68] sm:$0xff] }
0x108e   :  { %3868 = vperm.xlu1 %12566, %v14397_v60   ;;  %v5354_v60 = vmul.f32 %v14697_v45, %v5141_v30  ;;  %v5646_v45 = vld [vmem:[#allocation4 + $0x18] sm:$0xff] }
0x1092   :  { %12567 = vset.pattern.permute.xlu1 %v12701_v1 }
0x1093   :  { %3882 = vperm.xlu1 %12567, %v14356_v17   ;;  %v5359_v17 = vmul.f32 %v14695_v43, %v14692_v37 }
0x1097   :  { %12568 = vset.pattern.permute.xlu1 %v12700_v40 }
0x1098   :  { %4119 = vperm.xlu1 %12568, %v14456_v36   ;;  %v5392_v36 = vsub.f32 0.0, %v14704_v2 }
0x109c   :  { %12569 = vset.pattern.permute.xlu1 %v12701_v1 }
0x109d   :  { %4133 = vperm.xlu1 %12569, %v14414_v57   ;;  %v5360_v57 = vsub.f32 %v5354_v60, %v5359_v17  ;;  %v5701_v17 = vand.u32 4294901760, %v5655_v42  ;;  %v5704_v60 = vand.u32 4294901760, %v5656_v39 }
0x10a1   :  { %12570 = vset.pattern.permute.xlu1 %v12700_v40 }
0x10a2   :  { %4377 = vperm.xlu1 %12570, %v14468_v7  }
0x10a6   :  { %4621 = vperm.xlu1 %12570, %v14574_v33  }
0x10aa   :  { %4628 = vperm.xlu1 %12570, %v14527_v52  }
0x10ae   :  { %4872 = vperm.xlu1 %12570, %v14633_v14  }
0x10b2   :  { %12573 = vset.pattern.permute.xlu1 %v12701_v1 }
0x10b3   :  { %4886 = vperm.xlu1 %12573, %v14591_v8  }
0x10b7   :  { %12574 = vset.pattern.permute.xlu1 %v12700_v40 }
0x10b8   :  { %5123 = vperm.xlu1 %12574, %v14692_v37   ;;  %v5644_v37 = vld [vmem:[#allocation4 + $0x8] sm:$0xff] }
0x10b9   :  { %v5668_v43 = vand.u32 4294901760, %v5644_v37 }
0x10bb   :  { %v14789_v25 = vsub.f32 %v5644_v37, %v5668_v43 }
0x10bc   :  { %12575 = vset.pattern.permute.xlu1 %v12701_v1 }
0x10bd   :  { %5137 = vperm.xlu1 %12575, %v14650_v19  }
0x10c1   :  { %12576 = vset.pattern.permute.xlu1 %v12700_v40 }
0x10c2   :  { %5381 = vperm.xlu1 %12576, %v14704_v2   ;;  %v5647_v2 = vld [vmem:[#allocation4 + $0x20] sm:$0xff] }
0x10fc   :  { %v5608_v7 = vpop.permute.xlu1 %5607  ;;  %v5603_v52 = vpop.permute.xlu0 %5602 }
0x10fd   :  { %v5610_v33 = vmul.f32 %v5608_v7, %v5360_v57  ;;  %v5613_v8 = vmul.f32 %v5608_v7, %v5392_v36  ;;  %v5605_v14 = vmul.f32 %v5603_v52, %v5392_v36  ;;  %v5612_v19 = vmul.f32 %v5603_v52, %v5360_v57  ;;  %v5657_v36 = vld [vmem:[#allocation4 + $0x70] sm:$0xff]  ;;  %v5658_v7 = vld [vmem:[#allocation4 + $0x78] sm:$0xff] }
0x10fe   :  { %v5707_v52 = vand.u32 4294901760, %v5657_v36 }
0x10ff   :  { %v5611_v62 = vsub.f32 %v5605_v14, %v5610_v33  ;;  %v5614_v15 = vadd.f32 %v5613_v8, %v5612_v19  ;;  %v5710_v33 = vand.u32 4294901760, %v5658_v7  ;;  %v5765_v14 = vand.u32 4294901760, %v14789_v25 }
0x1101   :  { %5625 = vperm.xlu1 %12576, %v5611_v62   ;;  %v5615_v20 = vmul.f32 -9.81, %v5614_v15  ;;  %v5766_v62 = vsub.f32 %v14789_v25, %v5765_v14 }
0x1103   :  { %v5616_v26 = vmul.f32 0.1, %v5615_v20  ;;  %v14850_v20 = vsub.f32 %v5656_v39, %v5704_v60 }
0x1105   :  { %5618 = vrot.lane.b32.xlu0 %v5616_v26, %s12699_s18  ;;  %5632 = vperm.xlu1 %12576, %v5614_v15   ;;  %v14848_v15 = vsub.f32 %v5655_v42, %v5701_v17  ;;  %v14852_v26 = vsub.f32 %v5657_v36, %v5707_v52 }
0x1109   :  { %4384 = vperm.xlu0 %12571, %v14473_v54   ;;  %v5643_v54 = vld [vmem:[#allocation4] sm:$0xff] }
0x110a   :  { %v5665_v30 = vand.u32 4294901760, %v5643_v54 }
0x110c   :  { %v14785_v6 = vpack.c.bf16 %v5668_v43, %v5665_v30 }
0x110d   :  { %4635 = vperm.xlu0 %12571, %v14532_v16   ;;  %v5645_v16 = vld [vmem:[#allocation4 + $0x10] sm:$0xff] }
0x110e   :  { %11852 = vmatpush3.bf16.msra.mxu0 %v14785_v6 }
0x110f   :  { %11853 = vmatprep.subr.bf16.mxu0 %v12687_v28 }
0x1111   :  { %12572 = vset.pattern.permute.xlu0 %v12700_v40  ;;  %v5674_v40 = vand.u32 4294901760, %v5646_v45 }
0x1112   :  { %3875 = vperm.xlu0 %12572, %v14351_v47   ;;  %v5671_v47 = vand.u32 4294901760, %v5645_v16 }
0x1113   :  { %v14795_v51 = vsub.f32 %v5646_v45, %v5674_v40 }
0x1114   :  { %v14791_v44 = vsub.f32 %v5645_v16, %v5671_v47  ;;  %v14793_v12 = vpack.c.bf16 %v5674_v40, %v5671_v47  ;;  %v5767_v16 = vand.u32 4294901760, %v5766_v62 }
0x1115   :  { %v5779_v43 = vand.u32 4294901760, %v14795_v51 }
0x1116   :  { %4126 = vperm.xlu0 %12572, %v14409_v27   ;;  %v5648_v27 = vld [vmem:[#allocation4 + $0x28] sm:$0xff]  ;;  %11855 = vmatpush3.bf16.msra.mxu0 %v14793_v12 }
0x1117   :  { %v5680_v50 = vand.u32 4294901760, %v5648_v27  ;;  %11856 = vmatprep.subr.bf16.mxu0 %v12687_v28 }
0x1119   :  { %v14800_v4 = vsub.f32 %v5648_v27, %v5680_v50 }
0x111a   :  { %4370 = vperm.xlu0 %12572, %v14515_v46   ;;  %v5677_v46 = vand.u32 4294901760, %v5647_v2 }
0x111c   :  { %v14797_v49 = vsub.f32 %v5647_v2, %v5677_v46  ;;  %v14814_v56 = vpack.c.bf16 %v5680_v50, %v5677_v46  ;;  %v5780_v2 = vsub.f32 %v14795_v51, %v5779_v43  ;;  %v16034_v50 = vand.u32 4294901760, %v14800_v4 }
0x111e   :  { %4879 = vperm.xlu0 %12572, %v14586_v48   ;;  %v5649_v48 = vld [vmem:[#allocation4 + $0x30] sm:$0xff]  ;;  %11858 = vmatpush3.bf16.msra.mxu0 %v14814_v56  ;;  %v5781_v40 = vand.u32 4294901760, %v5780_v2  ;;  %v16035_v46 = vand.u32 4294901760, %v14797_v49 }
0x111f   :  { %v5683_v9 = vand.u32 4294901760, %v5649_v48  ;;  %11859 = vmatprep.subr.bf16.mxu0 %v12687_v28 }
0x1120   :  { %v5787_v41 = vsub.f32 %v14797_v49, %v16035_v46 }
0x1121   :  { %v14803_v38 = vsub.f32 %v5649_v48, %v5683_v9  ;;  %v14820_v10 = vpack.c.bf16 %v5686_v5, %v5683_v9  ;;  %v16032_v9 = vand.u32 4294901760, %v14805_v55 }
0x1122   :  { %5130 = vperm.xlu0 %12572, %v14645_v21   ;;  %v5651_v21 = vld [vmem:[#allocation4 + $0x40] sm:$0xff]  ;;  %v5788_v11 = vand.u32 4294901760, %v5787_v41 }
0x1123   :  { %v5689_v22 = vand.u32 4294901760, %v5651_v21  ;;  %11861 = vmatpush3.bf16.msra.mxu0 %v14820_v10  ;;  %v16033_v53 = vand.u32 4294901760, %v14803_v38 }
0x1124   :  { %11862 = vmatprep.subr.bf16.mxu0 %v12687_v28 }
0x1125   :  { %v14807_v34 = vsub.f32 %v5651_v21, %v5689_v22  ;;  %v14824_v35 = vpack.c.bf16 %v5692_v13, %v5689_v22  ;;  %v5794_v21 = vsub.f32 %v14800_v4, %v16034_v50  ;;  %v5801_v22 = vsub.f32 %v14803_v38, %v16033_v53 }
0x1126   :  { %5374 = vperm.xlu0 %12572, %v5360_v57   ;;  %v14834_v57 = vpack.c.bf16 %v5704_v60, %v5701_v17  ;;  %v5808_v13 = vsub.f32 %v14805_v55, %v16032_v9 }
0x1127   :  { %11864 = vmatpush3.bf16.msra.mxu0 %v14824_v35  ;;  %v5795_v29 = vand.u32 4294901760, %v5794_v21  ;;  %v5802_v61 = vand.u32 4294901760, %v5801_v22 }
0x1128   :  { %11865 = vmatprep.subr.bf16.mxu0 %v12687_v28  ;;  %v5809_v59 = vand.u32 4294901760, %v5808_v13 }
0x1129   :  { %v14880_v5 = vpack.c.bf16 %v5795_v29, %v5788_v11  ;;  %v16025_v29 = vand.u32 4294901760, %v14852_v26 }
0x112a   :  { %12577 = vset.pattern.permute.xlu0 %v12701_v1  ;;  %v14787_v1 = vsub.f32 %v5643_v54, %v5665_v30  ;;  %v14854_v54 = vsub.f32 %v5658_v7, %v5710_v33  ;;  %v5772_v30 = vand.u32 4294901760, %v14791_v44  ;;  %v14890_v42 = vpack.c.bf16 %v5809_v59, %v5802_v61 }
0x112b   :  { %5388 = vperm.xlu0 %12577, %v14711_v58   ;;  %11867 = vmatpush3.bf16.msra.mxu0 %v14828_v18  ;;  %v16029_v7 = vand.u32 4294901760, %v14811_v3  ;;  %v5857_v61 = vsub.f32 %v14852_v26, %v16025_v29  ;;  %v11917_v29 = vpack.c.bf16 %v14850_v20, %v14848_v15 }
0x112c   :  { %11868 = vmatprep.subr.bf16.mxu0 %v12687_v28  ;;  %v5758_v8 = vand.u32 4294901760, %v14787_v1  ;;  %v5773_v47 = vsub.f32 %v14791_v44, %v5772_v30  ;;  %v16024_v22 = vand.u32 4294901760, %v14854_v54 }
0x112e   :  { %v5759_v19 = vsub.f32 %v14787_v1, %v5758_v8  ;;  %v5774_v27 = vand.u32 4294901760, %v5773_v47  ;;  %v16026_v47 = vand.u32 4294901760, %v14850_v20  ;;  %v5864_v59 = vsub.f32 %v14854_v54, %v16024_v22 }
0x112f   :  { %11870 = vmatpush3.bf16.msra.mxu0 %v14834_v57 }
0x1130   :  { %11871 = vmatprep.subr.bf16.mxu0 %v12687_v28  ;;  %v5760_v37 = vand.u32 4294901760, %v5759_v19  ;;  %v14870_v48 = vpack.c.bf16 %v5781_v40, %v5774_v27  ;;  %v5829_v19 = vsub.f32 %v14811_v3, %v16029_v7  ;;  %v5850_v40 = vsub.f32 %v14850_v20, %v16026_v47 }
0x1132   :  { %v14860_v45 = vpack.c.bf16 %v5767_v16, %v5760_v37  ;;  %v5830_v37 = vand.u32 4294901760, %v5829_v19  ;;  %v16027_v16 = vand.u32 4294901760, %v14848_v15  ;;  %v5851_v11 = vand.u32 4294901760, %v5850_v40 }
0x1133   :  { %v11902_v19 = vpack.c.bf16 %v14795_v51, %v14791_v44  ;;  %v3634_v40 = vlaneseq  ;;  %v16147_v44 = vand.u32 4294901760, %v14805_v55 }
0x1134   :  { %v5843_v27 = vsub.f32 %v14848_v15, %v16027_v16 }
0x1136   :  { %v5844_v21 = vand.u32 4294901760, %v5843_v27  ;;  %v11908_v27 = vpack.c.bf16 %v14805_v55, %v14803_v38  ;;  %v16153_v55 = vand.u32 4294901760, %v14850_v20  ;;  %v6322_v20 = vld [vmem:[#allocation6 + $0x1f8] sm:$0xff] }
0x1138   :  { %v14920_v13 = vpack.c.bf16 %v5851_v11, %v5844_v21  ;;  %v11911_v11 = vpack.c.bf16 %v14809_v31, %v14807_v34 }
0x1177   :  { %v5619_v0 = vpop.permute.xlu0 %5618 }
0x1178   :  { %v5621_v32 = vadd.f32 %v5619_v0, %v14711_v58  ;;  %v14840_v58 = vpack.c.bf16 %v5710_v33, %v5707_v52  ;;  %v16031_v0 = vand.u32 4294901760, %v14807_v34  ;;  %v16028_v52 = vand.u32 4294901760, %v14816_v24 }
0x117a   :  { %5639 = vperm.xlu0 %12577, %v5621_v32   ;;  %11873 = vmatpush3.bf16.msra.mxu0 %v14840_v58  ;;  %v16030_v32 = vand.u32 4294901760, %v14809_v31  ;;  %v5815_v39 = vsub.f32 %v14807_v34, %v16031_v0  ;;  %v5836_v62 = vsub.f32 %v14816_v24, %v16028_v52 }
0x117b   :  { %11874 = vmatprep.subr.bf16.mxu0 %v12687_v28 }
0x117c   :  { %v5822_v17 = vsub.f32 %v14809_v31, %v16030_v32  ;;  %v5816_v60 = vand.u32 4294901760, %v5815_v39  ;;  %v5837_v2 = vand.u32 4294901760, %v5836_v62  ;;  %v5858_v39 = vand.u32 4294901760, %v5857_v61 }
0x117d   :  { %v11905_v62 = vpack.c.bf16 %v14800_v4, %v14797_v49 }
0x117e   :  { %v5823_v36 = vand.u32 4294901760, %v5822_v17  ;;  %v14916_v41 = vpack.c.bf16 %v5837_v2, %v5830_v37  ;;  %v5865_v17 = vand.u32 4294901760, %v5864_v59  ;;  %v3869_v37 = vpop.permute.xlu1 %3868  ;;  %v14940_v59 = vand.u32 127, %v3634_v40 }
0x117f   :  { %v11920_v40 = vpack.c.bf16 %v14854_v54, %v14852_v26 }
0x1180   :  { %v14900_v33 = vpack.c.bf16 %v5823_v36, %v5816_v60  ;;  %v14928_v60 = vpack.c.bf16 %v5865_v17, %v5858_v39  ;;  %v11899_v36 = vpack.c.bf16 %v14789_v25, %v14787_v1  ;;  %v11914_v39 = vpack.c.bf16 %v14816_v24, %v14811_v3 }
0x1181   :  { %vm3865_vm10 = vcmp.eq.s32.totalorder %v14940_v59, 96  ;;  %vm3872_vm11 = vcmp.eq.s32.totalorder %v14940_v59, 97  ;;  %vm3879_vm12 = vcmp.eq.s32.totalorder %v14940_v59, 98  ;;  %vm4116_vm13 = vcmp.eq.s32.totalorder %v14940_v59, 99 }
0x1182   :  { %v3883_v21 = vpop.permute.xlu1 %3882  ;;  %v3871_v47 = vsel %vm3865_vm10, %v3869_v37, %v14284_v23  ;;  %vm4123_vm14 = vcmp.eq.s32.totalorder %v14940_v59, 100  ;;  %vm4130_vm15 = vcmp.eq.s32.totalorder %v14940_v59, 101  ;;  %vm4367_vm1 = vcmp.eq.s32.totalorder %v14940_v59, 102 }
0x1183   :  { %vm4374_vm2 = vcmp.eq.s32.totalorder %v14940_v59, 103  ;;  %vm4381_vm3 = vcmp.eq.s32.totalorder %v14940_v59, 104  ;;  %vm4618_vm4 = vcmp.eq.s32.totalorder %v14940_v59, 105  ;;  %vm4625_vm5 = vcmp.eq.s32.totalorder %v14940_v59, 106 }
0x1184   :  { %vm4632_vm6 = vcmp.eq.s32.totalorder %v14940_v59, 107  ;;  %vm4869_vm7 = vcmp.eq.s32.totalorder %v14940_v59, 108  ;;  %vm4876_vm8 = vcmp.eq.s32.totalorder %v14940_v59, 109  ;;  %vm4883_vm9 = vcmp.eq.s32.totalorder %v14940_v59, 110 }
0x1185   :  { %vm5120_vm10 = vcmp.eq.s32.totalorder %v14940_v59, 111  ;;  %v16144_v1 = vand.u32 4294901760, %v14797_v49  ;;  %v16145_v25 = vand.u32 4294901760, %v14800_v4  ;;  %v16150_v49 = vand.u32 4294901760, %v14811_v3 }
0x1186   :  { %v4120_v17 = vpop.permute.xlu1 %4119  ;;  %v16151_v4 = vand.u32 4294901760, %v14816_v24 }
0x1188   :  { %v4385_v2 = vpop.permute.xlu0 %4384 }
0x118a   :  { %v4134_v16 = vpop.permute.xlu1 %4133 }
0x118c   :  { %v4636_v61 = vpop.permute.xlu0 %4635 }
0x118e   :  { %v4378_v0 = vpop.permute.xlu1 %4377 }
0x1191   :  { %v3876_v22 = vpop.permute.xlu0 %3875 }
0x1192   :  { %v3878_v52 = vsel %vm3872_vm11, %v3876_v22, %v3871_v47  ;;  %v4622_v37 = vpop.permute.xlu1 %4621  ;;  %vm5127_vm11 = vcmp.eq.s32.totalorder %v14940_v59, 112 }
0x1193   :  { %v3885_v7 = vsel %vm3879_vm12, %v3883_v21, %v3878_v52  ;;  %vm5134_vm12 = vcmp.eq.s32.totalorder %v14940_v59, 113 }
0x1194   :  { %v4122_v9 = vsel %vm4116_vm13, %v4120_v17, %v3885_v7  ;;  %vm5371_vm13 = vcmp.eq.s32.totalorder %v14940_v59, 114 }
0x1195   :  { %v4127_v32 = vpop.permute.xlu0 %4126 }
0x1196   :  { %v4129_v53 = vsel %vm4123_vm14, %v4127_v32, %v4122_v9  ;;  %v4629_v22 = vpop.permute.xlu1 %4628  ;;  %vm5378_vm14 = vcmp.eq.s32.totalorder %v14940_v59, 115 }
0x1197   :  { %v4136_v50 = vsel %vm4130_vm15, %v4134_v16, %v4129_v53  ;;  %vm5385_vm15 = vcmp.eq.s32.totalorder %v14940_v59, 116 }
0x1199   :  { %v4371_v23 = vpop.permute.xlu0 %4370 }
0x119a   :  { %v4373_v47 = vsel %vm4367_vm1, %v4371_v23, %v4136_v50  ;;  %v4873_v9 = vpop.permute.xlu1 %4872  ;;  %vm5622_vm1 = vcmp.eq.s32.totalorder %v14940_v59, 117 }
0x119b   :  { %v4380_v52 = vsel %vm4374_vm2, %v4378_v0, %v4373_v47  ;;  %vm5629_vm2 = vcmp.eq.s32.totalorder %v14940_v59, 118 }
0x119c   :  { %v4387_v7 = vsel %vm4381_vm3, %v4385_v2, %v4380_v52  ;;  %vm5636_vm3 = vcmp.eq.s32.totalorder %v14940_v59, 119  ;;  %v6311_v59 = vld [vmem:[#allocation6 + $0x1a0] sm:$0xff] }
0x119d   :  { %v4624_v21 = vsel %vm4618_vm4, %v4622_v37, %v4387_v7  ;;  %v4880_v50 = vpop.permute.xlu0 %4879 }
0x119e   :  { %v4631_v32 = vsel %vm4625_vm5, %v4629_v22, %v4624_v21  ;;  %v4887_v53 = vpop.permute.xlu1 %4886 }
0x119f   :  { %v4638_v17 = vsel %vm4632_vm6, %v4636_v61, %v4631_v32 }
0x11a0   :  { %v4875_v16 = vsel %vm4869_vm7, %v4873_v9, %v4638_v17 }
0x11a1   :  { %v4882_v0 = vsel %vm4876_vm8, %v4880_v50, %v4875_v16  ;;  %v5131_v37 = vpop.permute.xlu0 %5130 }
0x11a2   :  { %v5124_v23 = vpop.permute.xlu1 %5123  ;;  %v4889_v2 = vsel %vm4883_vm9, %v4887_v53, %v4882_v0 }
0x11a3   :  { %v5126_v47 = vsel %vm5120_vm10, %v5124_v23, %v4889_v2 }
0x11a4   :  { %v5133_v61 = vsel %vm5127_vm11, %v5131_v37, %v5126_v47 }
0x11a5   :  { %v5375_v22 = vpop.permute.xlu0 %5374 }
0x11a6   :  { %v5138_v52 = vpop.permute.xlu1 %5137 }
0x11a7   :  { %v5140_v7 = vsel %vm5134_vm12, %v5138_v52, %v5133_v61 }
0x11a8   :  { %v5377_v9 = vsel %vm5371_vm13, %v5375_v22, %v5140_v7 }
0x11aa   :  { %v5382_v21 = vpop.permute.xlu1 %5381  ;;  %v5389_v32 = vpop.permute.xlu0 %5388 }
0x11ab   :  { %v5384_v53 = vsel %vm5378_vm14, %v5382_v21, %v5377_v9  ;;  %v6341_v9 = vand.u32 4294901760, %v6311_v59 }
0x11ac   :  { %v5391_v16 = vsel %vm5385_vm15, %v5389_v32, %v5384_v53  ;;  %v6314_v53 = vld [vmem:[#allocation6 + $0x1b8] sm:$0xff] }
0x11ae   :  { %v5626_v17 = vpop.permute.xlu1 %5625 }
0x11af   :  { %v5628_v50 = vsel %vm5622_vm1, %v5626_v17, %v5391_v16  ;;  %v6313_v17 = vld [vmem:[#allocation6 + $0x1b0] sm:$0xff]  ;;  %v6315_v16 = vld [vmem:[#allocation6 + $0x1c0] sm:$0xff] }
0x11b2   :  { %v5633_v0 = vpop.permute.xlu1 %5632 }
0x11b3   :  { %v5635_v2 = vsel %vm5629_vm2, %v5633_v0, %v5628_v50 }
0x11f9   :  { %v5640_v23 = vpop.permute.xlu0 %5639 }
0x11fa   :  { %v5642_v37 = vsel %vm5636_vm3, %v5640_v23, %v5635_v2  ;;  %v6316_v2 = vld [vmem:[#allocation6 + $0x1c8] sm:$0xff] }
0x11fb   :  { %v14973_v47 = vand.u32 4294901760, %v5642_v37 }
0x11fd   :  { %v14976_v52 = vsub.f32 %v5642_v37, %v14973_v47 }
0x11ff   :  { %v5747_v61 = vand.u32 4294901760, %v14976_v52 }
0x1201   :  { %v5748_v22 = vsub.f32 %v14976_v52, %v5747_v61 }
0x1203   :  { %v5749_v7 = vand.u32 4294901760, %v5748_v22 }
0x1205   :  { %10275 = vmatmul.mubr.f32.vlgmr.msra.gmra.mrb[10].mxu0 %v5749_v7  ;;  %v15019_v7 = vsub.f32 %v6311_v59, %v6341_v9 }
0x1206   :  { %11876 = vmatpush3.bf16.msra.mxu0 %v14860_v45  ;;  %10309 = vmatprep.mubr.msk.f32.mxu0 %vm12688_vm0, %v12689_v63  ;;  %v6307_v45 = vld [vmem:[#allocation6 + $0x180] sm:$0xff] }
0x1207   :  { %11877 = vmatprep.subr.bf16.mxu0 %v12687_v28 }
0x120a   :  { %11879 = vmatpush3.bf16.msra.mxu0 %v14870_v48  ;;  %v6308_v48 = vld [vmem:[#allocation6 + $0x188] sm:$0xff] }
0x120b   :  { %11880 = vmatprep.subr.bf16.mxu0 %v12687_v28 }
0x120e   :  { %11882 = vmatpush3.bf16.msra.mxu0 %v14880_v5  ;;  %v6309_v5 = vld [vmem:[#allocation6 + $0x190] sm:$0xff] }
0x120f   :  { %11883 = vmatprep.subr.bf16.mxu0 %v12687_v28 }
0x1212   :  { %11885 = vmatpush3.bf16.msra.mxu0 %v14890_v42  ;;  %v6329_v42 = vand.u32 4294901760, %v6307_v45 }
0x1213   :  { %11886 = vmatprep.subr.bf16.mxu0 %v12687_v28 }
0x1216   :  { %11888 = vmatpush3.bf16.msra.mxu0 %v14900_v33  ;;  %v6332_v33 = vand.u32 4294901760, %v6308_v48 }
0x1217   :  { %11889 = vmatprep.subr.bf16.mxu0 %v12687_v28 }
0x1218   :  { %v15007_v50 = vpack.c.bf16 %v6332_v33, %v6329_v42  ;;  %v15011_v0 = vsub.f32 %v6308_v48, %v6332_v33  ;;  %v6350_v48 = vand.u32 4294901760, %v6314_v53 }
0x121a   :  { %11891 = vmatpush3.bf16.msra.mxu0 %v14916_v41  ;;  %v6310_v41 = vld [vmem:[#allocation6 + $0x198] sm:$0xff]  ;;  %11996 = vmatpush3.bf16.msra.mxu1 %v15007_v50 }
0x121b   :  { %11892 = vmatprep.subr.bf16.mxu0 %v12687_v28  ;;  %v6338_v21 = vand.u32 4294901760, %v6310_v41  ;;  %11997 = vmatprep.subr.bf16.mxu1 %v12687_v28 }
0x121d   :  { %v15017_v22 = vsub.f32 %v6310_v41, %v6338_v21  ;;  %v15031_v41 = vsub.f32 %v6314_v53, %v6350_v48 }
0x121e   :  { %11894 = vmatpush3.bf16.msra.mxu0 %v14920_v13  ;;  %v6335_v13 = vand.u32 4294901760, %v6309_v5 }
0x121f   :  { %11895 = vmatprep.subr.bf16.mxu0 %v12687_v28 }
0x1220   :  { %v15013_v23 = vsub.f32 %v6309_v5, %v6335_v13  ;;  %v15015_v37 = vpack.c.bf16 %v6338_v21, %v6335_v13  ;;  %v6356_v5 = vand.u32 4294901760, %v6316_v2 }
0x1222   :  { %11897 = vmatpush3.bf16.msra.mxu0 %v14928_v60  ;;  %v6312_v60 = vld [vmem:[#allocation6 + $0x1a8] sm:$0xff]  ;;  %v15035_v59 = vsub.f32 %v6316_v2, %v6356_v5  ;;  %11999 = vmatpush3.bf16.msra.mxu1 %v15015_v37 }
0x1223   :  { %11898 = vmatprep.subr.bf16.mxu0 %v12687_v28  ;;  %v6344_v32 = vand.u32 4294901760, %v6312_v60  ;;  %12000 = vmatprep.subr.bf16.mxu1 %v12687_v28 }
0x1225   :  { %10310 = vmatmul.mubr.f32.vlgmr.msra.gmra.mrb[10].mxu0 %v14973_v47  ;;  %v15025_v46 = vsub.f32 %v6312_v60, %v6344_v32 }
0x1226   :  { %11900 = vmatpush3.bf16.msra.mxu0 %v11899_v36  ;;  %10344 = vmatprep.mubr.msk.f32.mxu0 %vm12688_vm0, %v12689_v63  ;;  %v15009_v36 = vsub.f32 %v6307_v45, %v6329_v42  ;;  %v6347_v45 = vand.u32 4294901760, %v6313_v17  ;;  %v6353_v42 = vand.u32 4294901760, %v6315_v16 }
0x1227   :  { %11901 = vmatprep.subr.bf16.mxu0 %v12687_v28 }
0x1228   :  { %v15029_v33 = vsub.f32 %v6313_v17, %v6347_v45  ;;  %v15033_v13 = vsub.f32 %v6315_v16, %v6353_v42  ;;  %v15049_v60 = vpack.c.bf16 %v6350_v48, %v6347_v45 }
0x122a   :  { %11903 = vmatpush3.bf16.msra.mxu0 %v11902_v19  ;;  %v15041_v19 = vpack.c.bf16 %v6344_v32, %v6341_v9 }
0x122b   :  { %11904 = vmatprep.subr.bf16.mxu0 %v12687_v28 }
0x122c   :  { %12002 = vmatpush3.bf16.msra.mxu1 %v15041_v19 }
0x122d   :  { %12003 = vmatprep.subr.bf16.mxu1 %v12687_v28 }
0x122e   :  { %11906 = vmatpush3.bf16.msra.mxu0 %v11905_v62  ;;  %v15057_v62 = vpack.c.bf16 %v6356_v5, %v6353_v42 }
0x122f   :  { %11907 = vmatprep.subr.bf16.mxu0 %v12687_v28 }
0x1230   :  { %12005 = vmatpush3.bf16.msra.mxu1 %v15049_v60 }
0x1231   :  { %12006 = vmatprep.subr.bf16.mxu1 %v12687_v28 }
0x1232   :  { %11909 = vmatpush3.bf16.msra.mxu0 %v11908_v27  ;;  %v11950_v27 = vpack.c.bf16 %v5779_v43, %v5772_v30  ;;  %v16148_v30 = vand.u32 4294901760, %v14807_v34  ;;  %v16149_v43 = vand.u32 4294901760, %v14809_v31  ;;  %v16154_v34 = vand.u32 4294901760, %v14852_v26 }
0x1233   :  { %11910 = vmatprep.subr.bf16.mxu0 %v12687_v28  ;;  %v16155_v31 = vand.u32 4294901760, %v14854_v54  ;;  %v6374_v54 = vand.u32 4294901760, %v6322_v20 }
0x1234   :  { %12008 = vmatpush3.bf16.msra.mxu1 %v15057_v62 }
0x1235   :  { %12009 = vmatprep.subr.bf16.mxu1 %v12687_v28  ;;  %v15189_v48 = vsub.f32 %v6322_v20, %v6374_v54 }
0x1236   :  { %11912 = vmatpush3.bf16.msra.mxu0 %v11911_v11  ;;  %v11959_v11 = vpack.c.bf16 %v16149_v43, %v16148_v30 }
0x1237   :  { %11913 = vmatprep.subr.bf16.mxu0 %v12687_v28 }
0x123a   :  { %11915 = vmatpush3.bf16.msra.mxu0 %v11914_v39  ;;  %v11962_v39 = vpack.c.bf16 %v16151_v4, %v16150_v49 }
0x123b   :  { %11916 = vmatprep.subr.bf16.mxu0 %v12687_v28 }
0x123e   :  { %11918 = vmatpush3.bf16.msra.mxu0 %v11917_v29  ;;  %v11947_v29 = vpack.c.bf16 %v5765_v14, %v5758_v8  ;;  %v11953_v8 = vpack.c.bf16 %v16145_v25, %v16144_v1  ;;  %v16146_v14 = vand.u32 4294901760, %v14803_v38  ;;  %v16152_v38 = vand.u32 4294901760, %v14848_v15  ;;  %v6321_v15 = vld [vmem:[#allocation6 + $0x1f0] sm:$0xff] }
0x123f   :  { %11919 = vmatprep.subr.bf16.mxu0 %v12687_v28  ;;  %v6371_v26 = vand.u32 4294901760, %v6321_v15 }
0x1240   :  { %v11956_v51 = vpack.c.bf16 %v16147_v44, %v16146_v14  ;;  %v16047_v14 = vand.u32 4294901760, %v15019_v7  ;;  %v16046_v44 = vand.u32 4294901760, %v15025_v46 }
0x1241   :  { %v15170_v21 = vpack.c.bf16 %v6374_v54, %v6371_v26  ;;  %v15187_v45 = vsub.f32 %v6321_v15, %v6371_v26 }
0x1242   :  { %11921 = vmatpush3.bf16.msra.mxu0 %v11920_v40  ;;  %v11965_v40 = vpack.c.bf16 %v16153_v55, %v16152_v38  ;;  %v6451_v43 = vsub.f32 %v15019_v7, %v16047_v14  ;;  %v16045_v38 = vand.u32 4294901760, %v15029_v33  ;;  %v16044_v55 = vand.u32 4294901760, %v15031_v41 }
0x1243   :  { %11922 = vmatprep.subr.bf16.mxu0 %v12687_v28 }
0x1244   :  { %v6452_v4 = vand.u32 4294901760, %v6451_v43 }
0x1245   :  { %10345 = vmatmul.mubr.f32.vlgmr.msra.gmra.mrb[10].mxu0 %v14976_v52  ;;  %v11968_v52 = vpack.c.bf16 %v16155_v31, %v16154_v34  ;;  %v6465_v34 = vsub.f32 %v15029_v33, %v16045_v38  ;;  %v6472_v31 = vsub.f32 %v15031_v41, %v16044_v55 }
0x1246   :  { %11924 = vmatpush3.bf16.msra.mxu0 %v14785_v6  ;;  %10379 = vmatprep.mubr.msk.f32.mxu0 %vm12688_vm0, %v12689_v63 }
0x1247   :  { %11925 = vmatprep.subr.bf16.mxu0 %v12687_v28 }
0x124a   :  { %11927 = vmatpush3.bf16.msra.mxu0 %v14793_v12 }
0x124b   :  { %11928 = vmatprep.subr.bf16.mxu0 %v12687_v28 }
0x124e   :  { %11930 = vmatpush3.bf16.msra.mxu0 %v14814_v56 }
0x124f   :  { %11931 = vmatprep.subr.bf16.mxu0 %v12687_v28 }
0x1252   :  { %11933 = vmatpush3.bf16.msra.mxu0 %v14820_v10 }
0x1253   :  { %11934 = vmatprep.subr.bf16.mxu0 %v12687_v28 }
0x1256   :  { %11936 = vmatpush3.bf16.msra.mxu0 %v14824_v35 }
0x1257   :  { %11937 = vmatprep.subr.bf16.mxu0 %v12687_v28 }
0x125a   :  { %11939 = vmatpush3.bf16.msra.mxu0 %v14828_v18 }
0x125b   :  { %11940 = vmatprep.subr.bf16.mxu0 %v12687_v28 }
0x125e   :  { %11942 = vmatpush3.bf16.msra.mxu0 %v14834_v57 }
0x125f   :  { %11943 = vmatprep.subr.bf16.mxu0 %v12687_v28 }
0x1262   :  { %11945 = vmatpush3.bf16.msra.mxu0 %v14840_v58 }
0x1263   :  { %11946 = vmatprep.subr.bf16.mxu0 %v12687_v28 }
0x1265   :  { %10380 = vmatmul.mubr.f32.vlgmr.msra.gmra.mrb[10].mxu0 %v5747_v61  ;;  %v6429_v61 = vand.u32 4294901760, %v15011_v0 }
0x1266   :  { %11948 = vmatpush3.bf16.msra.mxu0 %v11947_v29  ;;  %10414 = vmatprep.mubr.msk.f32.mxu0 %vm12688_vm0, %v12689_v63  ;;  %v16049_v29 = vand.u32 4294901760, %v15013_v23 }
0x1267   :  { %11949 = vmatprep.subr.bf16.mxu0 %v12687_v28  ;;  %v6430_v32 = vsub.f32 %v15011_v0, %v6429_v61 }
0x1268   :  { %v6437_v25 = vsub.f32 %v15013_v23, %v16049_v29 }
0x1269   :  { %v6431_v5 = vand.u32 4294901760, %v6430_v32 }
0x126a   :  { %11951 = vmatpush3.bf16.msra.mxu0 %v11950_v27  ;;  %v16048_v27 = vand.u32 4294901760, %v15017_v22 }
0x126b   :  { %11952 = vmatprep.subr.bf16.mxu0 %v12687_v28 }
0x126e   :  { %11954 = vmatpush3.bf16.msra.mxu0 %v11953_v8  ;;  %v6444_v8 = vsub.f32 %v15017_v22, %v16048_v27 }
0x126f   :  { %11955 = vmatprep.subr.bf16.mxu0 %v12687_v28 }
0x1270   :  { %v6445_v30 = vand.u32 4294901760, %v6444_v8 }
0x1272   :  { %11957 = vmatpush3.bf16.msra.mxu0 %v11956_v51  ;;  %v6438_v51 = vand.u32 4294901760, %v6437_v25 }
0x1273   :  { %11958 = vmatprep.subr.bf16.mxu0 %v12687_v28 }
0x1274   :  { %v12022_v49 = vpack.c.bf16 %v6445_v30, %v6438_v51 }
0x1276   :  { %11960 = vmatpush3.bf16.msra.mxu0 %v11959_v11  ;;  %v6458_v11 = vsub.f32 %v15025_v46, %v16046_v44 }
0x1277   :  { %11961 = vmatprep.subr.bf16.mxu0 %v12687_v28 }
0x127a   :  { %11963 = vmatpush3.bf16.msra.mxu0 %v11962_v39  ;;  %v6459_v39 = vand.u32 4294901760, %v6458_v11 }
0x127b   :  { %11964 = vmatprep.subr.bf16.mxu0 %v12687_v28 }
0x127e   :  { %11966 = vmatpush3.bf16.msra.mxu0 %v11965_v40  ;;  %v12025_v40 = vpack.c.bf16 %v6459_v39, %v6452_v4  ;;  %v16037_v4 = vand.u32 4294901760, %v15187_v45  ;;  %v16036_v39 = vand.u32 4294901760, %v15189_v48 }
0x127f   :  { %11967 = vmatprep.subr.bf16.mxu0 %v12687_v28 }
0x1282   :  { %11969 = vmatpush3.bf16.msra.mxu0 %v11968_v52  ;;  %v6466_v52 = vand.u32 4294901760, %v6465_v34 }
0x1283   :  { %11970 = vmatprep.subr.bf16.mxu0 %v12687_v28 }
0x1285   :  { %10415 = vmatmul.mubr.f32.vlgmr.msra.gmra.mrb[10].mxu0 %v14973_v47 }
0x1286   :  { %11972 = vmatpush3.bf16.msra.mxu0 %v14785_v6  ;;  %10449 = vmatprep.mubr.msk.f32.mxu0 %vm12688_vm0, %v12689_v63  ;;  %v6317_v6 = vld [vmem:[#allocation6 + $0x1d0] sm:$0xff] }
0x1287   :  { %11973 = vmatprep.subr.bf16.mxu0 %v12687_v28  ;;  %v6359_v3 = vand.u32 4294901760, %v6317_v6 }
0x1289   :  { %v15178_v17 = vsub.f32 %v6317_v6, %v6359_v3  ;;  %v6473_v6 = vand.u32 4294901760, %v6472_v31  ;;  %v6521_v31 = vsub.f32 %v15187_v45, %v16037_v4 }
0x128a   :  { %11975 = vmatpush3.bf16.msra.mxu0 %v14793_v12  ;;  %v6318_v12 = vld [vmem:[#allocation6 + $0x1d8] sm:$0xff] }
0x128b   :  { %11976 = vmatprep.subr.bf16.mxu0 %v12687_v28  ;;  %v16041_v15 = vand.u32 4294901760, %v15178_v17 }
0x128d   :  { %v6493_v54 = vsub.f32 %v15178_v17, %v16041_v15 }
0x128e   :  { %11978 = vmatpush3.bf16.msra.mxu0 %v14814_v56  ;;  %v6362_v56 = vand.u32 4294901760, %v6318_v12 }
0x128f   :  { %11979 = vmatprep.subr.bf16.mxu0 %v12687_v28  ;;  %v6494_v32 = vand.u32 4294901760, %v6493_v54  ;;  %v12049_v54 = vpack.c.bf16 %v15025_v46, %v15019_v7 }
0x1290   :  { %v15160_v24 = vpack.c.bf16 %v6362_v56, %v6359_v3  ;;  %v15180_v53 = vsub.f32 %v6318_v12, %v6362_v56  ;;  %v16043_v12 = vand.u32 4294901760, %v15033_v13  ;;  %v16042_v3 = vand.u32 4294901760, %v15035_v59 }
0x1291   :  { %v12028_v56 = vpack.c.bf16 %v6473_v6, %v6466_v52  ;;  %v6528_v52 = vsub.f32 %v15189_v48, %v16036_v39  ;;  %v6522_v6 = vand.u32 4294901760, %v6521_v31 }
0x1292   :  { %11981 = vmatpush3.bf16.msra.mxu0 %v14820_v10  ;;  %v6319_v10 = vld [vmem:[#allocation6 + $0x1e0] sm:$0xff]  ;;  %12011 = vmatpush3.bf16.msra.mxu1 %v15160_v24  ;;  %v16040_v20 = vand.u32 4294901760, %v15180_v53 }
0x1293   :  { %11982 = vmatprep.subr.bf16.mxu0 %v12687_v28  ;;  %12012 = vmatprep.subr.bf16.mxu1 %v12687_v28 }
0x1296   :  { %11984 = vmatpush3.bf16.msra.mxu0 %v14824_v35  ;;  %v6320_v35 = vld [vmem:[#allocation6 + $0x1e8] sm:$0xff] }
0x1297   :  { %11985 = vmatprep.subr.bf16.mxu0 %v12687_v28 }
0x129a   :  { %11987 = vmatpush3.bf16.msra.mxu0 %v14828_v18  ;;  %v6365_v18 = vand.u32 4294901760, %v6319_v10 }
0x129b   :  { %11988 = vmatprep.subr.bf16.mxu0 %v12687_v28 }
0x129c   :  { %v15182_v16 = vsub.f32 %v6319_v10, %v6365_v18  ;;  %v6479_v10 = vsub.f32 %v15033_v13, %v16043_v12  ;;  %v6980_v12 = vld [vmem:[#allocation6 + $0x248] sm:$0xff] }
0x129e   :  { %11990 = vmatpush3.bf16.msra.mxu0 %v14834_v57  ;;  %v6368_v57 = vand.u32 4294901760, %v6320_v35 }
0x129f   :  { %11991 = vmatprep.subr.bf16.mxu0 %v12687_v28 }
0x12a0   :  { %v15184_v2 = vsub.f32 %v6320_v35, %v6368_v57  ;;  %v6486_v35 = vsub.f32 %v15035_v59, %v16042_v3 }
0x12a2   :  { %11993 = vmatpush3.bf16.msra.mxu0 %v14840_v58  ;;  %v15164_v58 = vpack.c.bf16 %v6368_v57, %v6365_v18  ;;  %v6480_v18 = vand.u32 4294901760, %v6479_v10  ;;  %v6487_v57 = vand.u32 4294901760, %v6486_v35  ;;  %v16038_v25 = vand.u32 4294901760, %v15184_v2 }
0x12a3   :  { %12138 = vmatprep.subr.bf16.mxu0 %v12687_v28  ;;  %v6529_v10 = vand.u32 4294901760, %v6528_v52 }
0x12a4   :  { %12014 = vmatpush3.bf16.msra.mxu1 %v15164_v58  ;;  %v12031_v26 = vpack.c.bf16 %v6487_v57, %v6480_v18  ;;  %v6514_v30 = vsub.f32 %v15184_v2, %v16038_v25  ;;  %v12043_v18 = vpack.c.bf16 %v15011_v0, %v15009_v36  ;;  %v12046_v57 = vpack.c.bf16 %v15017_v22, %v15013_v23 }
0x12a5   :  { %10450 = vmatmul.mubr.f32.vlgmr.msra.gmra.mrb[10].mxu0 %v14973_v47  ;;  %v6422_v47 = vand.u32 4294901760, %v15009_v36  ;;  %12015 = vmatprep.subr.bf16.mxu1 %v12687_v28  ;;  %v12040_v35 = vpack.c.bf16 %v6529_v10, %v6522_v6  ;;  %v16159_v0 = vand.u32 4294901760, %v15025_v46  ;;  %v16164_v46 = vand.u32 4294901760, %v15178_v17 }
0x12a6   :  { %10694 = vmatprep.mubr.msk.f32.mxu0 %vm12688_vm0, %v12689_v63  ;;  %v6515_v11 = vand.u32 4294901760, %v6514_v30  ;;  %v12064_v30 = vpack.c.bf16 %v15189_v48, %v15187_v45 }
0x12a7   :  { %v6423_v9 = vsub.f32 %v15009_v36, %v6422_v47  ;;  %v16158_v36 = vand.u32 4294901760, %v15019_v7  ;;  %v16165_v7 = vand.u32 4294901760, %v15180_v53 }
0x12a8   :  { %12017 = vmatpush3.bf16.msra.mxu1 %v15170_v21 }
0x12a9   :  { %12018 = vmatprep.subr.bf16.mxu1 %v12687_v28  ;;  %v6424_v42 = vand.u32 4294901760, %v6423_v9  ;;  %v6500_v9 = vsub.f32 %v15180_v53, %v16040_v20 }
0x12ab   :  { %v15194_v1 = vpack.c.bf16 %v6431_v5, %v6424_v42  ;;  %v6501_v42 = vand.u32 4294901760, %v6500_v9  ;;  %v16039_v5 = vand.u32 4294901760, %v15182_v16  ;;  %v12052_v9 = vpack.c.bf16 %v15031_v41, %v15029_v33 }
0x12ad   :  { %v12034_v8 = vpack.c.bf16 %v6501_v42, %v6494_v32  ;;  %v6507_v51 = vsub.f32 %v15182_v16, %v16039_v5  ;;  %v12055_v32 = vpack.c.bf16 %v15035_v59, %v15033_v13  ;;  %v12058_v42 = vpack.c.bf16 %v15180_v53, %v15178_v17  ;;  %v6984_v17 = vld [vmem:[#allocation6 + $0x268] sm:$0xff] }
0x12ae   :  { %v7032_v53 = vand.u32 4294901760, %v6984_v17 }
0x12af   :  { %v6508_v43 = vand.u32 4294901760, %v6507_v51  ;;  %v12061_v51 = vpack.c.bf16 %v15184_v2, %v15182_v16 }
0x12b1   :  { %v12037_v34 = vpack.c.bf16 %v6515_v11, %v6508_v43  ;;  %v8372_v43 = vld [vmem:[%s15946_s4 + $0x4] ss:$0 sm:$0xff] }
0x1378   :  { %v6301_v11 = vpop.f32.mrb[10].mxu0 }
0x1379   :  { %v12430_v31 = vadd.f32 %v8372_v43, %v6301_v11  ;;  %v10451_v52 = vpop.f32.mrb[11].mxu0 }
0x137a   :  { %v6978_v52 = vld [vmem:[#allocation6 + $0x238] sm:$0xff] }
0x137b   :  { %v6305_v6 = vmax.f32 %v12430_v31, 0.0  ;;  %v6977_v31 = vld [vmem:[#allocation6 + $0x230] sm:$0xff]  ;;  %v7014_v29 = vand.u32 4294901760, %v6978_v52 }
0x137c   :  { %v7011_v27 = vand.u32 4294901760, %v6977_v31 }
0x137d   :  { %v15269_v10 = vand.u32 4294901760, %v6305_v6 }
0x137f   :  { %v15272_v39 = vsub.f32 %v6305_v6, %v15269_v10  ;;  %v6979_v6 = vld [vmem:[#allocation6 + $0x240] sm:$0xff] }
0x1381   :  { %v6411_v4 = vand.u32 4294901760, %v15272_v39 }
0x1383   :  { %v6412_v25 = vsub.f32 %v15272_v39, %v6411_v4 }
0x1385   :  { %v6413_v5 = vand.u32 4294901760, %v6412_v25 }
0x1387   :  { %10485 = vmatmul.mubr.f32.vlgmr.msra.gmra.mrb[10].mxu1 %v6413_v5  ;;  %v6974_v5 = vld [vmem:[#allocation6 + $0x218] sm:$0xff] }
0x1388   :  { %12020 = vmatpush3.bf16.msra.mxu1 %v15194_v1  ;;  %10519 = vmatprep.mubr.msk.f32.mxu1 %vm12688_vm0, %v12689_v63  ;;  %v6971_v1 = vld [vmem:[#allocation6 + $0x200] sm:$0xff] }
0x1389   :  { %12021 = vmatprep.subr.bf16.mxu1 %v12687_v28 }
0x138c   :  { %12023 = vmatpush3.bf16.msra.mxu1 %v12022_v49  ;;  %v6972_v49 = vld [vmem:[#allocation6 + $0x208] sm:$0xff] }
0x138d   :  { %12024 = vmatprep.subr.bf16.mxu1 %v12687_v28 }
0x1390   :  { %12026 = vmatpush3.bf16.msra.mxu1 %v12025_v40  ;;  %v6973_v40 = vld [vmem:[#allocation6 + $0x210] sm:$0xff] }
0x1391   :  { %12027 = vmatprep.subr.bf16.mxu1 %v12687_v28  ;;  %v6999_v25 = vand.u32 4294901760, %v6973_v40 }
0x1393   :  { %v15299_v3 = vsub.f32 %v6973_v40, %v6999_v25  ;;  %v15312_v40 = vsub.f32 %v6977_v31, %v7011_v27 }
0x1394   :  { %12029 = vmatpush3.bf16.msra.mxu1 %v12028_v56  ;;  %v6993_v56 = vand.u32 4294901760, %v6971_v1 }
0x1395   :  { %12030 = vmatprep.subr.bf16.mxu1 %v12687_v28 }
0x1398   :  { %12032 = vmatpush3.bf16.msra.mxu1 %v12031_v26  ;;  %v6996_v26 = vand.u32 4294901760, %v6972_v49 }
0x1399   :  { %12033 = vmatprep.subr.bf16.mxu1 %v12687_v28 }
0x139a   :  { %v15293_v20 = vpack.c.bf16 %v6996_v26, %v6993_v56  ;;  %v15297_v15 = vsub.f32 %v6972_v49, %v6996_v26  ;;  %v7020_v49 = vand.u32 4294901760, %v6980_v12 }
0x139c   :  { %12035 = vmatpush3.bf16.msra.mxu1 %v12034_v8  ;;  %v6975_v8 = vld [vmem:[#allocation6 + $0x220] sm:$0xff]  ;;  %12140 = vmatpush3.bf16.msra.mxu0 %v15293_v20 }
0x139d   :  { %12036 = vmatprep.subr.bf16.mxu1 %v12687_v28  ;;  %v7005_v43 = vand.u32 4294901760, %v6975_v8  ;;  %12141 = vmatprep.subr.bf16.mxu0 %v12687_v28 }
0x139f   :  { %v15305_v44 = vsub.f32 %v6975_v8, %v7005_v43  ;;  %v7093_v8 = vand.u32 4294901760, %v15297_v15 }
0x13a0   :  { %12038 = vmatpush3.bf16.msra.mxu1 %v12037_v34  ;;  %v6976_v34 = vld [vmem:[#allocation6 + $0x228] sm:$0xff] }
0x13a1   :  { %12039 = vmatprep.subr.bf16.mxu1 %v12687_v28  ;;  %v7008_v11 = vand.u32 4294901760, %v6976_v34 }
0x13a3   :  { %v15308_v14 = vsub.f32 %v6976_v34, %v7008_v11 }
0x13a4   :  { %12041 = vmatpush3.bf16.msra.mxu1 %v12040_v35  ;;  %v7002_v35 = vand.u32 4294901760, %v6974_v5 }
0x13a5   :  { %12042 = vmatprep.subr.bf16.mxu1 %v12687_v28 }
0x13a6   :  { %v15301_v55 = vpack.c.bf16 %v7002_v35, %v6999_v25  ;;  %v15303_v38 = vsub.f32 %v6974_v5, %v7002_v35  ;;  %v15318_v5 = vsub.f32 %v6980_v12, %v7020_v49  ;;  %v15332_v12 = vpack.c.bf16 %v7014_v29, %v7011_v27 }
0x13a7   :  { %10520 = vmatmul.mubr.f32.vlgmr.msra.gmra.mrb[10].mxu1 %v15269_v10  ;;  %v16156_v27 = vand.u32 4294901760, %v15013_v23  ;;  %v16161_v23 = vand.u32 4294901760, %v15031_v41  ;;  %v16167_v41 = vand.u32 4294901760, %v15184_v2  ;;  %v6986_v2 = vld [vmem:[#allocation6 + $0x278] sm:$0xff] }
0x13a8   :  { %12044 = vmatpush3.bf16.msra.mxu1 %v12043_v18  ;;  %10554 = vmatprep.mubr.msk.f32.mxu1 %vm12688_vm0, %v12689_v63  ;;  %v15295_v18 = vsub.f32 %v6971_v1, %v6993_v56  ;;  %v7017_v1 = vand.u32 4294901760, %v6979_v6  ;;  %v15314_v56 = vsub.f32 %v6978_v52, %v7014_v29  ;;  %v12091_v29 = vpack.c.bf16 %v6429_v61, %v6422_v47 }
0x13a9   :  { %12045 = vmatprep.subr.bf16.mxu1 %v12687_v28  ;;  %12143 = vmatpush3.bf16.msra.mxu0 %v15301_v55  ;;  %v12097_v47 = vpack.c.bf16 %v16159_v0, %v16158_v36  ;;  %v16160_v61 = vand.u32 4294901760, %v15029_v33  ;;  %v16166_v33 = vand.u32 4294901760, %v15182_v16  ;;  %v6985_v16 = vld [vmem:[#allocation6 + $0x270] sm:$0xff] }
0x13aa   :  { %v15316_v26 = vsub.f32 %v6979_v6, %v7017_v1  ;;  %12144 = vmatprep.subr.bf16.mxu0 %v12687_v28  ;;  %v15467_v6 = vsub.f32 %v6984_v17, %v7032_v53 }
0x13ac   :  { %12047 = vmatpush3.bf16.msra.mxu1 %v12046_v57  ;;  %v15324_v57 = vpack.c.bf16 %v7008_v11, %v7005_v43  ;;  %v7094_v43 = vsub.f32 %v15297_v15, %v7093_v8 }
0x13ad   :  { %12048 = vmatprep.subr.bf16.mxu1 %v12687_v28 }
0x13ae   :  { %12146 = vmatpush3.bf16.msra.mxu0 %v15324_v57 }
0x13af   :  { %12147 = vmatprep.subr.bf16.mxu0 %v12687_v28 }
0x13b0   :  { %12050 = vmatpush3.bf16.msra.mxu1 %v12049_v54  ;;  %v15340_v54 = vpack.c.bf16 %v7020_v49, %v7017_v1 }
0x13b1   :  { %12051 = vmatprep.subr.bf16.mxu1 %v12687_v28 }
0x13b2   :  { %12149 = vmatpush3.bf16.msra.mxu0 %v15332_v12 }
0x13b3   :  { %12150 = vmatprep.subr.bf16.mxu0 %v12687_v28 }
0x13b4   :  { %12053 = vmatpush3.bf16.msra.mxu1 %v12052_v9  ;;  %v16157_v9 = vand.u32 4294901760, %v15017_v22  ;;  %v12100_v22 = vpack.c.bf16 %v16161_v23, %v16160_v61  ;;  %v16061_v61 = vand.u32 4294901760, %v15305_v44  ;;  %v16060_v23 = vand.u32 4294901760, %v15308_v14 }
0x13b5   :  { %12054 = vmatprep.subr.bf16.mxu1 %v12687_v28 }
0x13b6   :  { %12152 = vmatpush3.bf16.msra.mxu0 %v15340_v54 }
0x13b7   :  { %12153 = vmatprep.subr.bf16.mxu0 %v12687_v28 }
0x13b8   :  { %12056 = vmatpush3.bf16.msra.mxu1 %v12055_v32  ;;  %v12094_v32 = vpack.c.bf16 %v16157_v9, %v16156_v27  ;;  %v7095_v27 = vand.u32 4294901760, %v7094_v43  ;;  %v16063_v9 = vand.u32 4294901760, %v15299_v3 }
0x13b9   :  { %12057 = vmatprep.subr.bf16.mxu1 %v12687_v28 }
0x13ba   :  { %v7101_v0 = vsub.f32 %v15299_v3, %v16063_v9 }
0x13bc   :  { %12059 = vmatpush3.bf16.msra.mxu1 %v12058_v42 }
0x13bd   :  { %12060 = vmatprep.subr.bf16.mxu1 %v12687_v28 }
0x13c0   :  { %12062 = vmatpush3.bf16.msra.mxu1 %v12061_v51  ;;  %v12106_v51 = vpack.c.bf16 %v16165_v7, %v16164_v46 }
0x13c1   :  { %12063 = vmatprep.subr.bf16.mxu1 %v12687_v28 }
0x13c4   :  { %12065 = vmatpush3.bf16.msra.mxu1 %v12064_v30  ;;  %v12109_v30 = vpack.c.bf16 %v16167_v41, %v16166_v33  ;;  %v16059_v33 = vand.u32 4294901760, %v15312_v40  ;;  %v16058_v41 = vand.u32 4294901760, %v15314_v56 }
0x13c5   :  { %12066 = vmatprep.subr.bf16.mxu1 %v12687_v28 }
0x13c7   :  { %10555 = vmatmul.mubr.f32.vlgmr.msra.gmra.mrb[10].mxu1 %v15272_v39  ;;  %v16163_v39 = vand.u32 4294901760, %v15035_v59  ;;  %v16169_v59 = vand.u32 4294901760, %v15189_v48  ;;  %v7038_v48 = vand.u32 4294901760, %v6986_v2 }
0x13c8   :  { %12068 = vmatpush3.bf16.msra.mxu1 %v15007_v50  ;;  %10589 = vmatprep.mubr.msk.f32.mxu1 %vm12688_vm0, %v12689_v63 }
0x13c9   :  { %12069 = vmatprep.subr.bf16.mxu1 %v12687_v28  ;;  %v15472_v49 = vsub.f32 %v6986_v2, %v7038_v48 }
0x13cc   :  { %12071 = vmatpush3.bf16.msra.mxu1 %v15015_v37 }
0x13cd   :  { %12072 = vmatprep.subr.bf16.mxu1 %v12687_v28 }
0x13d0   :  { %12074 = vmatpush3.bf16.msra.mxu1 %v15041_v19 }
0x13d1   :  { %12075 = vmatprep.subr.bf16.mxu1 %v12687_v28 }
0x13d4   :  { %12077 = vmatpush3.bf16.msra.mxu1 %v15049_v60 }
0x13d5   :  { %12078 = vmatprep.subr.bf16.mxu1 %v12687_v28 }
0x13d8   :  { %12080 = vmatpush3.bf16.msra.mxu1 %v15057_v62 }
0x13d9   :  { %12081 = vmatprep.subr.bf16.mxu1 %v12687_v28 }
0x13dc   :  { %12083 = vmatpush3.bf16.msra.mxu1 %v15160_v24 }
0x13dd   :  { %12084 = vmatprep.subr.bf16.mxu1 %v12687_v28 }
0x13e0   :  { %12086 = vmatpush3.bf16.msra.mxu1 %v15164_v58 }
0x13e1   :  { %12087 = vmatprep.subr.bf16.mxu1 %v12687_v28 }
0x13e4   :  { %12089 = vmatpush3.bf16.msra.mxu1 %v15170_v21 }
0x13e5   :  { %12090 = vmatprep.subr.bf16.mxu1 %v12687_v28 }
0x13e7   :  { %10590 = vmatmul.mubr.f32.vlgmr.msra.gmra.mrb[10].mxu1 %v6411_v4  ;;  %v16162_v4 = vand.u32 4294901760, %v15033_v13  ;;  %v16168_v13 = vand.u32 4294901760, %v15187_v45  ;;  %v7035_v45 = vand.u32 4294901760, %v6985_v16 }
0x13e8   :  { %12092 = vmatpush3.bf16.msra.mxu1 %v12091_v29  ;;  %10624 = vmatprep.mubr.msk.f32.mxu1 %vm12688_vm0, %v12689_v63 }
0x13e9   :  { %12093 = vmatprep.subr.bf16.mxu1 %v12687_v28  ;;  %v12103_v42 = vpack.c.bf16 %v16163_v39, %v16162_v4  ;;  %v12112_v25 = vpack.c.bf16 %v16169_v59, %v16168_v13  ;;  %v15453_v34 = vpack.c.bf16 %v7038_v48, %v7035_v45  ;;  %v15470_v1 = vsub.f32 %v6985_v16, %v7035_v45 }
0x13ea   :  { %v7115_v39 = vsub.f32 %v15305_v44, %v16061_v61  ;;  %v7129_v13 = vsub.f32 %v15312_v40, %v16059_v33  ;;  %v7136_v59 = vsub.f32 %v15314_v56, %v16058_v41 }
0x13ec   :  { %12095 = vmatpush3.bf16.msra.mxu1 %v12094_v32  ;;  %v16062_v32 = vand.u32 4294901760, %v15303_v38  ;;  %v7116_v7 = vand.u32 4294901760, %v7115_v39 }
0x13ed   :  { %12096 = vmatprep.subr.bf16.mxu1 %v12687_v28 }
0x13f0   :  { %12098 = vmatpush3.bf16.msra.mxu1 %v12097_v47  ;;  %v7108_v47 = vsub.f32 %v15303_v38, %v16062_v32 }
0x13f1   :  { %12099 = vmatprep.subr.bf16.mxu1 %v12687_v28 }
0x13f2   :  { %v7109_v4 = vand.u32 4294901760, %v7108_v47 }
0x13f4   :  { %12101 = vmatpush3.bf16.msra.mxu1 %v12100_v22  ;;  %v7102_v22 = vand.u32 4294901760, %v7101_v0  ;;  %v16052_v0 = vand.u32 4294901760, %v15467_v6 }
0x13f5   :  { %12102 = vmatprep.subr.bf16.mxu1 %v12687_v28 }
0x13f6   :  { %v12166_v46 = vpack.c.bf16 %v7109_v4, %v7102_v22  ;;  %v7178_v4 = vsub.f32 %v15467_v6, %v16052_v0 }
0x13f8   :  { %12104 = vmatpush3.bf16.msra.mxu1 %v12103_v42  ;;  %v7122_v42 = vsub.f32 %v15308_v14, %v16060_v23 }
0x13f9   :  { %12105 = vmatprep.subr.bf16.mxu1 %v12687_v28 }
0x13fc   :  { %12107 = vmatpush3.bf16.msra.mxu1 %v12106_v51  ;;  %v7123_v51 = vand.u32 4294901760, %v7122_v42  ;;  %v7179_v42 = vand.u32 4294901760, %v7178_v4  ;;  %v12208_v4 = vpack.c.bf16 %v15472_v49, %v15470_v1 }
0x13fd   :  { %12108 = vmatprep.subr.bf16.mxu1 %v12687_v28 }
0x1400   :  { %12110 = vmatpush3.bf16.msra.mxu1 %v12109_v30  ;;  %v12169_v30 = vpack.c.bf16 %v7123_v51, %v7116_v7  ;;  %v16051_v7 = vand.u32 4294901760, %v15470_v1  ;;  %v16050_v51 = vand.u32 4294901760, %v15472_v49 }
0x1401   :  { %12111 = vmatprep.subr.bf16.mxu1 %v12687_v28 }
0x1404   :  { %12113 = vmatpush3.bf16.msra.mxu1 %v12112_v25  ;;  %v7130_v25 = vand.u32 4294901760, %v7129_v13 }
0x1405   :  { %12114 = vmatprep.subr.bf16.mxu1 %v12687_v28 }
0x1407   :  { %10625 = vmatmul.mubr.f32.vlgmr.msra.gmra.mrb[10].mxu1 %v15269_v10 }
0x1408   :  { %12116 = vmatpush3.bf16.msra.mxu1 %v15007_v50  ;;  %10659 = vmatprep.mubr.msk.f32.mxu1 %vm12688_vm0, %v12689_v63  ;;  %v6981_v50 = vld [vmem:[#allocation6 + $0x250] sm:$0xff] }
0x1409   :  { %12117 = vmatprep.subr.bf16.mxu1 %v12687_v28 }
0x140c   :  { %12119 = vmatpush3.bf16.msra.mxu1 %v15015_v37  ;;  %v6982_v37 = vld [vmem:[#allocation6 + $0x258] sm:$0xff] }
0x140d   :  { %12120 = vmatprep.subr.bf16.mxu1 %v12687_v28 }
0x1410   :  { %12122 = vmatpush3.bf16.msra.mxu1 %v15041_v19  ;;  %v7023_v19 = vand.u32 4294901760, %v6981_v50 }
0x1411   :  { %12123 = vmatprep.subr.bf16.mxu1 %v12687_v28 }
0x1412   :  { %v15461_v11 = vsub.f32 %v6981_v50, %v7023_v19  ;;  %v7137_v50 = vand.u32 4294901760, %v7136_v59  ;;  %v7185_v59 = vsub.f32 %v15470_v1, %v16051_v7 }
0x1414   :  { %12125 = vmatpush3.bf16.msra.mxu1 %v15049_v60  ;;  %v7026_v60 = vand.u32 4294901760, %v6982_v37  ;;  %v16055_v16 = vand.u32 4294901760, %v15461_v11 }
0x1415   :  { %12126 = vmatprep.subr.bf16.mxu1 %v12687_v28 }
0x1416   :  { %v15463_v31 = vsub.f32 %v6982_v37, %v7026_v60  ;;  %v16057_v37 = vand.u32 4294901760, %v15316_v26  ;;  %v7157_v48 = vsub.f32 %v15461_v11, %v16055_v16 }
0x1418   :  { %12128 = vmatpush3.bf16.msra.mxu1 %v15057_v62  ;;  %v15443_v62 = vpack.c.bf16 %v7026_v60, %v7023_v19  ;;  %v16056_v19 = vand.u32 4294901760, %v15318_v5  ;;  %v12172_v60 = vpack.c.bf16 %v7137_v50, %v7130_v25  ;;  %v16054_v2 = vand.u32 4294901760, %v15463_v31 }
0x1419   :  { %12129 = vmatprep.subr.bf16.mxu1 %v12687_v28  ;;  %v7158_v43 = vand.u32 4294901760, %v7157_v48  ;;  %v7192_v25 = vsub.f32 %v15472_v49, %v16050_v51  ;;  %v7186_v50 = vand.u32 4294901760, %v7185_v59  ;;  %v12193_v48 = vpack.c.bf16 %v15308_v14, %v15305_v44 }
0x141a   :  { %12155 = vmatpush3.bf16.msra.mxu0 %v15443_v62  ;;  %v7150_v17 = vsub.f32 %v15318_v5, %v16056_v19 }
0x141b   :  { %12156 = vmatprep.subr.bf16.mxu0 %v12687_v28 }
0x141c   :  { %12131 = vmatpush3.bf16.msra.mxu1 %v15160_v24  ;;  %v6983_v24 = vld [vmem:[#allocation6 + $0x260] sm:$0xff] }
0x141d   :  { %12132 = vmatprep.subr.bf16.mxu1 %v12687_v28 }
0x1420   :  { %12134 = vmatpush3.bf16.msra.mxu1 %v15164_v58  ;;  %v7029_v58 = vand.u32 4294901760, %v6983_v24 }
0x1421   :  { %12135 = vmatprep.subr.bf16.mxu1 %v12687_v28 }
0x1422   :  { %v15465_v52 = vsub.f32 %v6983_v24, %v7029_v58  ;;  %v7143_v24 = vsub.f32 %v15316_v26, %v16057_v37  ;;  %v7644_v37 = vld [vmem:[#allocation6 + $0x2c8] sm:$0xff] }
0x1424   :  { %12137 = vmatpush3.bf16.msra.mxu1 %v15170_v21  ;;  %v15447_v21 = vpack.c.bf16 %v7032_v53, %v7029_v58  ;;  %v7144_v58 = vand.u32 4294901760, %v7143_v24  ;;  %v7151_v53 = vand.u32 4294901760, %v7150_v17  ;;  %v7193_v24 = vand.u32 4294901760, %v7192_v25 }
0x1425   :  { %12282 = vmatprep.subr.bf16.mxu1 %v12687_v28 }
0x1426   :  { %12158 = vmatpush3.bf16.msra.mxu0 %v15447_v21  ;;  %v12175_v45 = vpack.c.bf16 %v7151_v53, %v7144_v58  ;;  %v12184_v17 = vpack.c.bf16 %v7193_v24, %v7186_v50  ;;  %v12187_v58 = vpack.c.bf16 %v15297_v15, %v15295_v18  ;;  %v12190_v53 = vpack.c.bf16 %v15303_v38, %v15299_v3 }
0x1427   :  { %10660 = vmatmul.mubr.f32.vlgmr.msra.gmra.mrb[10].mxu1 %v15269_v10  ;;  %v7086_v10 = vand.u32 4294901760, %v15295_v18  ;;  %12159 = vmatprep.subr.bf16.mxu0 %v12687_v28  ;;  %v16172_v15 = vand.u32 4294901760, %v15305_v44  ;;  %v16179_v44 = vand.u32 4294901760, %v15463_v31 }
0x1428   :  { %10904 = vmatprep.mubr.msk.f32.mxu1 %vm12688_vm0, %v12689_v63 }
0x1429   :  { %v7087_v35 = vsub.f32 %v15295_v18, %v7086_v10  ;;  %v16173_v18 = vand.u32 4294901760, %v15308_v14  ;;  %v16178_v14 = vand.u32 4294901760, %v15461_v11 }
0x142a   :  { %12161 = vmatpush3.bf16.msra.mxu0 %v15453_v34 }
0x142b   :  { %12162 = vmatprep.subr.bf16.mxu0 %v12687_v28  ;;  %v7088_v29 = vand.u32 4294901760, %v7087_v35  ;;  %v7164_v35 = vsub.f32 %v15463_v31, %v16054_v2 }
0x142d   :  { %v15477_v36 = vpack.c.bf16 %v7095_v27, %v7088_v29  ;;  %v7165_v29 = vand.u32 4294901760, %v7164_v35  ;;  %v16053_v27 = vand.u32 4294901760, %v15465_v52  ;;  %v12196_v35 = vpack.c.bf16 %v15314_v56, %v15312_v40 }
0x142f   :  { %v12178_v47 = vpack.c.bf16 %v7165_v29, %v7158_v43  ;;  %v7171_v22 = vsub.f32 %v15465_v52, %v16053_v27  ;;  %v12199_v43 = vpack.c.bf16 %v15318_v5, %v15316_v26  ;;  %v12202_v29 = vpack.c.bf16 %v15463_v31, %v15461_v11  ;;  %v7648_v31 = vld [vmem:[#allocation6 + $0x2e8] sm:$0xff] }
0x1431   :  { %v7172_v39 = vand.u32 4294901760, %v7171_v22  ;;  %v12205_v22 = vpack.c.bf16 %v15467_v6, %v15465_v52 }
0x1433   :  { %v12181_v13 = vpack.c.bf16 %v7179_v42, %v7172_v39  ;;  %v8373_v39 = vld [vmem:[%s15946_s4 + $0x5] ss:$0 sm:$0xff] }
0x14fa   :  { %v6965_v42 = vpop.f32.mrb[10].mxu1 }
0x14fb   :  { %v12431_v59 = vadd.f32 %v8373_v39, %v6965_v42  ;;  %v10661_v25 = vpop.f32.mrb[11].mxu1 }
0x14fc   :  { %v7642_v25 = vld [vmem:[#allocation6 + $0x2b8] sm:$0xff] }
0x14fd   :  { %v6969_v50 = vmax.f32 %v12431_v59, 0.0  ;;  %v7641_v59 = vld [vmem:[#allocation6 + $0x2b0] sm:$0xff]  ;;  %v7678_v9 = vand.u32 4294901760, %v7642_v25 }
0x14fe   :  { %v7675_v32 = vand.u32 4294901760, %v7641_v59 }
0x14ff   :  { %v15552_v24 = vand.u32 4294901760, %v6969_v50 }
0x1501   :  { %v15555_v51 = vsub.f32 %v6969_v50, %v15552_v24  ;;  %v7643_v50 = vld [vmem:[#allocation6 + $0x2c0] sm:$0xff] }
0x1503   :  { %v7075_v7 = vand.u32 4294901760, %v15555_v51 }
0x1505   :  { %v7076_v0 = vsub.f32 %v15555_v51, %v7075_v7 }
0x1507   :  { %v7077_v27 = vand.u32 4294901760, %v7076_v0 }
0x1509   :  { %10695 = vmatmul.mubr.f32.vlgmr.msra.gmra.mrb[12].mxu0 %v7077_v27  ;;  %v7638_v27 = vld [vmem:[#allocation6 + $0x298] sm:$0xff] }
0x150a   :  { %12164 = vmatpush3.bf16.msra.mxu0 %v15477_v36  ;;  %10729 = vmatprep.mubr.msk.f32.mxu0 %vm12688_vm0, %v12689_v63  ;;  %v7635_v36 = vld [vmem:[#allocation6 + $0x280] sm:$0xff] }
0x150b   :  { %12165 = vmatprep.subr.bf16.mxu0 %v12687_v28 }
0x150e   :  { %12167 = vmatpush3.bf16.msra.mxu0 %v12166_v46  ;;  %v7636_v46 = vld [vmem:[#allocation6 + $0x288] sm:$0xff] }
0x150f   :  { %12168 = vmatprep.subr.bf16.mxu0 %v12687_v28 }
0x1512   :  { %12170 = vmatpush3.bf16.msra.mxu0 %v12169_v30  ;;  %v7637_v30 = vld [vmem:[#allocation6 + $0x290] sm:$0xff] }
0x1513   :  { %12171 = vmatprep.subr.bf16.mxu0 %v12687_v28  ;;  %v7663_v0 = vand.u32 4294901760, %v7637_v30 }
0x1515   :  { %v15582_v19 = vsub.f32 %v7637_v30, %v7663_v0  ;;  %v15595_v30 = vsub.f32 %v7641_v59, %v7675_v32 }
0x1516   :  { %12173 = vmatpush3.bf16.msra.mxu0 %v12172_v60  ;;  %v7657_v60 = vand.u32 4294901760, %v7635_v36 }
0x1517   :  { %12174 = vmatprep.subr.bf16.mxu0 %v12687_v28 }
0x151a   :  { %12176 = vmatpush3.bf16.msra.mxu0 %v12175_v45  ;;  %v7660_v45 = vand.u32 4294901760, %v7636_v46 }
0x151b   :  { %12177 = vmatprep.subr.bf16.mxu0 %v12687_v28 }
0x151c   :  { %v15576_v2 = vpack.c.bf16 %v7660_v45, %v7657_v60  ;;  %v15580_v16 = vsub.f32 %v7636_v46, %v7660_v45  ;;  %v7684_v46 = vand.u32 4294901760, %v7644_v37 }
0x151e   :  { %12179 = vmatpush3.bf16.msra.mxu0 %v12178_v47  ;;  %v7639_v47 = vld [vmem:[#allocation6 + $0x2a0] sm:$0xff]  ;;  %12284 = vmatpush3.bf16.msra.mxu1 %v15576_v2 }
0x151f   :  { %12180 = vmatprep.subr.bf16.mxu0 %v12687_v28  ;;  %v7669_v39 = vand.u32 4294901760, %v7639_v47  ;;  %12285 = vmatprep.subr.bf16.mxu1 %v12687_v28 }
0x1521   :  { %v15588_v23 = vsub.f32 %v7639_v47, %v7669_v39  ;;  %v7757_v47 = vand.u32 4294901760, %v15580_v16 }
0x1522   :  { %12182 = vmatpush3.bf16.msra.mxu0 %v12181_v13  ;;  %v7640_v13 = vld [vmem:[#allocation6 + $0x2a8] sm:$0xff] }
0x1523   :  { %12183 = vmatprep.subr.bf16.mxu0 %v12687_v28  ;;  %v7672_v42 = vand.u32 4294901760, %v7640_v13 }
0x1525   :  { %v15591_v61 = vsub.f32 %v7640_v13, %v7672_v42 }
0x1526   :  { %12185 = vmatpush3.bf16.msra.mxu0 %v12184_v17  ;;  %v7666_v17 = vand.u32 4294901760, %v7638_v27 }
0x1527   :  { %12186 = vmatprep.subr.bf16.mxu0 %v12687_v28 }
0x1528   :  { %v15584_v41 = vpack.c.bf16 %v7666_v17, %v7663_v0  ;;  %v15586_v33 = vsub.f32 %v7638_v27, %v7666_v17  ;;  %v15601_v27 = vsub.f32 %v7644_v37, %v7684_v46  ;;  %v15615_v37 = vpack.c.bf16 %v7678_v9, %v7675_v32 }
0x1529   :  { %10730 = vmatmul.mubr.f32.vlgmr.msra.gmra.mrb[12].mxu0 %v15552_v24  ;;  %v16170_v32 = vand.u32 4294901760, %v15299_v3  ;;  %v16175_v3 = vand.u32 4294901760, %v15314_v56  ;;  %v16181_v56 = vand.u32 4294901760, %v15467_v6  ;;  %v7649_v6 = vld [vmem:[#allocation6 + $0x2f0] sm:$0xff] }
0x152a   :  { %12188 = vmatpush3.bf16.msra.mxu0 %v12187_v58  ;;  %10764 = vmatprep.mubr.msk.f32.mxu0 %vm12688_vm0, %v12689_v63  ;;  %v15578_v58 = vsub.f32 %v7635_v36, %v7657_v60  ;;  %v7681_v36 = vand.u32 4294901760, %v7643_v50  ;;  %v15597_v60 = vsub.f32 %v7642_v25, %v7678_v9  ;;  %v12235_v9 = vpack.c.bf16 %v7093_v8, %v7086_v10 }
0x152b   :  { %12189 = vmatprep.subr.bf16.mxu0 %v12687_v28  ;;  %12287 = vmatpush3.bf16.msra.mxu1 %v15584_v41  ;;  %v12241_v10 = vpack.c.bf16 %v16173_v18, %v16172_v15  ;;  %v16174_v8 = vand.u32 4294901760, %v15312_v40  ;;  %v16180_v40 = vand.u32 4294901760, %v15465_v52  ;;  %v7696_v52 = vand.u32 4294901760, %v7648_v31 }
0x152c   :  { %v15599_v45 = vsub.f32 %v7643_v50, %v7681_v36  ;;  %12288 = vmatprep.subr.bf16.mxu1 %v12687_v28 }
0x152d   :  { %v15747_v50 = vsub.f32 %v7648_v31, %v7696_v52 }
0x152e   :  { %12191 = vmatpush3.bf16.msra.mxu0 %v12190_v53  ;;  %v15607_v53 = vpack.c.bf16 %v7672_v42, %v7669_v39  ;;  %v7758_v39 = vsub.f32 %v15580_v16, %v7757_v47 }
0x152f   :  { %12192 = vmatprep.subr.bf16.mxu0 %v12687_v28 }
0x1530   :  { %12290 = vmatpush3.bf16.msra.mxu1 %v15607_v53 }
0x1531   :  { %12291 = vmatprep.subr.bf16.mxu1 %v12687_v28 }
0x1532   :  { %12194 = vmatpush3.bf16.msra.mxu0 %v12193_v48  ;;  %v15623_v48 = vpack.c.bf16 %v7684_v46, %v7681_v36 }
0x1533   :  { %12195 = vmatprep.subr.bf16.mxu0 %v12687_v28 }
0x1534   :  { %12293 = vmatpush3.bf16.msra.mxu1 %v15615_v37 }
0x1535   :  { %12294 = vmatprep.subr.bf16.mxu1 %v12687_v28 }
0x1536   :  { %12197 = vmatpush3.bf16.msra.mxu0 %v12196_v35  ;;  %v16171_v35 = vand.u32 4294901760, %v15303_v38  ;;  %v12244_v38 = vpack.c.bf16 %v16175_v3, %v16174_v8  ;;  %v7778_v8 = vand.u32 4294901760, %v15588_v23  ;;  %v7785_v3 = vand.u32 4294901760, %v15591_v61 }
0x1537   :  { %12198 = vmatprep.subr.bf16.mxu0 %v12687_v28 }
0x1538   :  { %12296 = vmatpush3.bf16.msra.mxu1 %v15623_v48 }
0x1539   :  { %12297 = vmatprep.subr.bf16.mxu1 %v12687_v28 }
0x153a   :  { %12200 = vmatpush3.bf16.msra.mxu0 %v12199_v43  ;;  %v12238_v43 = vpack.c.bf16 %v16171_v35, %v16170_v32  ;;  %v7759_v32 = vand.u32 4294901760, %v7758_v39  ;;  %v7764_v35 = vand.u32 4294901760, %v15582_v19 }
0x153b   :  { %12201 = vmatprep.subr.bf16.mxu0 %v12687_v28 }
0x153c   :  { %v7765_v18 = vsub.f32 %v15582_v19, %v7764_v35 }
0x153e   :  { %12203 = vmatpush3.bf16.msra.mxu0 %v12202_v29 }
0x153f   :  { %12204 = vmatprep.subr.bf16.mxu0 %v12687_v28 }
0x1542   :  { %12206 = vmatpush3.bf16.msra.mxu0 %v12205_v22  ;;  %v12250_v22 = vpack.c.bf16 %v16179_v44, %v16178_v14 }
0x1543   :  { %12207 = vmatprep.subr.bf16.mxu0 %v12687_v28 }
0x1546   :  { %12209 = vmatpush3.bf16.msra.mxu0 %v12208_v4  ;;  %v12253_v4 = vpack.c.bf16 %v16181_v56, %v16180_v40  ;;  %v7792_v40 = vand.u32 4294901760, %v15595_v30  ;;  %v7799_v56 = vand.u32 4294901760, %v15597_v60 }
0x1547   :  { %12210 = vmatprep.subr.bf16.mxu0 %v12687_v28 }
0x1549   :  { %10765 = vmatmul.mubr.f32.vlgmr.msra.gmra.mrb[12].mxu0 %v15555_v51  ;;  %v16177_v51 = vand.u32 4294901760, %v15318_v5  ;;  %v16183_v5 = vand.u32 4294901760, %v15472_v49 }
0x154a   :  { %12212 = vmatpush3.bf16.msra.mxu0 %v15293_v20  ;;  %10799 = vmatprep.mubr.msk.f32.mxu0 %vm12688_vm0, %v12689_v63 }
0x154b   :  { %12213 = vmatprep.subr.bf16.mxu0 %v12687_v28 }
0x154e   :  { %12215 = vmatpush3.bf16.msra.mxu0 %v15301_v55 }
0x154f   :  { %12216 = vmatprep.subr.bf16.mxu0 %v12687_v28 }
0x1552   :  { %12218 = vmatpush3.bf16.msra.mxu0 %v15324_v57 }
0x1553   :  { %12219 = vmatprep.subr.bf16.mxu0 %v12687_v28 }
0x1556   :  { %12221 = vmatpush3.bf16.msra.mxu0 %v15332_v12 }
0x1557   :  { %12222 = vmatprep.subr.bf16.mxu0 %v12687_v28 }
0x155a   :  { %12224 = vmatpush3.bf16.msra.mxu0 %v15340_v54 }
0x155b   :  { %12225 = vmatprep.subr.bf16.mxu0 %v12687_v28 }
0x155e   :  { %12227 = vmatpush3.bf16.msra.mxu0 %v15443_v62 }
0x155f   :  { %12228 = vmatprep.subr.bf16.mxu0 %v12687_v28 }
0x1562   :  { %12230 = vmatpush3.bf16.msra.mxu0 %v15447_v21 }
0x1563   :  { %12231 = vmatprep.subr.bf16.mxu0 %v12687_v28 }
0x1566   :  { %12233 = vmatpush3.bf16.msra.mxu0 %v15453_v34 }
0x1567   :  { %12234 = vmatprep.subr.bf16.mxu0 %v12687_v28 }
0x1569   :  { %10800 = vmatmul.mubr.f32.vlgmr.msra.gmra.mrb[12].mxu0 %v7075_v7  ;;  %v16176_v7 = vand.u32 4294901760, %v15316_v26  ;;  %v16182_v26 = vand.u32 4294901760, %v15470_v1  ;;  %v7699_v1 = vand.u32 4294901760, %v7649_v6 }
0x156a   :  { %12236 = vmatpush3.bf16.msra.mxu0 %v12235_v9  ;;  %10834 = vmatprep.mubr.msk.f32.mxu0 %vm12688_vm0, %v12689_v63 }
0x156b   :  { %12237 = vmatprep.subr.bf16.mxu0 %v12687_v28  ;;  %v12247_v29 = vpack.c.bf16 %v16177_v51, %v16176_v7  ;;  %v12256_v0 = vpack.c.bf16 %v16183_v5, %v16182_v26  ;;  %v15750_v36 = vsub.f32 %v7649_v6, %v7699_v1  ;;  %v7779_v51 = vsub.f32 %v15588_v23, %v7778_v8 }
0x156c   :  { %v7793_v26 = vsub.f32 %v15595_v30, %v7792_v40  ;;  %v7800_v5 = vsub.f32 %v15597_v60, %v7799_v56 }
0x156d   :  { %v7780_v44 = vand.u32 4294901760, %v7779_v51 }
0x156e   :  { %12239 = vmatpush3.bf16.msra.mxu0 %v12238_v43  ;;  %v7771_v43 = vand.u32 4294901760, %v15586_v33 }
0x156f   :  { %12240 = vmatprep.subr.bf16.mxu0 %v12687_v28 }
0x1572   :  { %12242 = vmatpush3.bf16.msra.mxu0 %v12241_v10  ;;  %v7772_v10 = vsub.f32 %v15586_v33, %v7771_v43 }
0x1573   :  { %12243 = vmatprep.subr.bf16.mxu0 %v12687_v28 }
0x1574   :  { %v7773_v7 = vand.u32 4294901760, %v7772_v10 }
0x1576   :  { %12245 = vmatpush3.bf16.msra.mxu0 %v12244_v38  ;;  %v7766_v38 = vand.u32 4294901760, %v7765_v18  ;;  %v16066_v18 = vand.u32 4294901760, %v15747_v50 }
0x1577   :  { %12246 = vmatprep.subr.bf16.mxu0 %v12687_v28 }
0x1578   :  { %v12310_v14 = vpack.c.bf16 %v7773_v7, %v7766_v38  ;;  %v7842_v7 = vsub.f32 %v15747_v50, %v16066_v18 }
0x157a   :  { %12248 = vmatpush3.bf16.msra.mxu0 %v12247_v29  ;;  %v7786_v29 = vsub.f32 %v15591_v61, %v7785_v3 }
0x157b   :  { %12249 = vmatprep.subr.bf16.mxu0 %v12687_v28 }
0x157e   :  { %12251 = vmatpush3.bf16.msra.mxu0 %v12250_v22  ;;  %v7787_v22 = vand.u32 4294901760, %v7786_v29  ;;  %v7843_v29 = vand.u32 4294901760, %v7842_v7 }
0x157f   :  { %12252 = vmatprep.subr.bf16.mxu0 %v12687_v28 }
0x1582   :  { %12254 = vmatpush3.bf16.msra.mxu0 %v12253_v4  ;;  %v12313_v4 = vpack.c.bf16 %v7787_v22, %v7780_v44  ;;  %v16065_v44 = vand.u32 4294901760, %v15750_v36 }
0x1583   :  { %12255 = vmatprep.subr.bf16.mxu0 %v12687_v28 }
0x1586   :  { %12257 = vmatpush3.bf16.msra.mxu0 %v12256_v0  ;;  %v7794_v0 = vand.u32 4294901760, %v7793_v26 }
0x1587   :  { %12258 = vmatprep.subr.bf16.mxu0 %v12687_v28 }
0x1589   :  { %10835 = vmatmul.mubr.f32.vlgmr.msra.gmra.mrb[12].mxu0 %v15552_v24 }
0x158a   :  { %12260 = vmatpush3.bf16.msra.mxu0 %v15293_v20  ;;  %10869 = vmatprep.mubr.msk.f32.mxu0 %vm12688_vm0, %v12689_v63  ;;  %v7646_v20 = vld [vmem:[#allocation6 + $0x2d8] sm:$0xff] }
0x158b   :  { %12261 = vmatprep.subr.bf16.mxu0 %v12687_v28 }
0x158e   :  { %12263 = vmatpush3.bf16.msra.mxu0 %v15301_v55  ;;  %v7645_v55 = vld [vmem:[#allocation6 + $0x2d0] sm:$0xff] }
0x158f   :  { %12264 = vmatprep.subr.bf16.mxu0 %v12687_v28 }
0x1592   :  { %12266 = vmatpush3.bf16.msra.mxu0 %v15324_v57  ;;  %v7687_v57 = vand.u32 4294901760, %v7645_v55 }
0x1593   :  { %12267 = vmatprep.subr.bf16.mxu0 %v12687_v28 }
0x1594   :  { %v15741_v42 = vsub.f32 %v7645_v55, %v7687_v57  ;;  %v7801_v55 = vand.u32 4294901760, %v7800_v5  ;;  %v7849_v5 = vsub.f32 %v15750_v36, %v16065_v44 }
0x1596   :  { %12269 = vmatpush3.bf16.msra.mxu0 %v15332_v12  ;;  %v7690_v12 = vand.u32 4294901760, %v7646_v20  ;;  %v7820_v6 = vand.u32 4294901760, %v15741_v42 }
0x1597   :  { %12270 = vmatprep.subr.bf16.mxu0 %v12687_v28 }
0x1598   :  { %v15723_v11 = vpack.c.bf16 %v7690_v12, %v7687_v57  ;;  %v15743_v59 = vsub.f32 %v7646_v20, %v7690_v12  ;;  %v7806_v20 = vand.u32 4294901760, %v15599_v45  ;;  %v7813_v57 = vand.u32 4294901760, %v15601_v27 }
0x1599   :  { %v12316_v12 = vpack.c.bf16 %v7801_v55, %v7794_v0  ;;  %v7850_v55 = vand.u32 4294901760, %v7849_v5 }
0x159a   :  { %12272 = vmatpush3.bf16.msra.mxu0 %v15340_v54  ;;  %v7647_v54 = vld [vmem:[#allocation6 + $0x2e0] sm:$0xff]  ;;  %12299 = vmatpush3.bf16.msra.mxu1 %v15723_v11  ;;  %v7814_v31 = vsub.f32 %v15601_v27, %v7813_v57 }
0x159b   :  { %12273 = vmatprep.subr.bf16.mxu0 %v12687_v28  ;;  %12300 = vmatprep.subr.bf16.mxu1 %v12687_v28 }
0x159e   :  { %12275 = vmatpush3.bf16.msra.mxu0 %v15443_v62  ;;  %v7693_v62 = vand.u32 4294901760, %v7647_v54 }
0x159f   :  { %12276 = vmatprep.subr.bf16.mxu0 %v12687_v28 }
0x15a0   :  { %v15745_v25 = vsub.f32 %v7647_v54, %v7693_v62  ;;  %v7807_v54 = vsub.f32 %v15599_v45, %v7806_v20 }
0x15a2   :  { %12278 = vmatpush3.bf16.msra.mxu0 %v15447_v21  ;;  %v15727_v21 = vpack.c.bf16 %v7696_v52, %v7693_v62  ;;  %v7808_v62 = vand.u32 4294901760, %v7807_v54  ;;  %v7815_v52 = vand.u32 4294901760, %v7814_v31 }
0x15a3   :  { %12279 = vmatprep.subr.bf16.mxu0 %v12687_v28 }
0x15a4   :  { %12302 = vmatpush3.bf16.msra.mxu1 %v15727_v21 }
0x15a5   :  { %12303 = vmatprep.subr.bf16.mxu1 %v12687_v28 }
0x15a6   :  { %12281 = vmatpush3.bf16.msra.mxu0 %v15453_v34  ;;  %v7650_v34 = vld [vmem:[#allocation6 + $0x2f8] sm:$0xff] }
0x15a7   :  { %v7702_v49 = vand.u32 4294901760, %v7650_v34 }
0x15a9   :  { %10870 = vmatmul.mubr.f32.vlgmr.msra.gmra.mrb[12].mxu0 %v15552_v24  ;;  %v7750_v24 = vand.u32 4294901760, %v15578_v58  ;;  %v15733_v13 = vpack.c.bf16 %v7702_v49, %v7699_v1  ;;  %v15752_v46 = vsub.f32 %v7650_v34, %v7702_v49  ;;  %v7827_v34 = vand.u32 4294901760, %v15743_v59 }
0x15aa   :  { %v12319_v1 = vpack.c.bf16 %v7815_v52, %v7808_v62  ;;  %v7821_v49 = vsub.f32 %v15741_v42, %v7820_v6  ;;  %v12331_v62 = vpack.c.bf16 %v15580_v16, %v15578_v58  ;;  %v12334_v52 = vpack.c.bf16 %v15586_v33, %v15582_v19 }
0x15ab   :  { %v7751_v17 = vsub.f32 %v15578_v58, %v7750_v24  ;;  %12305 = vmatpush3.bf16.msra.mxu1 %v15733_v13  ;;  %v16064_v22 = vand.u32 4294901760, %v15752_v46  ;;  %v12352_v7 = vpack.c.bf16 %v15752_v46, %v15750_v36  ;;  %v12385_v16 = vpack.c.bf16 %v7785_v3, %v7778_v8 }
0x15ac   :  { %12306 = vmatprep.subr.bf16.mxu1 %v12687_v28  ;;  %v7822_v39 = vand.u32 4294901760, %v7821_v49  ;;  %v12337_v49 = vpack.c.bf16 %v15591_v61, %v15588_v23  ;;  %v12388_v33 = vpack.c.bf16 %v7799_v56, %v7792_v40  ;;  %v12391_v19 = vpack.c.bf16 %v7813_v57, %v7806_v20 }
0x15ad   :  { %v7752_v9 = vand.u32 4294901760, %v7751_v17  ;;  %v7828_v17 = vsub.f32 %v15743_v59, %v7827_v34  ;;  %v7856_v0 = vsub.f32 %v15752_v46, %v16064_v22  ;;  %v12394_v61 = vpack.c.bf16 %v7827_v34, %v7820_v6 }
0x15ae   :  { %v16184_v23 = vand.u32 4294901760, %v15745_v25  ;;  %v16185_v58 = vand.u32 4294901760, %v15747_v50 }
0x15af   :  { %v15757_v15 = vpack.c.bf16 %v7759_v32, %v7752_v9  ;;  %v7829_v9 = vand.u32 4294901760, %v7828_v17  ;;  %v16067_v32 = vand.u32 4294901760, %v15745_v25  ;;  %v7857_v54 = vand.u32 4294901760, %v7856_v0 }
0x15b0   :  { %v12340_v17 = vpack.c.bf16 %v15597_v60, %v15595_v30  ;;  %v12397_v30 = vpack.c.bf16 %v16185_v58, %v16184_v23  ;;  %v16186_v60 = vand.u32 4294901760, %v15750_v36 }
0x15b1   :  { %v12322_v10 = vpack.c.bf16 %v7829_v9, %v7822_v39  ;;  %v7835_v38 = vsub.f32 %v15745_v25, %v16067_v32  ;;  %v12328_v31 = vpack.c.bf16 %v7857_v54, %v7850_v55  ;;  %v12343_v39 = vpack.c.bf16 %v15601_v27, %v15599_v45 }
0x15b2   :  { %v12346_v9 = vpack.c.bf16 %v15743_v59, %v15741_v42  ;;  %v16187_v45 = vand.u32 4294901760, %v15752_v46 }
0x15b3   :  { %v7836_v51 = vand.u32 4294901760, %v7835_v38  ;;  %v12349_v38 = vpack.c.bf16 %v15747_v50, %v15745_v25 }
0x15b4   :  { %v12400_v27 = vpack.c.bf16 %v16187_v45, %v16186_v60 }
0x15b5   :  { %v12325_v26 = vpack.c.bf16 %v7843_v29, %v7836_v51  ;;  %v8374_v51 = vld [vmem:[%s15946_s4 + $0x6] ss:$0 sm:$0xff] }
0x167c   :  { %v7629_v29 = vpop.f32.mrb[12].mxu0 }
0x167d   :  { %v12432_v5 = vadd.f32 %v8374_v51, %v7629_v29  ;;  %v10871_v0 = vpop.f32.mrb[13].mxu0 }
0x167f   :  { %v7633_v55 = vmax.f32 %v12432_v5, 0.0 }
0x1681   :  { %v15832_v54 = vand.u32 4294901760, %v7633_v55 }
0x1683   :  { %v7738_v22 = vsub.f32 %v7633_v55, %v15832_v54 }
0x1685   :  { %v7739_v44 = vand.u32 4294901760, %v7738_v22 }
0x1687   :  { %v7740_v18 = vsub.f32 %v7738_v22, %v7739_v44 }
0x1689   :  { %v7741_v32 = vand.u32 4294901760, %v7740_v18 }
0x168b   :  { %10905 = vmatmul.mubr.f32.vlgmr.msra.gmra.mrb[12].mxu1 %v7741_v32 }
0x168c   :  { %12308 = vmatpush3.bf16.msra.mxu1 %v15757_v15  ;;  %10939 = vmatprep.mubr.msk.f32.mxu1 %vm12688_vm0, %v12689_v63  ;;  %v12379_v15 = vpack.c.bf16 %v7757_v47, %v7750_v24 }
0x168d   :  { %12309 = vmatprep.subr.bf16.mxu1 %v12687_v28 }
0x1690   :  { %12311 = vmatpush3.bf16.msra.mxu1 %v12310_v14  ;;  %v12382_v14 = vpack.c.bf16 %v7771_v43, %v7764_v35 }
0x1691   :  { %12312 = vmatprep.subr.bf16.mxu1 %v12687_v28 }
0x1694   :  { %12314 = vmatpush3.bf16.msra.mxu1 %v12313_v4 }
0x1695   :  { %12315 = vmatprep.subr.bf16.mxu1 %v12687_v28 }
0x1698   :  { %12317 = vmatpush3.bf16.msra.mxu1 %v12316_v12 }
0x1699   :  { %12318 = vmatprep.subr.bf16.mxu1 %v12687_v28 }
0x169c   :  { %12320 = vmatpush3.bf16.msra.mxu1 %v12319_v1 }
0x169d   :  { %12321 = vmatprep.subr.bf16.mxu1 %v12687_v28 }
0x16a0   :  { %12323 = vmatpush3.bf16.msra.mxu1 %v12322_v10 }
0x16a1   :  { %12324 = vmatprep.subr.bf16.mxu1 %v12687_v28 }
0x16a4   :  { %12326 = vmatpush3.bf16.msra.mxu1 %v12325_v26 }
0x16a5   :  { %12327 = vmatprep.subr.bf16.mxu1 %v12687_v28 }
0x16a8   :  { %12329 = vmatpush3.bf16.msra.mxu1 %v12328_v31 }
0x16a9   :  { %12330 = vmatprep.subr.bf16.mxu1 %v12687_v28 }
0x16ab   :  { %10940 = vmatmul.mubr.f32.vlgmr.msra.gmra.mrb[12].mxu1 %v15832_v54 }
0x16ac   :  { %12332 = vmatpush3.bf16.msra.mxu1 %v12331_v62  ;;  %10974 = vmatprep.mubr.msk.f32.mxu1 %vm12688_vm0, %v12689_v63 }
0x16ad   :  { %12333 = vmatprep.subr.bf16.mxu1 %v12687_v28 }
0x16b0   :  { %12335 = vmatpush3.bf16.msra.mxu1 %v12334_v52 }
0x16b1   :  { %12336 = vmatprep.subr.bf16.mxu1 %v12687_v28 }
0x16b4   :  { %12338 = vmatpush3.bf16.msra.mxu1 %v12337_v49 }
0x16b5   :  { %12339 = vmatprep.subr.bf16.mxu1 %v12687_v28 }
0x16b8   :  { %12341 = vmatpush3.bf16.msra.mxu1 %v12340_v17 }
0x16b9   :  { %12342 = vmatprep.subr.bf16.mxu1 %v12687_v28 }
0x16bc   :  { %12344 = vmatpush3.bf16.msra.mxu1 %v12343_v39 }
0x16bd   :  { %12345 = vmatprep.subr.bf16.mxu1 %v12687_v28 }
0x16c0   :  { %12347 = vmatpush3.bf16.msra.mxu1 %v12346_v9 }
0x16c1   :  { %12348 = vmatprep.subr.bf16.mxu1 %v12687_v28 }
0x16c4   :  { %12350 = vmatpush3.bf16.msra.mxu1 %v12349_v38 }
0x16c5   :  { %12351 = vmatprep.subr.bf16.mxu1 %v12687_v28 }
0x16c8   :  { %12353 = vmatpush3.bf16.msra.mxu1 %v12352_v7 }
0x16c9   :  { %12354 = vmatprep.subr.bf16.mxu1 %v12687_v28 }
0x16cb   :  { %10975 = vmatmul.mubr.f32.vlgmr.msra.gmra.mrb[12].mxu1 %v7738_v22 }
0x16cc   :  { %12356 = vmatpush3.bf16.msra.mxu1 %v15576_v2  ;;  %11009 = vmatprep.mubr.msk.f32.mxu1 %vm12688_vm0, %v12689_v63 }
0x16cd   :  { %12357 = vmatprep.subr.bf16.mxu1 %v12687_v28 }
0x16d0   :  { %12359 = vmatpush3.bf16.msra.mxu1 %v15584_v41 }
0x16d1   :  { %12360 = vmatprep.subr.bf16.mxu1 %v12687_v28 }
0x16d4   :  { %12362 = vmatpush3.bf16.msra.mxu1 %v15607_v53 }
0x16d5   :  { %12363 = vmatprep.subr.bf16.mxu1 %v12687_v28 }
0x16d8   :  { %12365 = vmatpush3.bf16.msra.mxu1 %v15615_v37 }
0x16d9   :  { %12366 = vmatprep.subr.bf16.mxu1 %v12687_v28 }
0x16dc   :  { %12368 = vmatpush3.bf16.msra.mxu1 %v15623_v48 }
0x16dd   :  { %12369 = vmatprep.subr.bf16.mxu1 %v12687_v28 }
0x16e0   :  { %12371 = vmatpush3.bf16.msra.mxu1 %v15723_v11 }
0x16e1   :  { %12372 = vmatprep.subr.bf16.mxu1 %v12687_v28 }
0x16e4   :  { %12374 = vmatpush3.bf16.msra.mxu1 %v15727_v21 }
0x16e5   :  { %12375 = vmatprep.subr.bf16.mxu1 %v12687_v28 }
0x16e8   :  { %12377 = vmatpush3.bf16.msra.mxu1 %v15733_v13 }
0x16e9   :  { %12378 = vmatprep.subr.bf16.mxu1 %v12687_v28 }
0x16eb   :  { %11010 = vmatmul.mubr.f32.vlgmr.msra.gmra.mrb[12].mxu1 %v7739_v44 }
0x16ec   :  { %12380 = vmatpush3.bf16.msra.mxu1 %v12379_v15  ;;  %11044 = vmatprep.mubr.msk.f32.mxu1 %vm12688_vm0, %v12689_v63 }
0x16ed   :  { %12381 = vmatprep.subr.bf16.mxu1 %v12687_v28 }
0x16f0   :  { %12383 = vmatpush3.bf16.msra.mxu1 %v12382_v14 }
0x16f1   :  { %12384 = vmatprep.subr.bf16.mxu1 %v12687_v28 }
0x16f4   :  { %12386 = vmatpush3.bf16.msra.mxu1 %v12385_v16 }
0x16f5   :  { %12387 = vmatprep.subr.bf16.mxu1 %v12687_v28 }
0x16f8   :  { %12389 = vmatpush3.bf16.msra.mxu1 %v12388_v33 }
0x16f9   :  { %12390 = vmatprep.subr.bf16.mxu1 %v12687_v28 }
0x16fc   :  { %12392 = vmatpush3.bf16.msra.mxu1 %v12391_v19 }
0x16fd   :  { %12393 = vmatprep.subr.bf16.mxu1 %v12687_v28 }
0x1700   :  { %12395 = vmatpush3.bf16.msra.mxu1 %v12394_v61 }
0x1701   :  { %12396 = vmatprep.subr.bf16.mxu1 %v12687_v28 }
0x1704   :  { %12398 = vmatpush3.bf16.msra.mxu1 %v12397_v30 }
0x1705   :  { %12399 = vmatprep.subr.bf16.mxu1 %v12687_v28 }
0x1708   :  { %12401 = vmatpush3.bf16.msra.mxu1 %v12400_v27 }
0x1709   :  { %12402 = vmatprep.subr.bf16.mxu1 %v12687_v28 }
0x170b   :  { %11045 = vmatmul.mubr.f32.vlgmr.msra.gmra.mrb[12].mxu1 %v15832_v54 }
0x170c   :  { %12404 = vmatpush3.bf16.msra.mxu1 %v15576_v2  ;;  %11079 = vmatprep.mubr.msk.f32.mxu1 %vm12688_vm0, %v12689_v63  ;;  %v8375_v63 = vld [vmem:[%s15946_s4 + $0x7] ss:$0 sm:$0xff] }
0x170d   :  { %12405 = vmatprep.subr.bf16.mxu1 %v12687_v28 }
0x1710   :  { %12407 = vmatpush3.bf16.msra.mxu1 %v15584_v41 }
0x1711   :  { %12408 = vmatprep.subr.bf16.mxu1 %v12687_v28 }
0x1714   :  { %12410 = vmatpush3.bf16.msra.mxu1 %v15607_v53 }
0x1715   :  { %12411 = vmatprep.subr.bf16.mxu1 %v12687_v28 }
0x1718   :  { %12413 = vmatpush3.bf16.msra.mxu1 %v15615_v37 }
0x1719   :  { %12414 = vmatprep.subr.bf16.mxu1 %v12687_v28 }
0x171c   :  { %12416 = vmatpush3.bf16.msra.mxu1 %v15623_v48 }
0x171d   :  { %12417 = vmatprep.subr.bf16.mxu1 %v12687_v28 }
0x1720   :  { %12419 = vmatpush3.bf16.msra.mxu1 %v15723_v11 }
0x1721   :  { %12420 = vmatprep.subr.bf16.mxu1 %v12687_v28 }
0x1724   :  { %12422 = vmatpush3.bf16.msra.mxu1 %v15727_v21 }
0x1725   :  { %12423 = vmatprep.subr.bf16.mxu1 %v12687_v28 }
0x1728   :  { %12425 = vmatpush3.bf16.msra.mxu1 %v15733_v13 }
0x172b   :  { %11080 = vmatmul.mubr.f32.vlgmr.msra.gmra.mrb[12].mxu1 %v15832_v54 }
0x17fe   :  { %v8293_v41 = vpop.f32.mrb[12].mxu1 }
0x17ff   :  { %v12433_v2 = vadd.f32 %v8375_v63, %v8293_v41  ;;  %v11081_v53 = vpop.f32.mrb[13].mxu1 }
0x1801   :  { %8297 = vst [vmem:[%s15947_s5] sm:$0xff] %v12433_v2 }
0x1802   :  { %8302 = vsyncpa [#allocation3], 1 }
0x1803   :  { %8303 = vsyncpa [#allocation5], 1 }

</bundles_post_ra>
